<compile_context>
chip_gen: v7x
topology: tpu7x:2x2x1
jax: 0.10.0
libtpu: 0.0.40
codegen_flags: <defaults>
</compile_context>

<pallas_src>
import math
from functools import partial

import numpy as np
import jax
import jax.numpy as jnp
from jax.experimental import pallas as pl
from jax.experimental.pallas import tpu as pltpu

# ----------------------------- PAF config (synthetic, small) -----------------------------
LAYER = 2          # paf_config.LAYER
HIDDEN = 32        # emb_size / hidden size
HEADS = 4          # multi-head count
DH = HIDDEN // HEADS
FF = 64            # feed-forward size
USING_PAF = True
LN_EPS = 1e-6
NEG_INF = -1e9
SLAB_W = 128       # lane width of the packed weight slab


# --------------------------------- weight slab packing ---------------------------------
class _SlabPacker:
    """Packs many small 2-D f32 arrays into one (rows, 128) slab, 8-row aligned."""

    def __init__(self, width=SLAB_W):
        self.width = width
        self.rows = 0
        self.chunks = []   # (row_offset, np.ndarray)

    def add(self, arr):
        arr = np.asarray(arr, np.float32)
        r, c = arr.shape
        assert c <= self.width, f"array too wide for slab: {arr.shape}"
        off = ((self.rows + 7) // 8) * 8          # sublane-align every entry
        self.chunks.append((off, arr))
        self.rows = off + r
        return (off, r, c)                        # static metadata used in-kernel

    def finalize(self):
        total = ((self.rows + 7) // 8) * 8
        slab = np.zeros((total, self.width), np.float32)
        for off, a in self.chunks:
            slab[off:off + a.shape[0], :a.shape[1]] = a
        return jnp.asarray(slab)


def pack_params(params):
    """Repack the nested parameter dict into one slab + static (offset, rows, cols) metadata."""
    packer = _SlabPacker()
    scale = 1.0 / math.sqrt(DH)

    def pack_mha(p):
        # Fused QKV, q-scale folded into the Q columns (algebraically = scores / sqrt(dh)).
        wqkv = jnp.concatenate([p["wq"] * scale, p["wk"], p["wv"]], axis=1)   # (D, 3D)
        bqkv = jnp.concatenate([p["bq"] * scale, p["bk"], p["bv"]], axis=1)   # (1, 3D)
        return {"wqkv": packer.add(wqkv), "bqkv": packer.add(bqkv),
                "wo": packer.add(p["wo"]), "bo": packer.add(p["bo"])}

    def pack_ffn(p):
        return {k: packer.add(p[k]) for k in ("w1", "b1", "w2", "b2")}

    def pack_ln(p):
        return {"g": packer.add(p["g"]), "b": packer.add(p["b"])}

    enc, dec = [], []
    for pe in params["enc"]:
        enc.append({"mhatt": pack_mha(pe["mhatt"]), "ffn": pack_ffn(pe["ffn"]),
                    "ln1": pack_ln(pe["ln1"]), "ln2": pack_ln(pe["ln2"])})
    for pd in params["dec"]:
        dec.append({"mhatt1": pack_mha(pd["mhatt1"]), "mhatt2": pack_mha(pd["mhatt2"]),
                    "ffn": pack_ffn(pd["ffn"]),
                    "ln1": pack_ln(pd["ln1"]), "ln2": pack_ln(pd["ln2"]),
                    "ln3": pack_ln(pd["ln3"])})
    return packer.finalize(), {"enc": enc, "dec": dec}


# --------------------- in-kernel building blocks (all traced inside ONE kernel) ---------------------
def _ld(slab_ref, entry):
    """Lazy, zero-copy-view load of one packed weight at its point of use."""
    off, r, c = entry
    return slab_ref[off:off + r, 0:c]


def _mha(slab, m, xq, xkv, bias, *, self_attn):
    """Multi-head attention. xq: (Lq, D) queries; xkv: (Lk, D) keys/values.
    bias: (1, Lk) additive key-padding bias (0 valid, -1e9 pad). 1/sqrt(dh) is
    pre-folded into the Q columns of the packed Wqkv."""
    D, H, dh = HIDDEN, HEADS, DH
    w = _ld(slab, m["wqkv"])            # (D, 3D)
    b = _ld(slab, m["bqkv"])            # (1, 3D)

    if self_attn:                        # one fused lane-dense QKV matmul
        qkv = jnp.dot(xq, w, preferred_element_type=jnp.float32) + b      # (L, 3D)
        q, k, v = qkv[:, 0:D], qkv[:, D:2 * D], qkv[:, 2 * D:3 * D]
    else:                                # cross-attention: q from xq, k|v from xkv
        q = jnp.dot(xq, w[:, 0:D], preferred_element_type=jnp.float32) + b[:, 0:D]
        kv = jnp.dot(xkv, w[:, D:3 * D], preferred_element_type=jnp.float32) + b[:, D:3 * D]
        k, v = kv[:, 0:D], kv[:, D:2 * D]

    heads = []
    for h in range(H):                   # static unroll, H=4; per-head static lane slices
        qh = q[:, h * dh:(h + 1) * dh]                                     # (Lq, dh)
        kh = k[:, h * dh:(h + 1) * dh]                                     # (Lk, dh)
        vh = v[:, h * dh:(h + 1) * dh]                                     # (Lk, dh)
        s = jax.lax.dot_general(qh, kh, (((1,), (1,)), ((), ())),
                                preferred_element_type=jnp.float32) + bias  # (Lq, Lk)
        s = s - jnp.max(s, axis=-1, keepdims=True)
        e = jnp.exp(s)
        # approx reciprocal -> rows sum to 1 +/- ~1e-4; acceptable for inference
        pr = e * pl.reciprocal(jnp.sum(e, axis=-1, keepdims=True), approx=True)
        heads.append(jnp.dot(pr, vh, preferred_element_type=jnp.float32))  # (Lq, dh)

    att = jnp.concatenate(heads, axis=-1)                                  # (Lq, D)
    wo = _ld(slab, m["wo"])
    bo = _ld(slab, m["bo"])
    return jnp.dot(att, wo, preferred_element_type=jnp.float32) + bo       # one dense (D,D) matmul


def _ffn(slab, m, x):
    h = jnp.dot(x, _ld(slab, m["w1"]), preferred_element_type=jnp.float32) + _ld(slab, m["b1"])
    h = jnp.maximum(h, 0.0)
    return jnp.dot(h, _ld(slab, m["w2"]), preferred_element_type=jnp.float32) + _ld(slab, m["b2"])


def _ln_res(slab, m, x, r):
    # LayerNorm(x + residual) over features (biased variance, eps inside sqrt).
    h = x + r
    mu = jnp.mean(h, axis=-1, keepdims=True)
    var = jnp.mean((h - mu) * (h - mu), axis=-1, keepdims=True)
    return (h - mu) * jax.lax.rsqrt(var + LN_EPS) * _ld(slab, m["g"]) + _ld(slab, m["b"])


def _sf_block(slab, m, y, y_bias):
    # y = norm1(y + mhatt(y,y,y,y_mask)); y = norm2(y + ffn(y))
    y = _ln_res(slab, m["ln1"], y, _mha(slab, m["mhatt"], y, y, y_bias, self_attn=True))
    y = _ln_res(slab, m["ln2"], y, _ffn(slab, m["ffn"], y))
    return y


def _if_block(slab, m, x, y, x_bias, y_bias):
    # x = norm1(x + mhatt1(x,x,x,x_mask)); x = norm2(x + mhatt2(v=y,k=y,q=x,y_mask)); x = norm3(x + ffn(x))
    x = _ln_res(slab, m["ln1"], x, _mha(slab, m["mhatt1"], x, x, x_bias, self_attn=True))
    x = _ln_res(slab, m["ln2"], x, _mha(slab, m["mhatt2"], x, y, y_bias, self_attn=False))
    x = _ln_res(slab, m["ln3"], x, _ffn(slab, m["ffn"], x))
    return x


# --------------------------------- the fused backbone kernel ---------------------------------
def backbone_kernel(act_ref, yb_ref, xb_ref, slab_ref, out_ref, *,
                    meta, Ly, Lx, using_paf):
    # act_ref: (Ly+Lx, D) this batch element's y|x activations (row-concatenated)
    y = act_ref[0:Ly, :]
    x = act_ref[Ly:Ly + Lx, :]
    y_bias = yb_ref[...]      # (1, Ly), precomputed (1-mask)*-1e9 in the wrapper
    x_bias = xb_ref[...]      # (1, Lx)

    if using_paf:
        for me, md in zip(meta["enc"], meta["dec"]):
            y = _sf_block(slab_ref, me, y, y_bias)
            x = _if_block(slab_ref, md, x, y, x_bias, y_bias)
    else:
        for me in meta["enc"]:
            y = _sf_block(slab_ref, me, y, y_bias)
        for md in meta["dec"]:
            x = _if_block(slab_ref, md, x, y, x_bias, y_bias)

    out_ref[0:Ly, :] = y.astype(out_ref.dtype)
    out_ref[Ly:Ly + Lx, :] = x.astype(out_ref.dtype)


# --------------------------------------- wrapper ---------------------------------------
def paf_backbone_forward(y, x, y_mask, x_mask, slab, meta, using_paf=USING_PAF):
    B, Ly, D = y.shape
    Lx = x.shape[1]
    R = slab.shape[0]

    # Row-concat y|x into one activation slab; precompute additive key-padding biases here
    # (moves the (1-mask)*-1e9 VPU work out of the kernel).
    act = jnp.concatenate([y, x], axis=1).astype(jnp.float32)                    # (B, Ly+Lx, D)
    y_bias = ((1.0 - y_mask.astype(jnp.float32)) * NEG_INF)[:, None, :]          # (B, 1, Ly)
    x_bias = ((1.0 - x_mask.astype(jnp.float32)) * NEG_INF)[:, None, :]          # (B, 1, Lx)

    kernel = partial(backbone_kernel, meta=meta, Ly=Ly, Lx=Lx, using_paf=using_paf)

    out = pl.pallas_call(
        kernel,
        grid=(B,),
        in_specs=[
            pl.BlockSpec((None, Ly + Lx, D), lambda b: (b, 0, 0)),   # activations (per batch)
            pl.BlockSpec((None, 1, Ly), lambda b: (b, 0, 0)),        # y key-padding bias
            pl.BlockSpec((None, 1, Lx), lambda b: (b, 0, 0)),        # x key-padding bias
            pl.BlockSpec((R, SLAB_W), lambda b: (0, 0)),             # weight slab, VMEM-resident
        ],
        out_specs=pl.BlockSpec((None, Ly + Lx, D), lambda b: (b, 0, 0)),
        out_shape=jax.ShapeDtypeStruct((B, Ly + Lx, D), jnp.float32),
        compiler_params=pltpu.CompilerParams(
            dimension_semantics=("parallel",)),                      # 2 TCs on v7x; no-op on v5e/v6e
    )(act, y_bias, x_bias, slab)

    return out[:, :Ly, :], out[:, Ly:, :]


# ------------------------------ deterministic parameter init ------------------------------
def init_linear(key, din, dout):
    k1, k2 = jax.random.split(key)
    w = jax.random.normal(k1, (din, dout), jnp.float32) * (1.0 / math.sqrt(din))
    b = jax.random.normal(k2, (1, dout), jnp.float32) * 0.01
    return w, b


def init_mha(key):
    ks = jax.random.split(key, 4)
    p = {}
    for name, k in zip(("q", "k", "v", "o"), ks):
        w, b = init_linear(k, HIDDEN, HIDDEN)
        p["w" + name] = w
        p["b" + name] = b
    return p


def init_ln():
    return {"g": jnp.ones((1, HIDDEN), jnp.float32),
            "b": jnp.zeros((1, HIDDEN), jnp.float32)}


def init_ffn(key):
    k1, k2 = jax.random.split(key)
    w1, b1 = init_linear(k1, HIDDEN, FF)
    w2, b2 = init_linear(k2, FF, HIDDEN)
    return {"w1": w1, "b1": b1, "w2": w2, "b2": b2}


def init_backbone(key):
    enc, dec = [], []
    keys = jax.random.split(key, 2 * LAYER)
    for i in range(LAYER):
        ke = jax.random.split(keys[i], 2)
        enc.append({"mhatt": init_mha(ke[0]), "ffn": init_ffn(ke[1]),
                    "ln1": init_ln(), "ln2": init_ln()})
        kd = jax.random.split(keys[LAYER + i], 3)
        dec.append({"mhatt1": init_mha(kd[0]), "mhatt2": init_mha(kd[1]),
                    "ffn": init_ffn(kd[2]),
                    "ln1": init_ln(), "ln2": init_ln(), "ln3": init_ln()})
    return {"enc": enc, "dec": dec}


# ------------------------------ pure-JAX reference (tolerance check) ------------------------------
_HI = jax.lax.Precision.HIGHEST


def _ref_mha(p, xq, xkv, bias):
    q = jnp.dot(xq, p["wq"], precision=_HI) + p["bq"]
    k = jnp.dot(xkv, p["wk"], precision=_HI) + p["bk"]
    v = jnp.dot(xkv, p["wv"], precision=_HI) + p["bv"]
    outs = []
    for h in range(HEADS):
        sl = slice(h * DH, (h + 1) * DH)
        s = jnp.dot(q[:, sl], k[:, sl].T, precision=_HI) / math.sqrt(DH) + bias
        a = jax.nn.softmax(s, axis=-1)
        outs.append(jnp.dot(a, v[:, sl], precision=_HI))
    att = jnp.concatenate(outs, axis=-1)
    return jnp.dot(att, p["wo"], precision=_HI) + p["bo"]


def _ref_ffn(p, x):
    h = jnp.maximum(jnp.dot(x, p["w1"], precision=_HI) + p["b1"], 0.0)
    return jnp.dot(h, p["w2"], precision=_HI) + p["b2"]


def _ref_ln(p, h):
    mu = jnp.mean(h, -1, keepdims=True)
    var = jnp.mean((h - mu) ** 2, -1, keepdims=True)
    return (h - mu) / jnp.sqrt(var + LN_EPS) * p["g"] + p["b"]


def reference_forward(y, x, y_mask, x_mask, params, using_paf=True):
    B = y.shape[0]
    ys, xs = [], []
    for b in range(B):
        yb, xb = y[b], x[b]
        ybias = ((1.0 - y_mask[b].astype(jnp.float32)) * NEG_INF)[None, :]
        xbias = ((1.0 - x_mask[b].astype(jnp.float32)) * NEG_INF)[None, :]

        def sf(p, yy):
            yy = _ref_ln(p["ln1"], yy + _ref_mha(p["mhatt"], yy, yy, ybias))
            yy = _ref_ln(p["ln2"], yy + _ref_ffn(p["ffn"], yy))
            return yy

        def iff(p, xx, yy):
            xx = _ref_ln(p["ln1"], xx + _ref_mha(p["mhatt1"], xx, xx, xbias))
            xx = _ref_ln(p["ln2"], xx + _ref_mha(p["mhatt2"], xx, yy, ybias))
            xx = _ref_ln(p["ln3"], xx + _ref_ffn(p["ffn"], xx))
            return xx

        if using_paf:
            for pe, pd in zip(params["enc"], params["dec"]):
                yb = sf(pe, yb)
                xb = iff(pd, xb, yb)
        else:
            for pe in params["enc"]:
                yb = sf(pe, yb)
            for pd in params["dec"]:
                xb = iff(pd, xb, yb)
        ys.append(yb)
        xs.append(xb)
    return jnp.stack(ys), jnp.stack(xs)


# ---------------------------------------------- main ----------------------------------------------
if __name__ == "__main__":
    key = jax.random.PRNGKey(0)
    B, SEQ, PROP = 2, 8, 8   # bs*rounds, seq_len, proposals

    k_y, k_x, k_p = jax.random.split(key, 3)
    y = jax.random.normal(k_y, (B, SEQ, HIDDEN), jnp.float32)
    x = jax.random.normal(k_x, (B, PROP, HIDDEN), jnp.float32)
    # 1.0 = valid token, 0.0 = padding (pad the tail of each sequence)
    y_mask = jnp.ones((B, SEQ), jnp.float32).at[:, SEQ - 2:].set(0.0)
    x_mask = jnp.ones((B, PROP), jnp.float32).at[:, PROP - 1:].set(0.0)

    raw_params = init_backbone(k_p)
    slab, meta = pack_params(raw_params)        # one-time offline slab packing

    y_out, x_out = paf_backbone_forward(y, x, y_mask, x_mask, slab, meta, using_paf=True)
    jax.block_until_ready((y_out, x_out))

    assert y_out.shape == (B, SEQ, HIDDEN) and x_out.shape == (B, PROP, HIDDEN)
    assert bool(jnp.all(jnp.isfinite(y_out))) and bool(jnp.all(jnp.isfinite(x_out)))

    # Tolerance check vs. a pure-JAX reference of the PyTorch forward (approx reciprocal in
    # the kernel softmax + MXU rounding -> small deviation expected).
    y_ref, x_ref = reference_forward(y, x, y_mask, x_mask, raw_params, using_paf=True)
    err = max(float(jnp.max(jnp.abs(y_out - y_ref))), float(jnp.max(jnp.abs(x_out - x_ref))))
    assert err < 5e-2, f"kernel/reference mismatch: max abs err = {err}"

    print("KERNEL_OK")
</pallas_src>

<mosaic_0001>
module attributes {stable_mosaic.version = 11 : i64} {
  func.func @backbone_kernel(%arg0: i32, %arg1: memref<1x16x32xf32, #tpu.memory_space<vmem>>, %arg2: memref<1x1x8xf32, #tpu.memory_space<vmem>>, %arg3: memref<1x1x8xf32, #tpu.memory_space<vmem>>, %arg4: memref<1088x128xf32, #tpu.memory_space<vmem>>, %arg5: memref<1x16x32xf32, #tpu.memory_space<vmem>>) attributes {dimension_semantics = [#tpu.dimension_semantics<parallel>], iteration_bounds = array<i64: 2>, scalar_prefetch = 0 : i64, scratch_operands = 0 : i64, tpu.core_type = #tpu.core_type<tc>, window_params = [{transform_indices = @transform_0, window_bounds = array<i64: 1, 16, 32>}, {transform_indices = @transform_1, window_bounds = array<i64: 1, 1, 8>}, {transform_indices = @transform_2, window_bounds = array<i64: 1, 1, 8>}, {pipeline_mode = #tpu.pipeline_mode<synchronous>, transform_indices = @transform_3, window_bounds = array<i64: 1088, 128>}, {transform_indices = @transform_4, window_bounds = array<i64: 1, 16, 32>}]} {
    %c0 = arith.constant 0 : index
    %c0_0 = arith.constant 0 : index
    %c0_1 = arith.constant 0 : index
    %0 = vector.load %arg1[%c0, %c0_0, %c0_1] : memref<1x16x32xf32, #tpu.memory_space<vmem>>, vector<1x8x32xf32>
    %1 = vector.shape_cast %0 : vector<1x8x32xf32> to vector<8x32xf32>
    %c0_2 = arith.constant 0 : index
    %c8 = arith.constant 8 : index
    %c0_3 = arith.constant 0 : index
    %2 = vector.load %arg1[%c0_2, %c8, %c0_3] : memref<1x16x32xf32, #tpu.memory_space<vmem>>, vector<1x8x32xf32>
    %3 = vector.shape_cast %2 : vector<1x8x32xf32> to vector<8x32xf32>
    %c0_4 = arith.constant 0 : index
    %c0_5 = arith.constant 0 : index
    %c0_6 = arith.constant 0 : index
    %4 = vector.load %arg2[%c0_4, %c0_5, %c0_6] : memref<1x1x8xf32, #tpu.memory_space<vmem>>, vector<1x1x8xf32>
    %5 = vector.shape_cast %4 : vector<1x1x8xf32> to vector<1x8xf32>
    %c0_7 = arith.constant 0 : index
    %c0_8 = arith.constant 0 : index
    %c0_9 = arith.constant 0 : index
    %6 = vector.load %arg3[%c0_7, %c0_8, %c0_9] : memref<1x1x8xf32, #tpu.memory_space<vmem>>, vector<1x1x8xf32>
    %7 = vector.shape_cast %6 : vector<1x1x8xf32> to vector<1x8xf32>
    %c0_10 = arith.constant 0 : index
    %c0_11 = arith.constant 0 : index
    %8 = vector.load %arg4[%c0_10, %c0_11] : memref<1088x128xf32, #tpu.memory_space<vmem>>, vector<32x96xf32>
    %c32 = arith.constant 32 : index
    %c0_12 = arith.constant 0 : index
    %9 = vector.load %arg4[%c32, %c0_12] : memref<1088x128xf32, #tpu.memory_space<vmem>>, vector<1x96xf32>
    %cst = arith.constant dense<0.000000e+00> : vector<8x96xf32>
    %10 = tpu.matmul %1, %8, %cst {dimension_numbers = #tpu.dot_dimension_numbers<[1], [0], [0], [1], [0, 0, 1, 1], [], []>} : vector<8x32xf32>, vector<32x96xf32>, vector<8x96xf32> -> vector<8x96xf32>
    %11 = vector.broadcast %9 : vector<1x96xf32> to vector<8x96xf32>
    %12 = arith.addf %10, %11 : vector<8x96xf32>
    %13 = vector.extract_strided_slice %12 {offsets = [0, 0], sizes = [8, 32], strides = [1, 1]} : vector<8x96xf32> to vector<8x32xf32>
    %14 = vector.extract_strided_slice %12 {offsets = [0, 32], sizes = [8, 32], strides = [1, 1]} : vector<8x96xf32> to vector<8x32xf32>
    %15 = vector.extract_strided_slice %12 {offsets = [0, 64], sizes = [8, 32], strides = [1, 1]} : vector<8x96xf32> to vector<8x32xf32>
    %16 = vector.extract_strided_slice %13 {offsets = [0, 0], sizes = [8, 8], strides = [1, 1]} : vector<8x32xf32> to vector<8x8xf32>
    %17 = vector.extract_strided_slice %14 {offsets = [0, 0], sizes = [8, 8], strides = [1, 1]} : vector<8x32xf32> to vector<8x8xf32>
    %18 = vector.extract_strided_slice %15 {offsets = [0, 0], sizes = [8, 8], strides = [1, 1]} : vector<8x32xf32> to vector<8x8xf32>
    %cst_13 = arith.constant dense<0.000000e+00> : vector<8x8xf32>
    %19 = tpu.matmul %16, %17, %cst_13 {dimension_numbers = #tpu.dot_dimension_numbers<[1], [1], [0], [0], [0, 0, 1, 0], [], []>} : vector<8x8xf32>, vector<8x8xf32>, vector<8x8xf32> -> vector<8x8xf32>
    %20 = vector.broadcast %5 : vector<1x8xf32> to vector<8x8xf32>
    %21 = arith.addf %19, %20 : vector<8x8xf32>
    %cst_14 = arith.constant dense<0xFF800000> : vector<8xf32>
    %22 = vector.multi_reduction <maximumf>, %21, %cst_14 [1] : vector<8x8xf32> to vector<8xf32>
    %23 = vector.shape_cast %22 : vector<8xf32> to vector<8x1xf32>
    %24 = vector.broadcast %23 : vector<8x1xf32> to vector<8x8xf32>
    %25 = arith.subf %21, %24 : vector<8x8xf32>
    %26 = math.exp %25 : vector<8x8xf32>
    %cst_15 = arith.constant dense<0.000000e+00> : vector<8xf32>
    %27 = vector.multi_reduction <add>, %26, %cst_15 [1] : vector<8x8xf32> to vector<8xf32>
    %28 = vector.shape_cast %27 : vector<8xf32> to vector<8x1xf32>
    %29 = tpu.reciprocal %28 {approx = true} : vector<8x1xf32> -> vector<8x1xf32>
    %30 = vector.broadcast %29 : vector<8x1xf32> to vector<8x8xf32>
    %31 = arith.mulf %26, %30 : vector<8x8xf32>
    %cst_16 = arith.constant dense<0.000000e+00> : vector<8x8xf32>
    %32 = tpu.matmul %31, %18, %cst_16 {dimension_numbers = #tpu.dot_dimension_numbers<[1], [0], [0], [1], [0, 0, 1, 1], [], []>} : vector<8x8xf32>, vector<8x8xf32>, vector<8x8xf32> -> vector<8x8xf32>
    %33 = vector.extract_strided_slice %13 {offsets = [0, 8], sizes = [8, 8], strides = [1, 1]} : vector<8x32xf32> to vector<8x8xf32>
    %34 = vector.extract_strided_slice %14 {offsets = [0, 8], sizes = [8, 8], strides = [1, 1]} : vector<8x32xf32> to vector<8x8xf32>
    %35 = vector.extract_strided_slice %15 {offsets = [0, 8], sizes = [8, 8], strides = [1, 1]} : vector<8x32xf32> to vector<8x8xf32>
    %cst_17 = arith.constant dense<0.000000e+00> : vector<8x8xf32>
    %36 = tpu.matmul %33, %34, %cst_17 {dimension_numbers = #tpu.dot_dimension_numbers<[1], [1], [0], [0], [0, 0, 1, 0], [], []>} : vector<8x8xf32>, vector<8x8xf32>, vector<8x8xf32> -> vector<8x8xf32>
    %37 = vector.broadcast %5 : vector<1x8xf32> to vector<8x8xf32>
    %38 = arith.addf %36, %37 : vector<8x8xf32>
    %cst_18 = arith.constant dense<0xFF800000> : vector<8xf32>
    %39 = vector.multi_reduction <maximumf>, %38, %cst_18 [1] : vector<8x8xf32> to vector<8xf32>
    %40 = vector.shape_cast %39 : vector<8xf32> to vector<8x1xf32>
    %41 = vector.broadcast %40 : vector<8x1xf32> to vector<8x8xf32>
    %42 = arith.subf %38, %41 : vector<8x8xf32>
    %43 = math.exp %42 : vector<8x8xf32>
    %cst_19 = arith.constant dense<0.000000e+00> : vector<8xf32>
    %44 = vector.multi_reduction <add>, %43, %cst_19 [1] : vector<8x8xf32> to vector<8xf32>
    %45 = vector.shape_cast %44 : vector<8xf32> to vector<8x1xf32>
    %46 = tpu.reciprocal %45 {approx = true} : vector<8x1xf32> -> vector<8x1xf32>
    %47 = vector.broadcast %46 : vector<8x1xf32> to vector<8x8xf32>
    %48 = arith.mulf %43, %47 : vector<8x8xf32>
    %cst_20 = arith.constant dense<0.000000e+00> : vector<8x8xf32>
    %49 = tpu.matmul %48, %35, %cst_20 {dimension_numbers = #tpu.dot_dimension_numbers<[1], [0], [0], [1], [0, 0, 1, 1], [], []>} : vector<8x8xf32>, vector<8x8xf32>, vector<8x8xf32> -> vector<8x8xf32>
    %50 = vector.extract_strided_slice %13 {offsets = [0, 16], sizes = [8, 8], strides = [1, 1]} : vector<8x32xf32> to vector<8x8xf32>
    %51 = vector.extract_strided_slice %14 {offsets = [0, 16], sizes = [8, 8], strides = [1, 1]} : vector<8x32xf32> to vector<8x8xf32>
    %52 = vector.extract_strided_slice %15 {offsets = [0, 16], sizes = [8, 8], strides = [1, 1]} : vector<8x32xf32> to vector<8x8xf32>
    %cst_21 = arith.constant dense<0.000000e+00> : vector<8x8xf32>
    %53 = tpu.matmul %50, %51, %cst_21 {dimension_numbers = #tpu.dot_dimension_numbers<[1], [1], [0], [0], [0, 0, 1, 0], [], []>} : vector<8x8xf32>, vector<8x8xf32>, vector<8x8xf32> -> vector<8x8xf32>
    %54 = vector.broadcast %5 : vector<1x8xf32> to vector<8x8xf32>
    %55 = arith.addf %53, %54 : vector<8x8xf32>
    %cst_22 = arith.constant dense<0xFF800000> : vector<8xf32>
    %56 = vector.multi_reduction <maximumf>, %55, %cst_22 [1] : vector<8x8xf32> to vector<8xf32>
    %57 = vector.shape_cast %56 : vector<8xf32> to vector<8x1xf32>
    %58 = vector.broadcast %57 : vector<8x1xf32> to vector<8x8xf32>
    %59 = arith.subf %55, %58 : vector<8x8xf32>
    %60 = math.exp %59 : vector<8x8xf32>
    %cst_23 = arith.constant dense<0.000000e+00> : vector<8xf32>
    %61 = vector.multi_reduction <add>, %60, %cst_23 [1] : vector<8x8xf32> to vector<8xf32>
    %62 = vector.shape_cast %61 : vector<8xf32> to vector<8x1xf32>
    %63 = tpu.reciprocal %62 {approx = true} : vector<8x1xf32> -> vector<8x1xf32>
    %64 = vector.broadcast %63 : vector<8x1xf32> to vector<8x8xf32>
    %65 = arith.mulf %60, %64 : vector<8x8xf32>
    %cst_24 = arith.constant dense<0.000000e+00> : vector<8x8xf32>
    %66 = tpu.matmul %65, %52, %cst_24 {dimension_numbers = #tpu.dot_dimension_numbers<[1], [0], [0], [1], [0, 0, 1, 1], [], []>} : vector<8x8xf32>, vector<8x8xf32>, vector<8x8xf32> -> vector<8x8xf32>
    %67 = vector.extract_strided_slice %13 {offsets = [0, 24], sizes = [8, 8], strides = [1, 1]} : vector<8x32xf32> to vector<8x8xf32>
    %68 = vector.extract_strided_slice %14 {offsets = [0, 24], sizes = [8, 8], strides = [1, 1]} : vector<8x32xf32> to vector<8x8xf32>
    %69 = vector.extract_strided_slice %15 {offsets = [0, 24], sizes = [8, 8], strides = [1, 1]} : vector<8x32xf32> to vector<8x8xf32>
    %cst_25 = arith.constant dense<0.000000e+00> : vector<8x8xf32>
    %70 = tpu.matmul %67, %68, %cst_25 {dimension_numbers = #tpu.dot_dimension_numbers<[1], [1], [0], [0], [0, 0, 1, 0], [], []>} : vector<8x8xf32>, vector<8x8xf32>, vector<8x8xf32> -> vector<8x8xf32>
    %71 = vector.broadcast %5 : vector<1x8xf32> to vector<8x8xf32>
    %72 = arith.addf %70, %71 : vector<8x8xf32>
    %cst_26 = arith.constant dense<0xFF800000> : vector<8xf32>
    %73 = vector.multi_reduction <maximumf>, %72, %cst_26 [1] : vector<8x8xf32> to vector<8xf32>
    %74 = vector.shape_cast %73 : vector<8xf32> to vector<8x1xf32>
    %75 = vector.broadcast %74 : vector<8x1xf32> to vector<8x8xf32>
    %76 = arith.subf %72, %75 : vector<8x8xf32>
    %77 = math.exp %76 : vector<8x8xf32>
    %cst_27 = arith.constant dense<0.000000e+00> : vector<8xf32>
    %78 = vector.multi_reduction <add>, %77, %cst_27 [1] : vector<8x8xf32> to vector<8xf32>
    %79 = vector.shape_cast %78 : vector<8xf32> to vector<8x1xf32>
    %80 = tpu.reciprocal %79 {approx = true} : vector<8x1xf32> -> vector<8x1xf32>
    %81 = vector.broadcast %80 : vector<8x1xf32> to vector<8x8xf32>
    %82 = arith.mulf %77, %81 : vector<8x8xf32>
    %cst_28 = arith.constant dense<0.000000e+00> : vector<8x8xf32>
    %83 = tpu.matmul %82, %69, %cst_28 {dimension_numbers = #tpu.dot_dimension_numbers<[1], [0], [0], [1], [0, 0, 1, 1], [], []>} : vector<8x8xf32>, vector<8x8xf32>, vector<8x8xf32> -> vector<8x8xf32>
    %84 = tpu.concatenate %32, %49, %66, %83 in 1 : vector<8x8xf32>, vector<8x8xf32>, vector<8x8xf32>, vector<8x8xf32> -> vector<8x32xf32>
    %c40 = arith.constant 40 : index
    %c0_29 = arith.constant 0 : index
    %85 = vector.load %arg4[%c40, %c0_29] : memref<1088x128xf32, #tpu.memory_space<vmem>>, vector<32x32xf32>
    %c72 = arith.constant 72 : index
    %c0_30 = arith.constant 0 : index
    %86 = vector.load %arg4[%c72, %c0_30] : memref<1088x128xf32, #tpu.memory_space<vmem>>, vector<1x32xf32>
    %cst_31 = arith.constant dense<0.000000e+00> : vector<8x32xf32>
    %87 = tpu.matmul %84, %85, %cst_31 {dimension_numbers = #tpu.dot_dimension_numbers<[1], [0], [0], [1], [0, 0, 1, 1], [], []>} : vector<8x32xf32>, vector<32x32xf32>, vector<8x32xf32> -> vector<8x32xf32>
    %88 = vector.broadcast %86 : vector<1x32xf32> to vector<8x32xf32>
    %89 = arith.addf %87, %88 : vector<8x32xf32>
    %90 = arith.addf %1, %89 : vector<8x32xf32>
    %cst_32 = arith.constant dense<0.000000e+00> : vector<8xf32>
    %91 = vector.multi_reduction <add>, %90, %cst_32 [1] : vector<8x32xf32> to vector<8xf32>
    %92 = vector.shape_cast %91 : vector<8xf32> to vector<8x1xf32>
    %cst_33 = arith.constant 3.200000e+01 : f32
    %93 = vector.broadcast %cst_33 : f32 to vector<8x1xf32>
    %94 = arith.divf %92, %93 : vector<8x1xf32>
    %95 = vector.broadcast %94 : vector<8x1xf32> to vector<8x32xf32>
    %96 = arith.subf %90, %95 : vector<8x32xf32>
    %97 = vector.broadcast %94 : vector<8x1xf32> to vector<8x32xf32>
    %98 = arith.subf %90, %97 : vector<8x32xf32>
    %99 = arith.mulf %96, %98 : vector<8x32xf32>
    %cst_34 = arith.constant dense<0.000000e+00> : vector<8xf32>
    %100 = vector.multi_reduction <add>, %99, %cst_34 [1] : vector<8x32xf32> to vector<8xf32>
    %101 = vector.shape_cast %100 : vector<8xf32> to vector<8x1xf32>
    %cst_35 = arith.constant 3.200000e+01 : f32
    %102 = vector.broadcast %cst_35 : f32 to vector<8x1xf32>
    %103 = arith.divf %101, %102 : vector<8x1xf32>
    %104 = vector.broadcast %94 : vector<8x1xf32> to vector<8x32xf32>
    %105 = arith.subf %90, %104 : vector<8x32xf32>
    %cst_36 = arith.constant 9.99999997E-7 : f32
    %106 = vector.broadcast %cst_36 : f32 to vector<8x1xf32>
    %107 = arith.addf %103, %106 : vector<8x1xf32>
    %108 = math.rsqrt %107 : vector<8x1xf32>
    %109 = vector.broadcast %108 : vector<8x1xf32> to vector<8x32xf32>
    %110 = arith.mulf %105, %109 : vector<8x32xf32>
    %c192 = arith.constant 192 : index
    %c0_37 = arith.constant 0 : index
    %111 = vector.load %arg4[%c192, %c0_37] : memref<1088x128xf32, #tpu.memory_space<vmem>>, vector<1x32xf32>
    %112 = vector.broadcast %111 : vector<1x32xf32> to vector<8x32xf32>
    %113 = arith.mulf %110, %112 : vector<8x32xf32>
    %c200 = arith.constant 200 : index
    %c0_38 = arith.constant 0 : index
    %114 = vector.load %arg4[%c200, %c0_38] : memref<1088x128xf32, #tpu.memory_space<vmem>>, vector<1x32xf32>
    %115 = vector.broadcast %114 : vector<1x32xf32> to vector<8x32xf32>
    %116 = arith.addf %113, %115 : vector<8x32xf32>
    %c80 = arith.constant 80 : index
    %c0_39 = arith.constant 0 : index
    %117 = vector.load %arg4[%c80, %c0_39] : memref<1088x128xf32, #tpu.memory_space<vmem>>, vector<32x64xf32>
    %cst_40 = arith.constant dense<0.000000e+00> : vector<8x64xf32>
    %118 = tpu.matmul %116, %117, %cst_40 {dimension_numbers = #tpu.dot_dimension_numbers<[1], [0], [0], [1], [0, 0, 1, 1], [], []>} : vector<8x32xf32>, vector<32x64xf32>, vector<8x64xf32> -> vector<8x64xf32>
    %c112 = arith.constant 112 : index
    %c0_41 = arith.constant 0 : index
    %119 = vector.load %arg4[%c112, %c0_41] : memref<1088x128xf32, #tpu.memory_space<vmem>>, vector<1x64xf32>
    %120 = vector.broadcast %119 : vector<1x64xf32> to vector<8x64xf32>
    %121 = arith.addf %118, %120 : vector<8x64xf32>
    %cst_42 = arith.constant 0.000000e+00 : f32
    %122 = vector.broadcast %cst_42 : f32 to vector<8x64xf32>
    %123 = arith.maximumf %121, %122 : vector<8x64xf32>
    %c120 = arith.constant 120 : index
    %c0_43 = arith.constant 0 : index
    %124 = vector.load %arg4[%c120, %c0_43] : memref<1088x128xf32, #tpu.memory_space<vmem>>, vector<64x32xf32>
    %cst_44 = arith.constant dense<0.000000e+00> : vector<8x32xf32>
    %125 = tpu.matmul %123, %124, %cst_44 {dimension_numbers = #tpu.dot_dimension_numbers<[1], [0], [0], [1], [0, 0, 1, 1], [], []>} : vector<8x64xf32>, vector<64x32xf32>, vector<8x32xf32> -> vector<8x32xf32>
    %c184 = arith.constant 184 : index
    %c0_45 = arith.constant 0 : index
    %126 = vector.load %arg4[%c184, %c0_45] : memref<1088x128xf32, #tpu.memory_space<vmem>>, vector<1x32xf32>
    %127 = vector.broadcast %126 : vector<1x32xf32> to vector<8x32xf32>
    %128 = arith.addf %125, %127 : vector<8x32xf32>
    %129 = arith.addf %116, %128 : vector<8x32xf32>
    %cst_46 = arith.constant dense<0.000000e+00> : vector<8xf32>
    %130 = vector.multi_reduction <add>, %129, %cst_46 [1] : vector<8x32xf32> to vector<8xf32>
    %131 = vector.shape_cast %130 : vector<8xf32> to vector<8x1xf32>
    %cst_47 = arith.constant 3.200000e+01 : f32
    %132 = vector.broadcast %cst_47 : f32 to vector<8x1xf32>
    %133 = arith.divf %131, %132 : vector<8x1xf32>
    %134 = vector.broadcast %133 : vector<8x1xf32> to vector<8x32xf32>
    %135 = arith.subf %129, %134 : vector<8x32xf32>
    %136 = vector.broadcast %133 : vector<8x1xf32> to vector<8x32xf32>
    %137 = arith.subf %129, %136 : vector<8x32xf32>
    %138 = arith.mulf %135, %137 : vector<8x32xf32>
    %cst_48 = arith.constant dense<0.000000e+00> : vector<8xf32>
    %139 = vector.multi_reduction <add>, %138, %cst_48 [1] : vector<8x32xf32> to vector<8xf32>
    %140 = vector.shape_cast %139 : vector<8xf32> to vector<8x1xf32>
    %cst_49 = arith.constant 3.200000e+01 : f32
    %141 = vector.broadcast %cst_49 : f32 to vector<8x1xf32>
    %142 = arith.divf %140, %141 : vector<8x1xf32>
    %143 = vector.broadcast %133 : vector<8x1xf32> to vector<8x32xf32>
    %144 = arith.subf %129, %143 : vector<8x32xf32>
    %cst_50 = arith.constant 9.99999997E-7 : f32
    %145 = vector.broadcast %cst_50 : f32 to vector<8x1xf32>
    %146 = arith.addf %142, %145 : vector<8x1xf32>
    %147 = math.rsqrt %146 : vector<8x1xf32>
    %148 = vector.broadcast %147 : vector<8x1xf32> to vector<8x32xf32>
    %149 = arith.mulf %144, %148 : vector<8x32xf32>
    %c208 = arith.constant 208 : index
    %c0_51 = arith.constant 0 : index
    %150 = vector.load %arg4[%c208, %c0_51] : memref<1088x128xf32, #tpu.memory_space<vmem>>, vector<1x32xf32>
    %151 = vector.broadcast %150 : vector<1x32xf32> to vector<8x32xf32>
    %152 = arith.mulf %149, %151 : vector<8x32xf32>
    %c216 = arith.constant 216 : index
    %c0_52 = arith.constant 0 : index
    %153 = vector.load %arg4[%c216, %c0_52] : memref<1088x128xf32, #tpu.memory_space<vmem>>, vector<1x32xf32>
    %154 = vector.broadcast %153 : vector<1x32xf32> to vector<8x32xf32>
    %155 = arith.addf %152, %154 : vector<8x32xf32>
    %c448 = arith.constant 448 : index
    %c0_53 = arith.constant 0 : index
    %156 = vector.load %arg4[%c448, %c0_53] : memref<1088x128xf32, #tpu.memory_space<vmem>>, vector<32x96xf32>
    %c480 = arith.constant 480 : index
    %c0_54 = arith.constant 0 : index
    %157 = vector.load %arg4[%c480, %c0_54] : memref<1088x128xf32, #tpu.memory_space<vmem>>, vector<1x96xf32>
    %cst_55 = arith.constant dense<0.000000e+00> : vector<8x96xf32>
    %158 = tpu.matmul %3, %156, %cst_55 {dimension_numbers = #tpu.dot_dimension_numbers<[1], [0], [0], [1], [0, 0, 1, 1], [], []>} : vector<8x32xf32>, vector<32x96xf32>, vector<8x96xf32> -> vector<8x96xf32>
    %159 = vector.broadcast %157 : vector<1x96xf32> to vector<8x96xf32>
    %160 = arith.addf %158, %159 : vector<8x96xf32>
    %161 = vector.extract_strided_slice %160 {offsets = [0, 0], sizes = [8, 32], strides = [1, 1]} : vector<8x96xf32> to vector<8x32xf32>
    %162 = vector.extract_strided_slice %160 {offsets = [0, 32], sizes = [8, 32], strides = [1, 1]} : vector<8x96xf32> to vector<8x32xf32>
    %163 = vector.extract_strided_slice %160 {offsets = [0, 64], sizes = [8, 32], strides = [1, 1]} : vector<8x96xf32> to vector<8x32xf32>
    %164 = vector.extract_strided_slice %161 {offsets = [0, 0], sizes = [8, 8], strides = [1, 1]} : vector<8x32xf32> to vector<8x8xf32>
    %165 = vector.extract_strided_slice %162 {offsets = [0, 0], sizes = [8, 8], strides = [1, 1]} : vector<8x32xf32> to vector<8x8xf32>
    %166 = vector.extract_strided_slice %163 {offsets = [0, 0], sizes = [8, 8], strides = [1, 1]} : vector<8x32xf32> to vector<8x8xf32>
    %cst_56 = arith.constant dense<0.000000e+00> : vector<8x8xf32>
    %167 = tpu.matmul %164, %165, %cst_56 {dimension_numbers = #tpu.dot_dimension_numbers<[1], [1], [0], [0], [0, 0, 1, 0], [], []>} : vector<8x8xf32>, vector<8x8xf32>, vector<8x8xf32> -> vector<8x8xf32>
    %168 = vector.broadcast %7 : vector<1x8xf32> to vector<8x8xf32>
    %169 = arith.addf %167, %168 : vector<8x8xf32>
    %cst_57 = arith.constant dense<0xFF800000> : vector<8xf32>
    %170 = vector.multi_reduction <maximumf>, %169, %cst_57 [1] : vector<8x8xf32> to vector<8xf32>
    %171 = vector.shape_cast %170 : vector<8xf32> to vector<8x1xf32>
    %172 = vector.broadcast %171 : vector<8x1xf32> to vector<8x8xf32>
    %173 = arith.subf %169, %172 : vector<8x8xf32>
    %174 = math.exp %173 : vector<8x8xf32>
    %cst_58 = arith.constant dense<0.000000e+00> : vector<8xf32>
    %175 = vector.multi_reduction <add>, %174, %cst_58 [1] : vector<8x8xf32> to vector<8xf32>
    %176 = vector.shape_cast %175 : vector<8xf32> to vector<8x1xf32>
    %177 = tpu.reciprocal %176 {approx = true} : vector<8x1xf32> -> vector<8x1xf32>
    %178 = vector.broadcast %177 : vector<8x1xf32> to vector<8x8xf32>
    %179 = arith.mulf %174, %178 : vector<8x8xf32>
    %cst_59 = arith.constant dense<0.000000e+00> : vector<8x8xf32>
    %180 = tpu.matmul %179, %166, %cst_59 {dimension_numbers = #tpu.dot_dimension_numbers<[1], [0], [0], [1], [0, 0, 1, 1], [], []>} : vector<8x8xf32>, vector<8x8xf32>, vector<8x8xf32> -> vector<8x8xf32>
    %181 = vector.extract_strided_slice %161 {offsets = [0, 8], sizes = [8, 8], strides = [1, 1]} : vector<8x32xf32> to vector<8x8xf32>
    %182 = vector.extract_strided_slice %162 {offsets = [0, 8], sizes = [8, 8], strides = [1, 1]} : vector<8x32xf32> to vector<8x8xf32>
    %183 = vector.extract_strided_slice %163 {offsets = [0, 8], sizes = [8, 8], strides = [1, 1]} : vector<8x32xf32> to vector<8x8xf32>
    %cst_60 = arith.constant dense<0.000000e+00> : vector<8x8xf32>
    %184 = tpu.matmul %181, %182, %cst_60 {dimension_numbers = #tpu.dot_dimension_numbers<[1], [1], [0], [0], [0, 0, 1, 0], [], []>} : vector<8x8xf32>, vector<8x8xf32>, vector<8x8xf32> -> vector<8x8xf32>
    %185 = vector.broadcast %7 : vector<1x8xf32> to vector<8x8xf32>
    %186 = arith.addf %184, %185 : vector<8x8xf32>
    %cst_61 = arith.constant dense<0xFF800000> : vector<8xf32>
    %187 = vector.multi_reduction <maximumf>, %186, %cst_61 [1] : vector<8x8xf32> to vector<8xf32>
    %188 = vector.shape_cast %187 : vector<8xf32> to vector<8x1xf32>
    %189 = vector.broadcast %188 : vector<8x1xf32> to vector<8x8xf32>
    %190 = arith.subf %186, %189 : vector<8x8xf32>
    %191 = math.exp %190 : vector<8x8xf32>
    %cst_62 = arith.constant dense<0.000000e+00> : vector<8xf32>
    %192 = vector.multi_reduction <add>, %191, %cst_62 [1] : vector<8x8xf32> to vector<8xf32>
    %193 = vector.shape_cast %192 : vector<8xf32> to vector<8x1xf32>
    %194 = tpu.reciprocal %193 {approx = true} : vector<8x1xf32> -> vector<8x1xf32>
    %195 = vector.broadcast %194 : vector<8x1xf32> to vector<8x8xf32>
    %196 = arith.mulf %191, %195 : vector<8x8xf32>
    %cst_63 = arith.constant dense<0.000000e+00> : vector<8x8xf32>
    %197 = tpu.matmul %196, %183, %cst_63 {dimension_numbers = #tpu.dot_dimension_numbers<[1], [0], [0], [1], [0, 0, 1, 1], [], []>} : vector<8x8xf32>, vector<8x8xf32>, vector<8x8xf32> -> vector<8x8xf32>
    %198 = vector.extract_strided_slice %161 {offsets = [0, 16], sizes = [8, 8], strides = [1, 1]} : vector<8x32xf32> to vector<8x8xf32>
    %199 = vector.extract_strided_slice %162 {offsets = [0, 16], sizes = [8, 8], strides = [1, 1]} : vector<8x32xf32> to vector<8x8xf32>
    %200 = vector.extract_strided_slice %163 {offsets = [0, 16], sizes = [8, 8], strides = [1, 1]} : vector<8x32xf32> to vector<8x8xf32>
    %cst_64 = arith.constant dense<0.000000e+00> : vector<8x8xf32>
    %201 = tpu.matmul %198, %199, %cst_64 {dimension_numbers = #tpu.dot_dimension_numbers<[1], [1], [0], [0], [0, 0, 1, 0], [], []>} : vector<8x8xf32>, vector<8x8xf32>, vector<8x8xf32> -> vector<8x8xf32>
    %202 = vector.broadcast %7 : vector<1x8xf32> to vector<8x8xf32>
    %203 = arith.addf %201, %202 : vector<8x8xf32>
    %cst_65 = arith.constant dense<0xFF800000> : vector<8xf32>
    %204 = vector.multi_reduction <maximumf>, %203, %cst_65 [1] : vector<8x8xf32> to vector<8xf32>
    %205 = vector.shape_cast %204 : vector<8xf32> to vector<8x1xf32>
    %206 = vector.broadcast %205 : vector<8x1xf32> to vector<8x8xf32>
    %207 = arith.subf %203, %206 : vector<8x8xf32>
    %208 = math.exp %207 : vector<8x8xf32>
    %cst_66 = arith.constant dense<0.000000e+00> : vector<8xf32>
    %209 = vector.multi_reduction <add>, %208, %cst_66 [1] : vector<8x8xf32> to vector<8xf32>
    %210 = vector.shape_cast %209 : vector<8xf32> to vector<8x1xf32>
    %211 = tpu.reciprocal %210 {approx = true} : vector<8x1xf32> -> vector<8x1xf32>
    %212 = vector.broadcast %211 : vector<8x1xf32> to vector<8x8xf32>
    %213 = arith.mulf %208, %212 : vector<8x8xf32>
    %cst_67 = arith.constant dense<0.000000e+00> : vector<8x8xf32>
    %214 = tpu.matmul %213, %200, %cst_67 {dimension_numbers = #tpu.dot_dimension_numbers<[1], [0], [0], [1], [0, 0, 1, 1], [], []>} : vector<8x8xf32>, vector<8x8xf32>, vector<8x8xf32> -> vector<8x8xf32>
    %215 = vector.extract_strided_slice %161 {offsets = [0, 24], sizes = [8, 8], strides = [1, 1]} : vector<8x32xf32> to vector<8x8xf32>
    %216 = vector.extract_strided_slice %162 {offsets = [0, 24], sizes = [8, 8], strides = [1, 1]} : vector<8x32xf32> to vector<8x8xf32>
    %217 = vector.extract_strided_slice %163 {offsets = [0, 24], sizes = [8, 8], strides = [1, 1]} : vector<8x32xf32> to vector<8x8xf32>
    %cst_68 = arith.constant dense<0.000000e+00> : vector<8x8xf32>
    %218 = tpu.matmul %215, %216, %cst_68 {dimension_numbers = #tpu.dot_dimension_numbers<[1], [1], [0], [0], [0, 0, 1, 0], [], []>} : vector<8x8xf32>, vector<8x8xf32>, vector<8x8xf32> -> vector<8x8xf32>
    %219 = vector.broadcast %7 : vector<1x8xf32> to vector<8x8xf32>
    %220 = arith.addf %218, %219 : vector<8x8xf32>
    %cst_69 = arith.constant dense<0xFF800000> : vector<8xf32>
    %221 = vector.multi_reduction <maximumf>, %220, %cst_69 [1] : vector<8x8xf32> to vector<8xf32>
    %222 = vector.shape_cast %221 : vector<8xf32> to vector<8x1xf32>
    %223 = vector.broadcast %222 : vector<8x1xf32> to vector<8x8xf32>
    %224 = arith.subf %220, %223 : vector<8x8xf32>
    %225 = math.exp %224 : vector<8x8xf32>
    %cst_70 = arith.constant dense<0.000000e+00> : vector<8xf32>
    %226 = vector.multi_reduction <add>, %225, %cst_70 [1] : vector<8x8xf32> to vector<8xf32>
    %227 = vector.shape_cast %226 : vector<8xf32> to vector<8x1xf32>
    %228 = tpu.reciprocal %227 {approx = true} : vector<8x1xf32> -> vector<8x1xf32>
    %229 = vector.broadcast %228 : vector<8x1xf32> to vector<8x8xf32>
    %230 = arith.mulf %225, %229 : vector<8x8xf32>
    %cst_71 = arith.constant dense<0.000000e+00> : vector<8x8xf32>
    %231 = tpu.matmul %230, %217, %cst_71 {dimension_numbers = #tpu.dot_dimension_numbers<[1], [0], [0], [1], [0, 0, 1, 1], [], []>} : vector<8x8xf32>, vector<8x8xf32>, vector<8x8xf32> -> vector<8x8xf32>
    %232 = tpu.concatenate %180, %197, %214, %231 in 1 : vector<8x8xf32>, vector<8x8xf32>, vector<8x8xf32>, vector<8x8xf32> -> vector<8x32xf32>
    %c488 = arith.constant 488 : index
    %c0_72 = arith.constant 0 : index
    %233 = vector.load %arg4[%c488, %c0_72] : memref<1088x128xf32, #tpu.memory_space<vmem>>, vector<32x32xf32>
    %c520 = arith.constant 520 : index
    %c0_73 = arith.constant 0 : index
    %234 = vector.load %arg4[%c520, %c0_73] : memref<1088x128xf32, #tpu.memory_space<vmem>>, vector<1x32xf32>
    %cst_74 = arith.constant dense<0.000000e+00> : vector<8x32xf32>
    %235 = tpu.matmul %232, %233, %cst_74 {dimension_numbers = #tpu.dot_dimension_numbers<[1], [0], [0], [1], [0, 0, 1, 1], [], []>} : vector<8x32xf32>, vector<32x32xf32>, vector<8x32xf32> -> vector<8x32xf32>
    %236 = vector.broadcast %234 : vector<1x32xf32> to vector<8x32xf32>
    %237 = arith.addf %235, %236 : vector<8x32xf32>
    %238 = arith.addf %3, %237 : vector<8x32xf32>
    %cst_75 = arith.constant dense<0.000000e+00> : vector<8xf32>
    %239 = vector.multi_reduction <add>, %238, %cst_75 [1] : vector<8x32xf32> to vector<8xf32>
    %240 = vector.shape_cast %239 : vector<8xf32> to vector<8x1xf32>
    %cst_76 = arith.constant 3.200000e+01 : f32
    %241 = vector.broadcast %cst_76 : f32 to vector<8x1xf32>
    %242 = arith.divf %240, %241 : vector<8x1xf32>
    %243 = vector.broadcast %242 : vector<8x1xf32> to vector<8x32xf32>
    %244 = arith.subf %238, %243 : vector<8x32xf32>
    %245 = vector.broadcast %242 : vector<8x1xf32> to vector<8x32xf32>
    %246 = arith.subf %238, %245 : vector<8x32xf32>
    %247 = arith.mulf %244, %246 : vector<8x32xf32>
    %cst_77 = arith.constant dense<0.000000e+00> : vector<8xf32>
    %248 = vector.multi_reduction <add>, %247, %cst_77 [1] : vector<8x32xf32> to vector<8xf32>
    %249 = vector.shape_cast %248 : vector<8xf32> to vector<8x1xf32>
    %cst_78 = arith.constant 3.200000e+01 : f32
    %250 = vector.broadcast %cst_78 : f32 to vector<8x1xf32>
    %251 = arith.divf %249, %250 : vector<8x1xf32>
    %252 = vector.broadcast %242 : vector<8x1xf32> to vector<8x32xf32>
    %253 = arith.subf %238, %252 : vector<8x32xf32>
    %cst_79 = arith.constant 9.99999997E-7 : f32
    %254 = vector.broadcast %cst_79 : f32 to vector<8x1xf32>
    %255 = arith.addf %251, %254 : vector<8x1xf32>
    %256 = math.rsqrt %255 : vector<8x1xf32>
    %257 = vector.broadcast %256 : vector<8x1xf32> to vector<8x32xf32>
    %258 = arith.mulf %253, %257 : vector<8x32xf32>
    %c720 = arith.constant 720 : index
    %c0_80 = arith.constant 0 : index
    %259 = vector.load %arg4[%c720, %c0_80] : memref<1088x128xf32, #tpu.memory_space<vmem>>, vector<1x32xf32>
    %260 = vector.broadcast %259 : vector<1x32xf32> to vector<8x32xf32>
    %261 = arith.mulf %258, %260 : vector<8x32xf32>
    %c728 = arith.constant 728 : index
    %c0_81 = arith.constant 0 : index
    %262 = vector.load %arg4[%c728, %c0_81] : memref<1088x128xf32, #tpu.memory_space<vmem>>, vector<1x32xf32>
    %263 = vector.broadcast %262 : vector<1x32xf32> to vector<8x32xf32>
    %264 = arith.addf %261, %263 : vector<8x32xf32>
    %c528 = arith.constant 528 : index
    %c0_82 = arith.constant 0 : index
    %265 = vector.load %arg4[%c528, %c0_82] : memref<1088x128xf32, #tpu.memory_space<vmem>>, vector<32x96xf32>
    %c560 = arith.constant 560 : index
    %c0_83 = arith.constant 0 : index
    %266 = vector.load %arg4[%c560, %c0_83] : memref<1088x128xf32, #tpu.memory_space<vmem>>, vector<1x96xf32>
    %267 = vector.extract_strided_slice %265 {offsets = [0, 0], sizes = [32, 32], strides = [1, 1]} : vector<32x96xf32> to vector<32x32xf32>
    %cst_84 = arith.constant dense<0.000000e+00> : vector<8x32xf32>
    %268 = tpu.matmul %264, %267, %cst_84 {dimension_numbers = #tpu.dot_dimension_numbers<[1], [0], [0], [1], [0, 0, 1, 1], [], []>} : vector<8x32xf32>, vector<32x32xf32>, vector<8x32xf32> -> vector<8x32xf32>
    %269 = vector.extract_strided_slice %266 {offsets = [0, 0], sizes = [1, 32], strides = [1, 1]} : vector<1x96xf32> to vector<1x32xf32>
    %270 = vector.broadcast %269 : vector<1x32xf32> to vector<8x32xf32>
    %271 = arith.addf %268, %270 : vector<8x32xf32>
    %272 = vector.extract_strided_slice %265 {offsets = [0, 32], sizes = [32, 64], strides = [1, 1]} : vector<32x96xf32> to vector<32x64xf32>
    %cst_85 = arith.constant dense<0.000000e+00> : vector<8x64xf32>
    %273 = tpu.matmul %155, %272, %cst_85 {dimension_numbers = #tpu.dot_dimension_numbers<[1], [0], [0], [1], [0, 0, 1, 1], [], []>} : vector<8x32xf32>, vector<32x64xf32>, vector<8x64xf32> -> vector<8x64xf32>
    %274 = vector.extract_strided_slice %266 {offsets = [0, 32], sizes = [1, 64], strides = [1, 1]} : vector<1x96xf32> to vector<1x64xf32>
    %275 = vector.broadcast %274 : vector<1x64xf32> to vector<8x64xf32>
    %276 = arith.addf %273, %275 : vector<8x64xf32>
    %277 = vector.extract_strided_slice %276 {offsets = [0, 0], sizes = [8, 32], strides = [1, 1]} : vector<8x64xf32> to vector<8x32xf32>
    %278 = vector.extract_strided_slice %276 {offsets = [0, 32], sizes = [8, 32], strides = [1, 1]} : vector<8x64xf32> to vector<8x32xf32>
    %279 = vector.extract_strided_slice %271 {offsets = [0, 0], sizes = [8, 8], strides = [1, 1]} : vector<8x32xf32> to vector<8x8xf32>
    %280 = vector.extract_strided_slice %277 {offsets = [0, 0], sizes = [8, 8], strides = [1, 1]} : vector<8x32xf32> to vector<8x8xf32>
    %281 = vector.extract_strided_slice %278 {offsets = [0, 0], sizes = [8, 8], strides = [1, 1]} : vector<8x32xf32> to vector<8x8xf32>
    %cst_86 = arith.constant dense<0.000000e+00> : vector<8x8xf32>
    %282 = tpu.matmul %279, %280, %cst_86 {dimension_numbers = #tpu.dot_dimension_numbers<[1], [1], [0], [0], [0, 0, 1, 0], [], []>} : vector<8x8xf32>, vector<8x8xf32>, vector<8x8xf32> -> vector<8x8xf32>
    %283 = vector.broadcast %5 : vector<1x8xf32> to vector<8x8xf32>
    %284 = arith.addf %282, %283 : vector<8x8xf32>
    %cst_87 = arith.constant dense<0xFF800000> : vector<8xf32>
    %285 = vector.multi_reduction <maximumf>, %284, %cst_87 [1] : vector<8x8xf32> to vector<8xf32>
    %286 = vector.shape_cast %285 : vector<8xf32> to vector<8x1xf32>
    %287 = vector.broadcast %286 : vector<8x1xf32> to vector<8x8xf32>
    %288 = arith.subf %284, %287 : vector<8x8xf32>
    %289 = math.exp %288 : vector<8x8xf32>
    %cst_88 = arith.constant dense<0.000000e+00> : vector<8xf32>
    %290 = vector.multi_reduction <add>, %289, %cst_88 [1] : vector<8x8xf32> to vector<8xf32>
    %291 = vector.shape_cast %290 : vector<8xf32> to vector<8x1xf32>
    %292 = tpu.reciprocal %291 {approx = true} : vector<8x1xf32> -> vector<8x1xf32>
    %293 = vector.broadcast %292 : vector<8x1xf32> to vector<8x8xf32>
    %294 = arith.mulf %289, %293 : vector<8x8xf32>
    %cst_89 = arith.constant dense<0.000000e+00> : vector<8x8xf32>
    %295 = tpu.matmul %294, %281, %cst_89 {dimension_numbers = #tpu.dot_dimension_numbers<[1], [0], [0], [1], [0, 0, 1, 1], [], []>} : vector<8x8xf32>, vector<8x8xf32>, vector<8x8xf32> -> vector<8x8xf32>
    %296 = vector.extract_strided_slice %271 {offsets = [0, 8], sizes = [8, 8], strides = [1, 1]} : vector<8x32xf32> to vector<8x8xf32>
    %297 = vector.extract_strided_slice %277 {offsets = [0, 8], sizes = [8, 8], strides = [1, 1]} : vector<8x32xf32> to vector<8x8xf32>
    %298 = vector.extract_strided_slice %278 {offsets = [0, 8], sizes = [8, 8], strides = [1, 1]} : vector<8x32xf32> to vector<8x8xf32>
    %cst_90 = arith.constant dense<0.000000e+00> : vector<8x8xf32>
    %299 = tpu.matmul %296, %297, %cst_90 {dimension_numbers = #tpu.dot_dimension_numbers<[1], [1], [0], [0], [0, 0, 1, 0], [], []>} : vector<8x8xf32>, vector<8x8xf32>, vector<8x8xf32> -> vector<8x8xf32>
    %300 = vector.broadcast %5 : vector<1x8xf32> to vector<8x8xf32>
    %301 = arith.addf %299, %300 : vector<8x8xf32>
    %cst_91 = arith.constant dense<0xFF800000> : vector<8xf32>
    %302 = vector.multi_reduction <maximumf>, %301, %cst_91 [1] : vector<8x8xf32> to vector<8xf32>
    %303 = vector.shape_cast %302 : vector<8xf32> to vector<8x1xf32>
    %304 = vector.broadcast %303 : vector<8x1xf32> to vector<8x8xf32>
    %305 = arith.subf %301, %304 : vector<8x8xf32>
    %306 = math.exp %305 : vector<8x8xf32>
    %cst_92 = arith.constant dense<0.000000e+00> : vector<8xf32>
    %307 = vector.multi_reduction <add>, %306, %cst_92 [1] : vector<8x8xf32> to vector<8xf32>
    %308 = vector.shape_cast %307 : vector<8xf32> to vector<8x1xf32>
    %309 = tpu.reciprocal %308 {approx = true} : vector<8x1xf32> -> vector<8x1xf32>
    %310 = vector.broadcast %309 : vector<8x1xf32> to vector<8x8xf32>
    %311 = arith.mulf %306, %310 : vector<8x8xf32>
    %cst_93 = arith.constant dense<0.000000e+00> : vector<8x8xf32>
    %312 = tpu.matmul %311, %298, %cst_93 {dimension_numbers = #tpu.dot_dimension_numbers<[1], [0], [0], [1], [0, 0, 1, 1], [], []>} : vector<8x8xf32>, vector<8x8xf32>, vector<8x8xf32> -> vector<8x8xf32>
    %313 = vector.extract_strided_slice %271 {offsets = [0, 16], sizes = [8, 8], strides = [1, 1]} : vector<8x32xf32> to vector<8x8xf32>
    %314 = vector.extract_strided_slice %277 {offsets = [0, 16], sizes = [8, 8], strides = [1, 1]} : vector<8x32xf32> to vector<8x8xf32>
    %315 = vector.extract_strided_slice %278 {offsets = [0, 16], sizes = [8, 8], strides = [1, 1]} : vector<8x32xf32> to vector<8x8xf32>
    %cst_94 = arith.constant dense<0.000000e+00> : vector<8x8xf32>
    %316 = tpu.matmul %313, %314, %cst_94 {dimension_numbers = #tpu.dot_dimension_numbers<[1], [1], [0], [0], [0, 0, 1, 0], [], []>} : vector<8x8xf32>, vector<8x8xf32>, vector<8x8xf32> -> vector<8x8xf32>
    %317 = vector.broadcast %5 : vector<1x8xf32> to vector<8x8xf32>
    %318 = arith.addf %316, %317 : vector<8x8xf32>
    %cst_95 = arith.constant dense<0xFF800000> : vector<8xf32>
    %319 = vector.multi_reduction <maximumf>, %318, %cst_95 [1] : vector<8x8xf32> to vector<8xf32>
    %320 = vector.shape_cast %319 : vector<8xf32> to vector<8x1xf32>
    %321 = vector.broadcast %320 : vector<8x1xf32> to vector<8x8xf32>
    %322 = arith.subf %318, %321 : vector<8x8xf32>
    %323 = math.exp %322 : vector<8x8xf32>
    %cst_96 = arith.constant dense<0.000000e+00> : vector<8xf32>
    %324 = vector.multi_reduction <add>, %323, %cst_96 [1] : vector<8x8xf32> to vector<8xf32>
    %325 = vector.shape_cast %324 : vector<8xf32> to vector<8x1xf32>
    %326 = tpu.reciprocal %325 {approx = true} : vector<8x1xf32> -> vector<8x1xf32>
    %327 = vector.broadcast %326 : vector<8x1xf32> to vector<8x8xf32>
    %328 = arith.mulf %323, %327 : vector<8x8xf32>
    %cst_97 = arith.constant dense<0.000000e+00> : vector<8x8xf32>
    %329 = tpu.matmul %328, %315, %cst_97 {dimension_numbers = #tpu.dot_dimension_numbers<[1], [0], [0], [1], [0, 0, 1, 1], [], []>} : vector<8x8xf32>, vector<8x8xf32>, vector<8x8xf32> -> vector<8x8xf32>
    %330 = vector.extract_strided_slice %271 {offsets = [0, 24], sizes = [8, 8], strides = [1, 1]} : vector<8x32xf32> to vector<8x8xf32>
    %331 = vector.extract_strided_slice %277 {offsets = [0, 24], sizes = [8, 8], strides = [1, 1]} : vector<8x32xf32> to vector<8x8xf32>
    %332 = vector.extract_strided_slice %278 {offsets = [0, 24], sizes = [8, 8], strides = [1, 1]} : vector<8x32xf32> to vector<8x8xf32>
    %cst_98 = arith.constant dense<0.000000e+00> : vector<8x8xf32>
    %333 = tpu.matmul %330, %331, %cst_98 {dimension_numbers = #tpu.dot_dimension_numbers<[1], [1], [0], [0], [0, 0, 1, 0], [], []>} : vector<8x8xf32>, vector<8x8xf32>, vector<8x8xf32> -> vector<8x8xf32>
    %334 = vector.broadcast %5 : vector<1x8xf32> to vector<8x8xf32>
    %335 = arith.addf %333, %334 : vector<8x8xf32>
    %cst_99 = arith.constant dense<0xFF800000> : vector<8xf32>
    %336 = vector.multi_reduction <maximumf>, %335, %cst_99 [1] : vector<8x8xf32> to vector<8xf32>
    %337 = vector.shape_cast %336 : vector<8xf32> to vector<8x1xf32>
    %338 = vector.broadcast %337 : vector<8x1xf32> to vector<8x8xf32>
    %339 = arith.subf %335, %338 : vector<8x8xf32>
    %340 = math.exp %339 : vector<8x8xf32>
    %cst_100 = arith.constant dense<0.000000e+00> : vector<8xf32>
    %341 = vector.multi_reduction <add>, %340, %cst_100 [1] : vector<8x8xf32> to vector<8xf32>
    %342 = vector.shape_cast %341 : vector<8xf32> to vector<8x1xf32>
    %343 = tpu.reciprocal %342 {approx = true} : vector<8x1xf32> -> vector<8x1xf32>
    %344 = vector.broadcast %343 : vector<8x1xf32> to vector<8x8xf32>
    %345 = arith.mulf %340, %344 : vector<8x8xf32>
    %cst_101 = arith.constant dense<0.000000e+00> : vector<8x8xf32>
    %346 = tpu.matmul %345, %332, %cst_101 {dimension_numbers = #tpu.dot_dimension_numbers<[1], [0], [0], [1], [0, 0, 1, 1], [], []>} : vector<8x8xf32>, vector<8x8xf32>, vector<8x8xf32> -> vector<8x8xf32>
    %347 = tpu.concatenate %295, %312, %329, %346 in 1 : vector<8x8xf32>, vector<8x8xf32>, vector<8x8xf32>, vector<8x8xf32> -> vector<8x32xf32>
    %c568 = arith.constant 568 : index
    %c0_102 = arith.constant 0 : index
    %348 = vector.load %arg4[%c568, %c0_102] : memref<1088x128xf32, #tpu.memory_space<vmem>>, vector<32x32xf32>
    %c600 = arith.constant 600 : index
    %c0_103 = arith.constant 0 : index
    %349 = vector.load %arg4[%c600, %c0_103] : memref<1088x128xf32, #tpu.memory_space<vmem>>, vector<1x32xf32>
    %cst_104 = arith.constant dense<0.000000e+00> : vector<8x32xf32>
    %350 = tpu.matmul %347, %348, %cst_104 {dimension_numbers = #tpu.dot_dimension_numbers<[1], [0], [0], [1], [0, 0, 1, 1], [], []>} : vector<8x32xf32>, vector<32x32xf32>, vector<8x32xf32> -> vector<8x32xf32>
    %351 = vector.broadcast %349 : vector<1x32xf32> to vector<8x32xf32>
    %352 = arith.addf %350, %351 : vector<8x32xf32>
    %353 = arith.addf %264, %352 : vector<8x32xf32>
    %cst_105 = arith.constant dense<0.000000e+00> : vector<8xf32>
    %354 = vector.multi_reduction <add>, %353, %cst_105 [1] : vector<8x32xf32> to vector<8xf32>
    %355 = vector.shape_cast %354 : vector<8xf32> to vector<8x1xf32>
    %cst_106 = arith.constant 3.200000e+01 : f32
    %356 = vector.broadcast %cst_106 : f32 to vector<8x1xf32>
    %357 = arith.divf %355, %356 : vector<8x1xf32>
    %358 = vector.broadcast %357 : vector<8x1xf32> to vector<8x32xf32>
    %359 = arith.subf %353, %358 : vector<8x32xf32>
    %360 = vector.broadcast %357 : vector<8x1xf32> to vector<8x32xf32>
    %361 = arith.subf %353, %360 : vector<8x32xf32>
    %362 = arith.mulf %359, %361 : vector<8x32xf32>
    %cst_107 = arith.constant dense<0.000000e+00> : vector<8xf32>
    %363 = vector.multi_reduction <add>, %362, %cst_107 [1] : vector<8x32xf32> to vector<8xf32>
    %364 = vector.shape_cast %363 : vector<8xf32> to vector<8x1xf32>
    %cst_108 = arith.constant 3.200000e+01 : f32
    %365 = vector.broadcast %cst_108 : f32 to vector<8x1xf32>
    %366 = arith.divf %364, %365 : vector<8x1xf32>
    %367 = vector.broadcast %357 : vector<8x1xf32> to vector<8x32xf32>
    %368 = arith.subf %353, %367 : vector<8x32xf32>
    %cst_109 = arith.constant 9.99999997E-7 : f32
    %369 = vector.broadcast %cst_109 : f32 to vector<8x1xf32>
    %370 = arith.addf %366, %369 : vector<8x1xf32>
    %371 = math.rsqrt %370 : vector<8x1xf32>
    %372 = vector.broadcast %371 : vector<8x1xf32> to vector<8x32xf32>
    %373 = arith.mulf %368, %372 : vector<8x32xf32>
    %c736 = arith.constant 736 : index
    %c0_110 = arith.constant 0 : index
    %374 = vector.load %arg4[%c736, %c0_110] : memref<1088x128xf32, #tpu.memory_space<vmem>>, vector<1x32xf32>
    %375 = vector.broadcast %374 : vector<1x32xf32> to vector<8x32xf32>
    %376 = arith.mulf %373, %375 : vector<8x32xf32>
    %c744 = arith.constant 744 : index
    %c0_111 = arith.constant 0 : index
    %377 = vector.load %arg4[%c744, %c0_111] : memref<1088x128xf32, #tpu.memory_space<vmem>>, vector<1x32xf32>
    %378 = vector.broadcast %377 : vector<1x32xf32> to vector<8x32xf32>
    %379 = arith.addf %376, %378 : vector<8x32xf32>
    %c608 = arith.constant 608 : index
    %c0_112 = arith.constant 0 : index
    %380 = vector.load %arg4[%c608, %c0_112] : memref<1088x128xf32, #tpu.memory_space<vmem>>, vector<32x64xf32>
    %cst_113 = arith.constant dense<0.000000e+00> : vector<8x64xf32>
    %381 = tpu.matmul %379, %380, %cst_113 {dimension_numbers = #tpu.dot_dimension_numbers<[1], [0], [0], [1], [0, 0, 1, 1], [], []>} : vector<8x32xf32>, vector<32x64xf32>, vector<8x64xf32> -> vector<8x64xf32>
    %c640 = arith.constant 640 : index
    %c0_114 = arith.constant 0 : index
    %382 = vector.load %arg4[%c640, %c0_114] : memref<1088x128xf32, #tpu.memory_space<vmem>>, vector<1x64xf32>
    %383 = vector.broadcast %382 : vector<1x64xf32> to vector<8x64xf32>
    %384 = arith.addf %381, %383 : vector<8x64xf32>
    %cst_115 = arith.constant 0.000000e+00 : f32
    %385 = vector.broadcast %cst_115 : f32 to vector<8x64xf32>
    %386 = arith.maximumf %384, %385 : vector<8x64xf32>
    %c648 = arith.constant 648 : index
    %c0_116 = arith.constant 0 : index
    %387 = vector.load %arg4[%c648, %c0_116] : memref<1088x128xf32, #tpu.memory_space<vmem>>, vector<64x32xf32>
    %cst_117 = arith.constant dense<0.000000e+00> : vector<8x32xf32>
    %388 = tpu.matmul %386, %387, %cst_117 {dimension_numbers = #tpu.dot_dimension_numbers<[1], [0], [0], [1], [0, 0, 1, 1], [], []>} : vector<8x64xf32>, vector<64x32xf32>, vector<8x32xf32> -> vector<8x32xf32>
    %c712 = arith.constant 712 : index
    %c0_118 = arith.constant 0 : index
    %389 = vector.load %arg4[%c712, %c0_118] : memref<1088x128xf32, #tpu.memory_space<vmem>>, vector<1x32xf32>
    %390 = vector.broadcast %389 : vector<1x32xf32> to vector<8x32xf32>
    %391 = arith.addf %388, %390 : vector<8x32xf32>
    %392 = arith.addf %379, %391 : vector<8x32xf32>
    %cst_119 = arith.constant dense<0.000000e+00> : vector<8xf32>
    %393 = vector.multi_reduction <add>, %392, %cst_119 [1] : vector<8x32xf32> to vector<8xf32>
    %394 = vector.shape_cast %393 : vector<8xf32> to vector<8x1xf32>
    %cst_120 = arith.constant 3.200000e+01 : f32
    %395 = vector.broadcast %cst_120 : f32 to vector<8x1xf32>
    %396 = arith.divf %394, %395 : vector<8x1xf32>
    %397 = vector.broadcast %396 : vector<8x1xf32> to vector<8x32xf32>
    %398 = arith.subf %392, %397 : vector<8x32xf32>
    %399 = vector.broadcast %396 : vector<8x1xf32> to vector<8x32xf32>
    %400 = arith.subf %392, %399 : vector<8x32xf32>
    %401 = arith.mulf %398, %400 : vector<8x32xf32>
    %cst_121 = arith.constant dense<0.000000e+00> : vector<8xf32>
    %402 = vector.multi_reduction <add>, %401, %cst_121 [1] : vector<8x32xf32> to vector<8xf32>
    %403 = vector.shape_cast %402 : vector<8xf32> to vector<8x1xf32>
    %cst_122 = arith.constant 3.200000e+01 : f32
    %404 = vector.broadcast %cst_122 : f32 to vector<8x1xf32>
    %405 = arith.divf %403, %404 : vector<8x1xf32>
    %406 = vector.broadcast %396 : vector<8x1xf32> to vector<8x32xf32>
    %407 = arith.subf %392, %406 : vector<8x32xf32>
    %cst_123 = arith.constant 9.99999997E-7 : f32
    %408 = vector.broadcast %cst_123 : f32 to vector<8x1xf32>
    %409 = arith.addf %405, %408 : vector<8x1xf32>
    %410 = math.rsqrt %409 : vector<8x1xf32>
    %411 = vector.broadcast %410 : vector<8x1xf32> to vector<8x32xf32>
    %412 = arith.mulf %407, %411 : vector<8x32xf32>
    %c752 = arith.constant 752 : index
    %c0_124 = arith.constant 0 : index
    %413 = vector.load %arg4[%c752, %c0_124] : memref<1088x128xf32, #tpu.memory_space<vmem>>, vector<1x32xf32>
    %414 = vector.broadcast %413 : vector<1x32xf32> to vector<8x32xf32>
    %415 = arith.mulf %412, %414 : vector<8x32xf32>
    %c760 = arith.constant 760 : index
    %c0_125 = arith.constant 0 : index
    %416 = vector.load %arg4[%c760, %c0_125] : memref<1088x128xf32, #tpu.memory_space<vmem>>, vector<1x32xf32>
    %417 = vector.broadcast %416 : vector<1x32xf32> to vector<8x32xf32>
    %418 = arith.addf %415, %417 : vector<8x32xf32>
    %c224 = arith.constant 224 : index
    %c0_126 = arith.constant 0 : index
    %419 = vector.load %arg4[%c224, %c0_126] : memref<1088x128xf32, #tpu.memory_space<vmem>>, vector<32x96xf32>
    %c256 = arith.constant 256 : index
    %c0_127 = arith.constant 0 : index
    %420 = vector.load %arg4[%c256, %c0_127] : memref<1088x128xf32, #tpu.memory_space<vmem>>, vector<1x96xf32>
    %cst_128 = arith.constant dense<0.000000e+00> : vector<8x96xf32>
    %421 = tpu.matmul %155, %419, %cst_128 {dimension_numbers = #tpu.dot_dimension_numbers<[1], [0], [0], [1], [0, 0, 1, 1], [], []>} : vector<8x32xf32>, vector<32x96xf32>, vector<8x96xf32> -> vector<8x96xf32>
    %422 = vector.broadcast %420 : vector<1x96xf32> to vector<8x96xf32>
    %423 = arith.addf %421, %422 : vector<8x96xf32>
    %424 = vector.extract_strided_slice %423 {offsets = [0, 0], sizes = [8, 32], strides = [1, 1]} : vector<8x96xf32> to vector<8x32xf32>
    %425 = vector.extract_strided_slice %423 {offsets = [0, 32], sizes = [8, 32], strides = [1, 1]} : vector<8x96xf32> to vector<8x32xf32>
    %426 = vector.extract_strided_slice %423 {offsets = [0, 64], sizes = [8, 32], strides = [1, 1]} : vector<8x96xf32> to vector<8x32xf32>
    %427 = vector.extract_strided_slice %424 {offsets = [0, 0], sizes = [8, 8], strides = [1, 1]} : vector<8x32xf32> to vector<8x8xf32>
    %428 = vector.extract_strided_slice %425 {offsets = [0, 0], sizes = [8, 8], strides = [1, 1]} : vector<8x32xf32> to vector<8x8xf32>
    %429 = vector.extract_strided_slice %426 {offsets = [0, 0], sizes = [8, 8], strides = [1, 1]} : vector<8x32xf32> to vector<8x8xf32>
    %cst_129 = arith.constant dense<0.000000e+00> : vector<8x8xf32>
    %430 = tpu.matmul %427, %428, %cst_129 {dimension_numbers = #tpu.dot_dimension_numbers<[1], [1], [0], [0], [0, 0, 1, 0], [], []>} : vector<8x8xf32>, vector<8x8xf32>, vector<8x8xf32> -> vector<8x8xf32>
    %431 = vector.broadcast %5 : vector<1x8xf32> to vector<8x8xf32>
    %432 = arith.addf %430, %431 : vector<8x8xf32>
    %cst_130 = arith.constant dense<0xFF800000> : vector<8xf32>
    %433 = vector.multi_reduction <maximumf>, %432, %cst_130 [1] : vector<8x8xf32> to vector<8xf32>
    %434 = vector.shape_cast %433 : vector<8xf32> to vector<8x1xf32>
    %435 = vector.broadcast %434 : vector<8x1xf32> to vector<8x8xf32>
    %436 = arith.subf %432, %435 : vector<8x8xf32>
    %437 = math.exp %436 : vector<8x8xf32>
    %cst_131 = arith.constant dense<0.000000e+00> : vector<8xf32>
    %438 = vector.multi_reduction <add>, %437, %cst_131 [1] : vector<8x8xf32> to vector<8xf32>
    %439 = vector.shape_cast %438 : vector<8xf32> to vector<8x1xf32>
    %440 = tpu.reciprocal %439 {approx = true} : vector<8x1xf32> -> vector<8x1xf32>
    %441 = vector.broadcast %440 : vector<8x1xf32> to vector<8x8xf32>
    %442 = arith.mulf %437, %441 : vector<8x8xf32>
    %cst_132 = arith.constant dense<0.000000e+00> : vector<8x8xf32>
    %443 = tpu.matmul %442, %429, %cst_132 {dimension_numbers = #tpu.dot_dimension_numbers<[1], [0], [0], [1], [0, 0, 1, 1], [], []>} : vector<8x8xf32>, vector<8x8xf32>, vector<8x8xf32> -> vector<8x8xf32>
    %444 = vector.extract_strided_slice %424 {offsets = [0, 8], sizes = [8, 8], strides = [1, 1]} : vector<8x32xf32> to vector<8x8xf32>
    %445 = vector.extract_strided_slice %425 {offsets = [0, 8], sizes = [8, 8], strides = [1, 1]} : vector<8x32xf32> to vector<8x8xf32>
    %446 = vector.extract_strided_slice %426 {offsets = [0, 8], sizes = [8, 8], strides = [1, 1]} : vector<8x32xf32> to vector<8x8xf32>
    %cst_133 = arith.constant dense<0.000000e+00> : vector<8x8xf32>
    %447 = tpu.matmul %444, %445, %cst_133 {dimension_numbers = #tpu.dot_dimension_numbers<[1], [1], [0], [0], [0, 0, 1, 0], [], []>} : vector<8x8xf32>, vector<8x8xf32>, vector<8x8xf32> -> vector<8x8xf32>
    %448 = vector.broadcast %5 : vector<1x8xf32> to vector<8x8xf32>
    %449 = arith.addf %447, %448 : vector<8x8xf32>
    %cst_134 = arith.constant dense<0xFF800000> : vector<8xf32>
    %450 = vector.multi_reduction <maximumf>, %449, %cst_134 [1] : vector<8x8xf32> to vector<8xf32>
    %451 = vector.shape_cast %450 : vector<8xf32> to vector<8x1xf32>
    %452 = vector.broadcast %451 : vector<8x1xf32> to vector<8x8xf32>
    %453 = arith.subf %449, %452 : vector<8x8xf32>
    %454 = math.exp %453 : vector<8x8xf32>
    %cst_135 = arith.constant dense<0.000000e+00> : vector<8xf32>
    %455 = vector.multi_reduction <add>, %454, %cst_135 [1] : vector<8x8xf32> to vector<8xf32>
    %456 = vector.shape_cast %455 : vector<8xf32> to vector<8x1xf32>
    %457 = tpu.reciprocal %456 {approx = true} : vector<8x1xf32> -> vector<8x1xf32>
    %458 = vector.broadcast %457 : vector<8x1xf32> to vector<8x8xf32>
    %459 = arith.mulf %454, %458 : vector<8x8xf32>
    %cst_136 = arith.constant dense<0.000000e+00> : vector<8x8xf32>
    %460 = tpu.matmul %459, %446, %cst_136 {dimension_numbers = #tpu.dot_dimension_numbers<[1], [0], [0], [1], [0, 0, 1, 1], [], []>} : vector<8x8xf32>, vector<8x8xf32>, vector<8x8xf32> -> vector<8x8xf32>
    %461 = vector.extract_strided_slice %424 {offsets = [0, 16], sizes = [8, 8], strides = [1, 1]} : vector<8x32xf32> to vector<8x8xf32>
    %462 = vector.extract_strided_slice %425 {offsets = [0, 16], sizes = [8, 8], strides = [1, 1]} : vector<8x32xf32> to vector<8x8xf32>
    %463 = vector.extract_strided_slice %426 {offsets = [0, 16], sizes = [8, 8], strides = [1, 1]} : vector<8x32xf32> to vector<8x8xf32>
    %cst_137 = arith.constant dense<0.000000e+00> : vector<8x8xf32>
    %464 = tpu.matmul %461, %462, %cst_137 {dimension_numbers = #tpu.dot_dimension_numbers<[1], [1], [0], [0], [0, 0, 1, 0], [], []>} : vector<8x8xf32>, vector<8x8xf32>, vector<8x8xf32> -> vector<8x8xf32>
    %465 = vector.broadcast %5 : vector<1x8xf32> to vector<8x8xf32>
    %466 = arith.addf %464, %465 : vector<8x8xf32>
    %cst_138 = arith.constant dense<0xFF800000> : vector<8xf32>
    %467 = vector.multi_reduction <maximumf>, %466, %cst_138 [1] : vector<8x8xf32> to vector<8xf32>
    %468 = vector.shape_cast %467 : vector<8xf32> to vector<8x1xf32>
    %469 = vector.broadcast %468 : vector<8x1xf32> to vector<8x8xf32>
    %470 = arith.subf %466, %469 : vector<8x8xf32>
    %471 = math.exp %470 : vector<8x8xf32>
    %cst_139 = arith.constant dense<0.000000e+00> : vector<8xf32>
    %472 = vector.multi_reduction <add>, %471, %cst_139 [1] : vector<8x8xf32> to vector<8xf32>
    %473 = vector.shape_cast %472 : vector<8xf32> to vector<8x1xf32>
    %474 = tpu.reciprocal %473 {approx = true} : vector<8x1xf32> -> vector<8x1xf32>
    %475 = vector.broadcast %474 : vector<8x1xf32> to vector<8x8xf32>
    %476 = arith.mulf %471, %475 : vector<8x8xf32>
    %cst_140 = arith.constant dense<0.000000e+00> : vector<8x8xf32>
    %477 = tpu.matmul %476, %463, %cst_140 {dimension_numbers = #tpu.dot_dimension_numbers<[1], [0], [0], [1], [0, 0, 1, 1], [], []>} : vector<8x8xf32>, vector<8x8xf32>, vector<8x8xf32> -> vector<8x8xf32>
    %478 = vector.extract_strided_slice %424 {offsets = [0, 24], sizes = [8, 8], strides = [1, 1]} : vector<8x32xf32> to vector<8x8xf32>
    %479 = vector.extract_strided_slice %425 {offsets = [0, 24], sizes = [8, 8], strides = [1, 1]} : vector<8x32xf32> to vector<8x8xf32>
    %480 = vector.extract_strided_slice %426 {offsets = [0, 24], sizes = [8, 8], strides = [1, 1]} : vector<8x32xf32> to vector<8x8xf32>
    %cst_141 = arith.constant dense<0.000000e+00> : vector<8x8xf32>
    %481 = tpu.matmul %478, %479, %cst_141 {dimension_numbers = #tpu.dot_dimension_numbers<[1], [1], [0], [0], [0, 0, 1, 0], [], []>} : vector<8x8xf32>, vector<8x8xf32>, vector<8x8xf32> -> vector<8x8xf32>
    %482 = vector.broadcast %5 : vector<1x8xf32> to vector<8x8xf32>
    %483 = arith.addf %481, %482 : vector<8x8xf32>
    %cst_142 = arith.constant dense<0xFF800000> : vector<8xf32>
    %484 = vector.multi_reduction <maximumf>, %483, %cst_142 [1] : vector<8x8xf32> to vector<8xf32>
    %485 = vector.shape_cast %484 : vector<8xf32> to vector<8x1xf32>
    %486 = vector.broadcast %485 : vector<8x1xf32> to vector<8x8xf32>
    %487 = arith.subf %483, %486 : vector<8x8xf32>
    %488 = math.exp %487 : vector<8x8xf32>
    %cst_143 = arith.constant dense<0.000000e+00> : vector<8xf32>
    %489 = vector.multi_reduction <add>, %488, %cst_143 [1] : vector<8x8xf32> to vector<8xf32>
    %490 = vector.shape_cast %489 : vector<8xf32> to vector<8x1xf32>
    %491 = tpu.reciprocal %490 {approx = true} : vector<8x1xf32> -> vector<8x1xf32>
    %492 = vector.broadcast %491 : vector<8x1xf32> to vector<8x8xf32>
    %493 = arith.mulf %488, %492 : vector<8x8xf32>
    %cst_144 = arith.constant dense<0.000000e+00> : vector<8x8xf32>
    %494 = tpu.matmul %493, %480, %cst_144 {dimension_numbers = #tpu.dot_dimension_numbers<[1], [0], [0], [1], [0, 0, 1, 1], [], []>} : vector<8x8xf32>, vector<8x8xf32>, vector<8x8xf32> -> vector<8x8xf32>
    %495 = tpu.concatenate %443, %460, %477, %494 in 1 : vector<8x8xf32>, vector<8x8xf32>, vector<8x8xf32>, vector<8x8xf32> -> vector<8x32xf32>
    %c264 = arith.constant 264 : index
    %c0_145 = arith.constant 0 : index
    %496 = vector.load %arg4[%c264, %c0_145] : memref<1088x128xf32, #tpu.memory_space<vmem>>, vector<32x32xf32>
    %c296 = arith.constant 296 : index
    %c0_146 = arith.constant 0 : index
    %497 = vector.load %arg4[%c296, %c0_146] : memref<1088x128xf32, #tpu.memory_space<vmem>>, vector<1x32xf32>
    %cst_147 = arith.constant dense<0.000000e+00> : vector<8x32xf32>
    %498 = tpu.matmul %495, %496, %cst_147 {dimension_numbers = #tpu.dot_dimension_numbers<[1], [0], [0], [1], [0, 0, 1, 1], [], []>} : vector<8x32xf32>, vector<32x32xf32>, vector<8x32xf32> -> vector<8x32xf32>
    %499 = vector.broadcast %497 : vector<1x32xf32> to vector<8x32xf32>
    %500 = arith.addf %498, %499 : vector<8x32xf32>
    %501 = arith.addf %155, %500 : vector<8x32xf32>
    %cst_148 = arith.constant dense<0.000000e+00> : vector<8xf32>
    %502 = vector.multi_reduction <add>, %501, %cst_148 [1] : vector<8x32xf32> to vector<8xf32>
    %503 = vector.shape_cast %502 : vector<8xf32> to vector<8x1xf32>
    %cst_149 = arith.constant 3.200000e+01 : f32
    %504 = vector.broadcast %cst_149 : f32 to vector<8x1xf32>
    %505 = arith.divf %503, %504 : vector<8x1xf32>
    %506 = vector.broadcast %505 : vector<8x1xf32> to vector<8x32xf32>
    %507 = arith.subf %501, %506 : vector<8x32xf32>
    %508 = vector.broadcast %505 : vector<8x1xf32> to vector<8x32xf32>
    %509 = arith.subf %501, %508 : vector<8x32xf32>
    %510 = arith.mulf %507, %509 : vector<8x32xf32>
    %cst_150 = arith.constant dense<0.000000e+00> : vector<8xf32>
    %511 = vector.multi_reduction <add>, %510, %cst_150 [1] : vector<8x32xf32> to vector<8xf32>
    %512 = vector.shape_cast %511 : vector<8xf32> to vector<8x1xf32>
    %cst_151 = arith.constant 3.200000e+01 : f32
    %513 = vector.broadcast %cst_151 : f32 to vector<8x1xf32>
    %514 = arith.divf %512, %513 : vector<8x1xf32>
    %515 = vector.broadcast %505 : vector<8x1xf32> to vector<8x32xf32>
    %516 = arith.subf %501, %515 : vector<8x32xf32>
    %cst_152 = arith.constant 9.99999997E-7 : f32
    %517 = vector.broadcast %cst_152 : f32 to vector<8x1xf32>
    %518 = arith.addf %514, %517 : vector<8x1xf32>
    %519 = math.rsqrt %518 : vector<8x1xf32>
    %520 = vector.broadcast %519 : vector<8x1xf32> to vector<8x32xf32>
    %521 = arith.mulf %516, %520 : vector<8x32xf32>
    %c416 = arith.constant 416 : index
    %c0_153 = arith.constant 0 : index
    %522 = vector.load %arg4[%c416, %c0_153] : memref<1088x128xf32, #tpu.memory_space<vmem>>, vector<1x32xf32>
    %523 = vector.broadcast %522 : vector<1x32xf32> to vector<8x32xf32>
    %524 = arith.mulf %521, %523 : vector<8x32xf32>
    %c424 = arith.constant 424 : index
    %c0_154 = arith.constant 0 : index
    %525 = vector.load %arg4[%c424, %c0_154] : memref<1088x128xf32, #tpu.memory_space<vmem>>, vector<1x32xf32>
    %526 = vector.broadcast %525 : vector<1x32xf32> to vector<8x32xf32>
    %527 = arith.addf %524, %526 : vector<8x32xf32>
    %c304 = arith.constant 304 : index
    %c0_155 = arith.constant 0 : index
    %528 = vector.load %arg4[%c304, %c0_155] : memref<1088x128xf32, #tpu.memory_space<vmem>>, vector<32x64xf32>
    %cst_156 = arith.constant dense<0.000000e+00> : vector<8x64xf32>
    %529 = tpu.matmul %527, %528, %cst_156 {dimension_numbers = #tpu.dot_dimension_numbers<[1], [0], [0], [1], [0, 0, 1, 1], [], []>} : vector<8x32xf32>, vector<32x64xf32>, vector<8x64xf32> -> vector<8x64xf32>
    %c336 = arith.constant 336 : index
    %c0_157 = arith.constant 0 : index
    %530 = vector.load %arg4[%c336, %c0_157] : memref<1088x128xf32, #tpu.memory_space<vmem>>, vector<1x64xf32>
    %531 = vector.broadcast %530 : vector<1x64xf32> to vector<8x64xf32>
    %532 = arith.addf %529, %531 : vector<8x64xf32>
    %cst_158 = arith.constant 0.000000e+00 : f32
    %533 = vector.broadcast %cst_158 : f32 to vector<8x64xf32>
    %534 = arith.maximumf %532, %533 : vector<8x64xf32>
    %c344 = arith.constant 344 : index
    %c0_159 = arith.constant 0 : index
    %535 = vector.load %arg4[%c344, %c0_159] : memref<1088x128xf32, #tpu.memory_space<vmem>>, vector<64x32xf32>
    %cst_160 = arith.constant dense<0.000000e+00> : vector<8x32xf32>
    %536 = tpu.matmul %534, %535, %cst_160 {dimension_numbers = #tpu.dot_dimension_numbers<[1], [0], [0], [1], [0, 0, 1, 1], [], []>} : vector<8x64xf32>, vector<64x32xf32>, vector<8x32xf32> -> vector<8x32xf32>
    %c408 = arith.constant 408 : index
    %c0_161 = arith.constant 0 : index
    %537 = vector.load %arg4[%c408, %c0_161] : memref<1088x128xf32, #tpu.memory_space<vmem>>, vector<1x32xf32>
    %538 = vector.broadcast %537 : vector<1x32xf32> to vector<8x32xf32>
    %539 = arith.addf %536, %538 : vector<8x32xf32>
    %540 = arith.addf %527, %539 : vector<8x32xf32>
    %cst_162 = arith.constant dense<0.000000e+00> : vector<8xf32>
    %541 = vector.multi_reduction <add>, %540, %cst_162 [1] : vector<8x32xf32> to vector<8xf32>
    %542 = vector.shape_cast %541 : vector<8xf32> to vector<8x1xf32>
    %cst_163 = arith.constant 3.200000e+01 : f32
    %543 = vector.broadcast %cst_163 : f32 to vector<8x1xf32>
    %544 = arith.divf %542, %543 : vector<8x1xf32>
    %545 = vector.broadcast %544 : vector<8x1xf32> to vector<8x32xf32>
    %546 = arith.subf %540, %545 : vector<8x32xf32>
    %547 = vector.broadcast %544 : vector<8x1xf32> to vector<8x32xf32>
    %548 = arith.subf %540, %547 : vector<8x32xf32>
    %549 = arith.mulf %546, %548 : vector<8x32xf32>
    %cst_164 = arith.constant dense<0.000000e+00> : vector<8xf32>
    %550 = vector.multi_reduction <add>, %549, %cst_164 [1] : vector<8x32xf32> to vector<8xf32>
    %551 = vector.shape_cast %550 : vector<8xf32> to vector<8x1xf32>
    %cst_165 = arith.constant 3.200000e+01 : f32
    %552 = vector.broadcast %cst_165 : f32 to vector<8x1xf32>
    %553 = arith.divf %551, %552 : vector<8x1xf32>
    %554 = vector.broadcast %544 : vector<8x1xf32> to vector<8x32xf32>
    %555 = arith.subf %540, %554 : vector<8x32xf32>
    %cst_166 = arith.constant 9.99999997E-7 : f32
    %556 = vector.broadcast %cst_166 : f32 to vector<8x1xf32>
    %557 = arith.addf %553, %556 : vector<8x1xf32>
    %558 = math.rsqrt %557 : vector<8x1xf32>
    %559 = vector.broadcast %558 : vector<8x1xf32> to vector<8x32xf32>
    %560 = arith.mulf %555, %559 : vector<8x32xf32>
    %c432 = arith.constant 432 : index
    %c0_167 = arith.constant 0 : index
    %561 = vector.load %arg4[%c432, %c0_167] : memref<1088x128xf32, #tpu.memory_space<vmem>>, vector<1x32xf32>
    %562 = vector.broadcast %561 : vector<1x32xf32> to vector<8x32xf32>
    %563 = arith.mulf %560, %562 : vector<8x32xf32>
    %c440 = arith.constant 440 : index
    %c0_168 = arith.constant 0 : index
    %564 = vector.load %arg4[%c440, %c0_168] : memref<1088x128xf32, #tpu.memory_space<vmem>>, vector<1x32xf32>
    %565 = vector.broadcast %564 : vector<1x32xf32> to vector<8x32xf32>
    %566 = arith.addf %563, %565 : vector<8x32xf32>
    %c768 = arith.constant 768 : index
    %c0_169 = arith.constant 0 : index
    %567 = vector.load %arg4[%c768, %c0_169] : memref<1088x128xf32, #tpu.memory_space<vmem>>, vector<32x96xf32>
    %c800 = arith.constant 800 : index
    %c0_170 = arith.constant 0 : index
    %568 = vector.load %arg4[%c800, %c0_170] : memref<1088x128xf32, #tpu.memory_space<vmem>>, vector<1x96xf32>
    %cst_171 = arith.constant dense<0.000000e+00> : vector<8x96xf32>
    %569 = tpu.matmul %418, %567, %cst_171 {dimension_numbers = #tpu.dot_dimension_numbers<[1], [0], [0], [1], [0, 0, 1, 1], [], []>} : vector<8x32xf32>, vector<32x96xf32>, vector<8x96xf32> -> vector<8x96xf32>
    %570 = vector.broadcast %568 : vector<1x96xf32> to vector<8x96xf32>
    %571 = arith.addf %569, %570 : vector<8x96xf32>
    %572 = vector.extract_strided_slice %571 {offsets = [0, 0], sizes = [8, 32], strides = [1, 1]} : vector<8x96xf32> to vector<8x32xf32>
    %573 = vector.extract_strided_slice %571 {offsets = [0, 32], sizes = [8, 32], strides = [1, 1]} : vector<8x96xf32> to vector<8x32xf32>
    %574 = vector.extract_strided_slice %571 {offsets = [0, 64], sizes = [8, 32], strides = [1, 1]} : vector<8x96xf32> to vector<8x32xf32>
    %575 = vector.extract_strided_slice %572 {offsets = [0, 0], sizes = [8, 8], strides = [1, 1]} : vector<8x32xf32> to vector<8x8xf32>
    %576 = vector.extract_strided_slice %573 {offsets = [0, 0], sizes = [8, 8], strides = [1, 1]} : vector<8x32xf32> to vector<8x8xf32>
    %577 = vector.extract_strided_slice %574 {offsets = [0, 0], sizes = [8, 8], strides = [1, 1]} : vector<8x32xf32> to vector<8x8xf32>
    %cst_172 = arith.constant dense<0.000000e+00> : vector<8x8xf32>
    %578 = tpu.matmul %575, %576, %cst_172 {dimension_numbers = #tpu.dot_dimension_numbers<[1], [1], [0], [0], [0, 0, 1, 0], [], []>} : vector<8x8xf32>, vector<8x8xf32>, vector<8x8xf32> -> vector<8x8xf32>
    %579 = vector.broadcast %7 : vector<1x8xf32> to vector<8x8xf32>
    %580 = arith.addf %578, %579 : vector<8x8xf32>
    %cst_173 = arith.constant dense<0xFF800000> : vector<8xf32>
    %581 = vector.multi_reduction <maximumf>, %580, %cst_173 [1] : vector<8x8xf32> to vector<8xf32>
    %582 = vector.shape_cast %581 : vector<8xf32> to vector<8x1xf32>
    %583 = vector.broadcast %582 : vector<8x1xf32> to vector<8x8xf32>
    %584 = arith.subf %580, %583 : vector<8x8xf32>
    %585 = math.exp %584 : vector<8x8xf32>
    %cst_174 = arith.constant dense<0.000000e+00> : vector<8xf32>
    %586 = vector.multi_reduction <add>, %585, %cst_174 [1] : vector<8x8xf32> to vector<8xf32>
    %587 = vector.shape_cast %586 : vector<8xf32> to vector<8x1xf32>
    %588 = tpu.reciprocal %587 {approx = true} : vector<8x1xf32> -> vector<8x1xf32>
    %589 = vector.broadcast %588 : vector<8x1xf32> to vector<8x8xf32>
    %590 = arith.mulf %585, %589 : vector<8x8xf32>
    %cst_175 = arith.constant dense<0.000000e+00> : vector<8x8xf32>
    %591 = tpu.matmul %590, %577, %cst_175 {dimension_numbers = #tpu.dot_dimension_numbers<[1], [0], [0], [1], [0, 0, 1, 1], [], []>} : vector<8x8xf32>, vector<8x8xf32>, vector<8x8xf32> -> vector<8x8xf32>
    %592 = vector.extract_strided_slice %572 {offsets = [0, 8], sizes = [8, 8], strides = [1, 1]} : vector<8x32xf32> to vector<8x8xf32>
    %593 = vector.extract_strided_slice %573 {offsets = [0, 8], sizes = [8, 8], strides = [1, 1]} : vector<8x32xf32> to vector<8x8xf32>
    %594 = vector.extract_strided_slice %574 {offsets = [0, 8], sizes = [8, 8], strides = [1, 1]} : vector<8x32xf32> to vector<8x8xf32>
    %cst_176 = arith.constant dense<0.000000e+00> : vector<8x8xf32>
    %595 = tpu.matmul %592, %593, %cst_176 {dimension_numbers = #tpu.dot_dimension_numbers<[1], [1], [0], [0], [0, 0, 1, 0], [], []>} : vector<8x8xf32>, vector<8x8xf32>, vector<8x8xf32> -> vector<8x8xf32>
    %596 = vector.broadcast %7 : vector<1x8xf32> to vector<8x8xf32>
    %597 = arith.addf %595, %596 : vector<8x8xf32>
    %cst_177 = arith.constant dense<0xFF800000> : vector<8xf32>
    %598 = vector.multi_reduction <maximumf>, %597, %cst_177 [1] : vector<8x8xf32> to vector<8xf32>
    %599 = vector.shape_cast %598 : vector<8xf32> to vector<8x1xf32>
    %600 = vector.broadcast %599 : vector<8x1xf32> to vector<8x8xf32>
    %601 = arith.subf %597, %600 : vector<8x8xf32>
    %602 = math.exp %601 : vector<8x8xf32>
    %cst_178 = arith.constant dense<0.000000e+00> : vector<8xf32>
    %603 = vector.multi_reduction <add>, %602, %cst_178 [1] : vector<8x8xf32> to vector<8xf32>
    %604 = vector.shape_cast %603 : vector<8xf32> to vector<8x1xf32>
    %605 = tpu.reciprocal %604 {approx = true} : vector<8x1xf32> -> vector<8x1xf32>
    %606 = vector.broadcast %605 : vector<8x1xf32> to vector<8x8xf32>
    %607 = arith.mulf %602, %606 : vector<8x8xf32>
    %cst_179 = arith.constant dense<0.000000e+00> : vector<8x8xf32>
    %608 = tpu.matmul %607, %594, %cst_179 {dimension_numbers = #tpu.dot_dimension_numbers<[1], [0], [0], [1], [0, 0, 1, 1], [], []>} : vector<8x8xf32>, vector<8x8xf32>, vector<8x8xf32> -> vector<8x8xf32>
    %609 = vector.extract_strided_slice %572 {offsets = [0, 16], sizes = [8, 8], strides = [1, 1]} : vector<8x32xf32> to vector<8x8xf32>
    %610 = vector.extract_strided_slice %573 {offsets = [0, 16], sizes = [8, 8], strides = [1, 1]} : vector<8x32xf32> to vector<8x8xf32>
    %611 = vector.extract_strided_slice %574 {offsets = [0, 16], sizes = [8, 8], strides = [1, 1]} : vector<8x32xf32> to vector<8x8xf32>
    %cst_180 = arith.constant dense<0.000000e+00> : vector<8x8xf32>
    %612 = tpu.matmul %609, %610, %cst_180 {dimension_numbers = #tpu.dot_dimension_numbers<[1], [1], [0], [0], [0, 0, 1, 0], [], []>} : vector<8x8xf32>, vector<8x8xf32>, vector<8x8xf32> -> vector<8x8xf32>
    %613 = vector.broadcast %7 : vector<1x8xf32> to vector<8x8xf32>
    %614 = arith.addf %612, %613 : vector<8x8xf32>
    %cst_181 = arith.constant dense<0xFF800000> : vector<8xf32>
    %615 = vector.multi_reduction <maximumf>, %614, %cst_181 [1] : vector<8x8xf32> to vector<8xf32>
    %616 = vector.shape_cast %615 : vector<8xf32> to vector<8x1xf32>
    %617 = vector.broadcast %616 : vector<8x1xf32> to vector<8x8xf32>
    %618 = arith.subf %614, %617 : vector<8x8xf32>
    %619 = math.exp %618 : vector<8x8xf32>
    %cst_182 = arith.constant dense<0.000000e+00> : vector<8xf32>
    %620 = vector.multi_reduction <add>, %619, %cst_182 [1] : vector<8x8xf32> to vector<8xf32>
    %621 = vector.shape_cast %620 : vector<8xf32> to vector<8x1xf32>
    %622 = tpu.reciprocal %621 {approx = true} : vector<8x1xf32> -> vector<8x1xf32>
    %623 = vector.broadcast %622 : vector<8x1xf32> to vector<8x8xf32>
    %624 = arith.mulf %619, %623 : vector<8x8xf32>
    %cst_183 = arith.constant dense<0.000000e+00> : vector<8x8xf32>
    %625 = tpu.matmul %624, %611, %cst_183 {dimension_numbers = #tpu.dot_dimension_numbers<[1], [0], [0], [1], [0, 0, 1, 1], [], []>} : vector<8x8xf32>, vector<8x8xf32>, vector<8x8xf32> -> vector<8x8xf32>
    %626 = vector.extract_strided_slice %572 {offsets = [0, 24], sizes = [8, 8], strides = [1, 1]} : vector<8x32xf32> to vector<8x8xf32>
    %627 = vector.extract_strided_slice %573 {offsets = [0, 24], sizes = [8, 8], strides = [1, 1]} : vector<8x32xf32> to vector<8x8xf32>
    %628 = vector.extract_strided_slice %574 {offsets = [0, 24], sizes = [8, 8], strides = [1, 1]} : vector<8x32xf32> to vector<8x8xf32>
    %cst_184 = arith.constant dense<0.000000e+00> : vector<8x8xf32>
    %629 = tpu.matmul %626, %627, %cst_184 {dimension_numbers = #tpu.dot_dimension_numbers<[1], [1], [0], [0], [0, 0, 1, 0], [], []>} : vector<8x8xf32>, vector<8x8xf32>, vector<8x8xf32> -> vector<8x8xf32>
    %630 = vector.broadcast %7 : vector<1x8xf32> to vector<8x8xf32>
    %631 = arith.addf %629, %630 : vector<8x8xf32>
    %cst_185 = arith.constant dense<0xFF800000> : vector<8xf32>
    %632 = vector.multi_reduction <maximumf>, %631, %cst_185 [1] : vector<8x8xf32> to vector<8xf32>
    %633 = vector.shape_cast %632 : vector<8xf32> to vector<8x1xf32>
    %634 = vector.broadcast %633 : vector<8x1xf32> to vector<8x8xf32>
    %635 = arith.subf %631, %634 : vector<8x8xf32>
    %636 = math.exp %635 : vector<8x8xf32>
    %cst_186 = arith.constant dense<0.000000e+00> : vector<8xf32>
    %637 = vector.multi_reduction <add>, %636, %cst_186 [1] : vector<8x8xf32> to vector<8xf32>
    %638 = vector.shape_cast %637 : vector<8xf32> to vector<8x1xf32>
    %639 = tpu.reciprocal %638 {approx = true} : vector<8x1xf32> -> vector<8x1xf32>
    %640 = vector.broadcast %639 : vector<8x1xf32> to vector<8x8xf32>
    %641 = arith.mulf %636, %640 : vector<8x8xf32>
    %cst_187 = arith.constant dense<0.000000e+00> : vector<8x8xf32>
    %642 = tpu.matmul %641, %628, %cst_187 {dimension_numbers = #tpu.dot_dimension_numbers<[1], [0], [0], [1], [0, 0, 1, 1], [], []>} : vector<8x8xf32>, vector<8x8xf32>, vector<8x8xf32> -> vector<8x8xf32>
    %643 = tpu.concatenate %591, %608, %625, %642 in 1 : vector<8x8xf32>, vector<8x8xf32>, vector<8x8xf32>, vector<8x8xf32> -> vector<8x32xf32>
    %c808 = arith.constant 808 : index
    %c0_188 = arith.constant 0 : index
    %644 = vector.load %arg4[%c808, %c0_188] : memref<1088x128xf32, #tpu.memory_space<vmem>>, vector<32x32xf32>
    %c840 = arith.constant 840 : index
    %c0_189 = arith.constant 0 : index
    %645 = vector.load %arg4[%c840, %c0_189] : memref<1088x128xf32, #tpu.memory_space<vmem>>, vector<1x32xf32>
    %cst_190 = arith.constant dense<0.000000e+00> : vector<8x32xf32>
    %646 = tpu.matmul %643, %644, %cst_190 {dimension_numbers = #tpu.dot_dimension_numbers<[1], [0], [0], [1], [0, 0, 1, 1], [], []>} : vector<8x32xf32>, vector<32x32xf32>, vector<8x32xf32> -> vector<8x32xf32>
    %647 = vector.broadcast %645 : vector<1x32xf32> to vector<8x32xf32>
    %648 = arith.addf %646, %647 : vector<8x32xf32>
    %649 = arith.addf %418, %648 : vector<8x32xf32>
    %cst_191 = arith.constant dense<0.000000e+00> : vector<8xf32>
    %650 = vector.multi_reduction <add>, %649, %cst_191 [1] : vector<8x32xf32> to vector<8xf32>
    %651 = vector.shape_cast %650 : vector<8xf32> to vector<8x1xf32>
    %cst_192 = arith.constant 3.200000e+01 : f32
    %652 = vector.broadcast %cst_192 : f32 to vector<8x1xf32>
    %653 = arith.divf %651, %652 : vector<8x1xf32>
    %654 = vector.broadcast %653 : vector<8x1xf32> to vector<8x32xf32>
    %655 = arith.subf %649, %654 : vector<8x32xf32>
    %656 = vector.broadcast %653 : vector<8x1xf32> to vector<8x32xf32>
    %657 = arith.subf %649, %656 : vector<8x32xf32>
    %658 = arith.mulf %655, %657 : vector<8x32xf32>
    %cst_193 = arith.constant dense<0.000000e+00> : vector<8xf32>
    %659 = vector.multi_reduction <add>, %658, %cst_193 [1] : vector<8x32xf32> to vector<8xf32>
    %660 = vector.shape_cast %659 : vector<8xf32> to vector<8x1xf32>
    %cst_194 = arith.constant 3.200000e+01 : f32
    %661 = vector.broadcast %cst_194 : f32 to vector<8x1xf32>
    %662 = arith.divf %660, %661 : vector<8x1xf32>
    %663 = vector.broadcast %653 : vector<8x1xf32> to vector<8x32xf32>
    %664 = arith.subf %649, %663 : vector<8x32xf32>
    %cst_195 = arith.constant 9.99999997E-7 : f32
    %665 = vector.broadcast %cst_195 : f32 to vector<8x1xf32>
    %666 = arith.addf %662, %665 : vector<8x1xf32>
    %667 = math.rsqrt %666 : vector<8x1xf32>
    %668 = vector.broadcast %667 : vector<8x1xf32> to vector<8x32xf32>
    %669 = arith.mulf %664, %668 : vector<8x32xf32>
    %c1040 = arith.constant 1040 : index
    %c0_196 = arith.constant 0 : index
    %670 = vector.load %arg4[%c1040, %c0_196] : memref<1088x128xf32, #tpu.memory_space<vmem>>, vector<1x32xf32>
    %671 = vector.broadcast %670 : vector<1x32xf32> to vector<8x32xf32>
    %672 = arith.mulf %669, %671 : vector<8x32xf32>
    %c1048 = arith.constant 1048 : index
    %c0_197 = arith.constant 0 : index
    %673 = vector.load %arg4[%c1048, %c0_197] : memref<1088x128xf32, #tpu.memory_space<vmem>>, vector<1x32xf32>
    %674 = vector.broadcast %673 : vector<1x32xf32> to vector<8x32xf32>
    %675 = arith.addf %672, %674 : vector<8x32xf32>
    %c848 = arith.constant 848 : index
    %c0_198 = arith.constant 0 : index
    %676 = vector.load %arg4[%c848, %c0_198] : memref<1088x128xf32, #tpu.memory_space<vmem>>, vector<32x96xf32>
    %c880 = arith.constant 880 : index
    %c0_199 = arith.constant 0 : index
    %677 = vector.load %arg4[%c880, %c0_199] : memref<1088x128xf32, #tpu.memory_space<vmem>>, vector<1x96xf32>
    %678 = vector.extract_strided_slice %676 {offsets = [0, 0], sizes = [32, 32], strides = [1, 1]} : vector<32x96xf32> to vector<32x32xf32>
    %cst_200 = arith.constant dense<0.000000e+00> : vector<8x32xf32>
    %679 = tpu.matmul %675, %678, %cst_200 {dimension_numbers = #tpu.dot_dimension_numbers<[1], [0], [0], [1], [0, 0, 1, 1], [], []>} : vector<8x32xf32>, vector<32x32xf32>, vector<8x32xf32> -> vector<8x32xf32>
    %680 = vector.extract_strided_slice %677 {offsets = [0, 0], sizes = [1, 32], strides = [1, 1]} : vector<1x96xf32> to vector<1x32xf32>
    %681 = vector.broadcast %680 : vector<1x32xf32> to vector<8x32xf32>
    %682 = arith.addf %679, %681 : vector<8x32xf32>
    %683 = vector.extract_strided_slice %676 {offsets = [0, 32], sizes = [32, 64], strides = [1, 1]} : vector<32x96xf32> to vector<32x64xf32>
    %cst_201 = arith.constant dense<0.000000e+00> : vector<8x64xf32>
    %684 = tpu.matmul %566, %683, %cst_201 {dimension_numbers = #tpu.dot_dimension_numbers<[1], [0], [0], [1], [0, 0, 1, 1], [], []>} : vector<8x32xf32>, vector<32x64xf32>, vector<8x64xf32> -> vector<8x64xf32>
    %685 = vector.extract_strided_slice %677 {offsets = [0, 32], sizes = [1, 64], strides = [1, 1]} : vector<1x96xf32> to vector<1x64xf32>
    %686 = vector.broadcast %685 : vector<1x64xf32> to vector<8x64xf32>
    %687 = arith.addf %684, %686 : vector<8x64xf32>
    %688 = vector.extract_strided_slice %687 {offsets = [0, 0], sizes = [8, 32], strides = [1, 1]} : vector<8x64xf32> to vector<8x32xf32>
    %689 = vector.extract_strided_slice %687 {offsets = [0, 32], sizes = [8, 32], strides = [1, 1]} : vector<8x64xf32> to vector<8x32xf32>
    %690 = vector.extract_strided_slice %682 {offsets = [0, 0], sizes = [8, 8], strides = [1, 1]} : vector<8x32xf32> to vector<8x8xf32>
    %691 = vector.extract_strided_slice %688 {offsets = [0, 0], sizes = [8, 8], strides = [1, 1]} : vector<8x32xf32> to vector<8x8xf32>
    %692 = vector.extract_strided_slice %689 {offsets = [0, 0], sizes = [8, 8], strides = [1, 1]} : vector<8x32xf32> to vector<8x8xf32>
    %cst_202 = arith.constant dense<0.000000e+00> : vector<8x8xf32>
    %693 = tpu.matmul %690, %691, %cst_202 {dimension_numbers = #tpu.dot_dimension_numbers<[1], [1], [0], [0], [0, 0, 1, 0], [], []>} : vector<8x8xf32>, vector<8x8xf32>, vector<8x8xf32> -> vector<8x8xf32>
    %694 = vector.broadcast %5 : vector<1x8xf32> to vector<8x8xf32>
    %695 = arith.addf %693, %694 : vector<8x8xf32>
    %cst_203 = arith.constant dense<0xFF800000> : vector<8xf32>
    %696 = vector.multi_reduction <maximumf>, %695, %cst_203 [1] : vector<8x8xf32> to vector<8xf32>
    %697 = vector.shape_cast %696 : vector<8xf32> to vector<8x1xf32>
    %698 = vector.broadcast %697 : vector<8x1xf32> to vector<8x8xf32>
    %699 = arith.subf %695, %698 : vector<8x8xf32>
    %700 = math.exp %699 : vector<8x8xf32>
    %cst_204 = arith.constant dense<0.000000e+00> : vector<8xf32>
    %701 = vector.multi_reduction <add>, %700, %cst_204 [1] : vector<8x8xf32> to vector<8xf32>
    %702 = vector.shape_cast %701 : vector<8xf32> to vector<8x1xf32>
    %703 = tpu.reciprocal %702 {approx = true} : vector<8x1xf32> -> vector<8x1xf32>
    %704 = vector.broadcast %703 : vector<8x1xf32> to vector<8x8xf32>
    %705 = arith.mulf %700, %704 : vector<8x8xf32>
    %cst_205 = arith.constant dense<0.000000e+00> : vector<8x8xf32>
    %706 = tpu.matmul %705, %692, %cst_205 {dimension_numbers = #tpu.dot_dimension_numbers<[1], [0], [0], [1], [0, 0, 1, 1], [], []>} : vector<8x8xf32>, vector<8x8xf32>, vector<8x8xf32> -> vector<8x8xf32>
    %707 = vector.extract_strided_slice %682 {offsets = [0, 8], sizes = [8, 8], strides = [1, 1]} : vector<8x32xf32> to vector<8x8xf32>
    %708 = vector.extract_strided_slice %688 {offsets = [0, 8], sizes = [8, 8], strides = [1, 1]} : vector<8x32xf32> to vector<8x8xf32>
    %709 = vector.extract_strided_slice %689 {offsets = [0, 8], sizes = [8, 8], strides = [1, 1]} : vector<8x32xf32> to vector<8x8xf32>
    %cst_206 = arith.constant dense<0.000000e+00> : vector<8x8xf32>
    %710 = tpu.matmul %707, %708, %cst_206 {dimension_numbers = #tpu.dot_dimension_numbers<[1], [1], [0], [0], [0, 0, 1, 0], [], []>} : vector<8x8xf32>, vector<8x8xf32>, vector<8x8xf32> -> vector<8x8xf32>
    %711 = vector.broadcast %5 : vector<1x8xf32> to vector<8x8xf32>
    %712 = arith.addf %710, %711 : vector<8x8xf32>
    %cst_207 = arith.constant dense<0xFF800000> : vector<8xf32>
    %713 = vector.multi_reduction <maximumf>, %712, %cst_207 [1] : vector<8x8xf32> to vector<8xf32>
    %714 = vector.shape_cast %713 : vector<8xf32> to vector<8x1xf32>
    %715 = vector.broadcast %714 : vector<8x1xf32> to vector<8x8xf32>
    %716 = arith.subf %712, %715 : vector<8x8xf32>
    %717 = math.exp %716 : vector<8x8xf32>
    %cst_208 = arith.constant dense<0.000000e+00> : vector<8xf32>
    %718 = vector.multi_reduction <add>, %717, %cst_208 [1] : vector<8x8xf32> to vector<8xf32>
    %719 = vector.shape_cast %718 : vector<8xf32> to vector<8x1xf32>
    %720 = tpu.reciprocal %719 {approx = true} : vector<8x1xf32> -> vector<8x1xf32>
    %721 = vector.broadcast %720 : vector<8x1xf32> to vector<8x8xf32>
    %722 = arith.mulf %717, %721 : vector<8x8xf32>
    %cst_209 = arith.constant dense<0.000000e+00> : vector<8x8xf32>
    %723 = tpu.matmul %722, %709, %cst_209 {dimension_numbers = #tpu.dot_dimension_numbers<[1], [0], [0], [1], [0, 0, 1, 1], [], []>} : vector<8x8xf32>, vector<8x8xf32>, vector<8x8xf32> -> vector<8x8xf32>
    %724 = vector.extract_strided_slice %682 {offsets = [0, 16], sizes = [8, 8], strides = [1, 1]} : vector<8x32xf32> to vector<8x8xf32>
    %725 = vector.extract_strided_slice %688 {offsets = [0, 16], sizes = [8, 8], strides = [1, 1]} : vector<8x32xf32> to vector<8x8xf32>
    %726 = vector.extract_strided_slice %689 {offsets = [0, 16], sizes = [8, 8], strides = [1, 1]} : vector<8x32xf32> to vector<8x8xf32>
    %cst_210 = arith.constant dense<0.000000e+00> : vector<8x8xf32>
    %727 = tpu.matmul %724, %725, %cst_210 {dimension_numbers = #tpu.dot_dimension_numbers<[1], [1], [0], [0], [0, 0, 1, 0], [], []>} : vector<8x8xf32>, vector<8x8xf32>, vector<8x8xf32> -> vector<8x8xf32>
    %728 = vector.broadcast %5 : vector<1x8xf32> to vector<8x8xf32>
    %729 = arith.addf %727, %728 : vector<8x8xf32>
    %cst_211 = arith.constant dense<0xFF800000> : vector<8xf32>
    %730 = vector.multi_reduction <maximumf>, %729, %cst_211 [1] : vector<8x8xf32> to vector<8xf32>
    %731 = vector.shape_cast %730 : vector<8xf32> to vector<8x1xf32>
    %732 = vector.broadcast %731 : vector<8x1xf32> to vector<8x8xf32>
    %733 = arith.subf %729, %732 : vector<8x8xf32>
    %734 = math.exp %733 : vector<8x8xf32>
    %cst_212 = arith.constant dense<0.000000e+00> : vector<8xf32>
    %735 = vector.multi_reduction <add>, %734, %cst_212 [1] : vector<8x8xf32> to vector<8xf32>
    %736 = vector.shape_cast %735 : vector<8xf32> to vector<8x1xf32>
    %737 = tpu.reciprocal %736 {approx = true} : vector<8x1xf32> -> vector<8x1xf32>
    %738 = vector.broadcast %737 : vector<8x1xf32> to vector<8x8xf32>
    %739 = arith.mulf %734, %738 : vector<8x8xf32>
    %cst_213 = arith.constant dense<0.000000e+00> : vector<8x8xf32>
    %740 = tpu.matmul %739, %726, %cst_213 {dimension_numbers = #tpu.dot_dimension_numbers<[1], [0], [0], [1], [0, 0, 1, 1], [], []>} : vector<8x8xf32>, vector<8x8xf32>, vector<8x8xf32> -> vector<8x8xf32>
    %741 = vector.extract_strided_slice %682 {offsets = [0, 24], sizes = [8, 8], strides = [1, 1]} : vector<8x32xf32> to vector<8x8xf32>
    %742 = vector.extract_strided_slice %688 {offsets = [0, 24], sizes = [8, 8], strides = [1, 1]} : vector<8x32xf32> to vector<8x8xf32>
    %743 = vector.extract_strided_slice %689 {offsets = [0, 24], sizes = [8, 8], strides = [1, 1]} : vector<8x32xf32> to vector<8x8xf32>
    %cst_214 = arith.constant dense<0.000000e+00> : vector<8x8xf32>
    %744 = tpu.matmul %741, %742, %cst_214 {dimension_numbers = #tpu.dot_dimension_numbers<[1], [1], [0], [0], [0, 0, 1, 0], [], []>} : vector<8x8xf32>, vector<8x8xf32>, vector<8x8xf32> -> vector<8x8xf32>
    %745 = vector.broadcast %5 : vector<1x8xf32> to vector<8x8xf32>
    %746 = arith.addf %744, %745 : vector<8x8xf32>
    %cst_215 = arith.constant dense<0xFF800000> : vector<8xf32>
    %747 = vector.multi_reduction <maximumf>, %746, %cst_215 [1] : vector<8x8xf32> to vector<8xf32>
    %748 = vector.shape_cast %747 : vector<8xf32> to vector<8x1xf32>
    %749 = vector.broadcast %748 : vector<8x1xf32> to vector<8x8xf32>
    %750 = arith.subf %746, %749 : vector<8x8xf32>
    %751 = math.exp %750 : vector<8x8xf32>
    %cst_216 = arith.constant dense<0.000000e+00> : vector<8xf32>
    %752 = vector.multi_reduction <add>, %751, %cst_216 [1] : vector<8x8xf32> to vector<8xf32>
    %753 = vector.shape_cast %752 : vector<8xf32> to vector<8x1xf32>
    %754 = tpu.reciprocal %753 {approx = true} : vector<8x1xf32> -> vector<8x1xf32>
    %755 = vector.broadcast %754 : vector<8x1xf32> to vector<8x8xf32>
    %756 = arith.mulf %751, %755 : vector<8x8xf32>
    %cst_217 = arith.constant dense<0.000000e+00> : vector<8x8xf32>
    %757 = tpu.matmul %756, %743, %cst_217 {dimension_numbers = #tpu.dot_dimension_numbers<[1], [0], [0], [1], [0, 0, 1, 1], [], []>} : vector<8x8xf32>, vector<8x8xf32>, vector<8x8xf32> -> vector<8x8xf32>
    %758 = tpu.concatenate %706, %723, %740, %757 in 1 : vector<8x8xf32>, vector<8x8xf32>, vector<8x8xf32>, vector<8x8xf32> -> vector<8x32xf32>
    %c888 = arith.constant 888 : index
    %c0_218 = arith.constant 0 : index
    %759 = vector.load %arg4[%c888, %c0_218] : memref<1088x128xf32, #tpu.memory_space<vmem>>, vector<32x32xf32>
    %c920 = arith.constant 920 : index
    %c0_219 = arith.constant 0 : index
    %760 = vector.load %arg4[%c920, %c0_219] : memref<1088x128xf32, #tpu.memory_space<vmem>>, vector<1x32xf32>
    %cst_220 = arith.constant dense<0.000000e+00> : vector<8x32xf32>
    %761 = tpu.matmul %758, %759, %cst_220 {dimension_numbers = #tpu.dot_dimension_numbers<[1], [0], [0], [1], [0, 0, 1, 1], [], []>} : vector<8x32xf32>, vector<32x32xf32>, vector<8x32xf32> -> vector<8x32xf32>
    %762 = vector.broadcast %760 : vector<1x32xf32> to vector<8x32xf32>
    %763 = arith.addf %761, %762 : vector<8x32xf32>
    %764 = arith.addf %675, %763 : vector<8x32xf32>
    %cst_221 = arith.constant dense<0.000000e+00> : vector<8xf32>
    %765 = vector.multi_reduction <add>, %764, %cst_221 [1] : vector<8x32xf32> to vector<8xf32>
    %766 = vector.shape_cast %765 : vector<8xf32> to vector<8x1xf32>
    %cst_222 = arith.constant 3.200000e+01 : f32
    %767 = vector.broadcast %cst_222 : f32 to vector<8x1xf32>
    %768 = arith.divf %766, %767 : vector<8x1xf32>
    %769 = vector.broadcast %768 : vector<8x1xf32> to vector<8x32xf32>
    %770 = arith.subf %764, %769 : vector<8x32xf32>
    %771 = vector.broadcast %768 : vector<8x1xf32> to vector<8x32xf32>
    %772 = arith.subf %764, %771 : vector<8x32xf32>
    %773 = arith.mulf %770, %772 : vector<8x32xf32>
    %cst_223 = arith.constant dense<0.000000e+00> : vector<8xf32>
    %774 = vector.multi_reduction <add>, %773, %cst_223 [1] : vector<8x32xf32> to vector<8xf32>
    %775 = vector.shape_cast %774 : vector<8xf32> to vector<8x1xf32>
    %cst_224 = arith.constant 3.200000e+01 : f32
    %776 = vector.broadcast %cst_224 : f32 to vector<8x1xf32>
    %777 = arith.divf %775, %776 : vector<8x1xf32>
    %778 = vector.broadcast %768 : vector<8x1xf32> to vector<8x32xf32>
    %779 = arith.subf %764, %778 : vector<8x32xf32>
    %cst_225 = arith.constant 9.99999997E-7 : f32
    %780 = vector.broadcast %cst_225 : f32 to vector<8x1xf32>
    %781 = arith.addf %777, %780 : vector<8x1xf32>
    %782 = math.rsqrt %781 : vector<8x1xf32>
    %783 = vector.broadcast %782 : vector<8x1xf32> to vector<8x32xf32>
    %784 = arith.mulf %779, %783 : vector<8x32xf32>
    %c1056 = arith.constant 1056 : index
    %c0_226 = arith.constant 0 : index
    %785 = vector.load %arg4[%c1056, %c0_226] : memref<1088x128xf32, #tpu.memory_space<vmem>>, vector<1x32xf32>
    %786 = vector.broadcast %785 : vector<1x32xf32> to vector<8x32xf32>
    %787 = arith.mulf %784, %786 : vector<8x32xf32>
    %c1064 = arith.constant 1064 : index
    %c0_227 = arith.constant 0 : index
    %788 = vector.load %arg4[%c1064, %c0_227] : memref<1088x128xf32, #tpu.memory_space<vmem>>, vector<1x32xf32>
    %789 = vector.broadcast %788 : vector<1x32xf32> to vector<8x32xf32>
    %790 = arith.addf %787, %789 : vector<8x32xf32>
    %c928 = arith.constant 928 : index
    %c0_228 = arith.constant 0 : index
    %791 = vector.load %arg4[%c928, %c0_228] : memref<1088x128xf32, #tpu.memory_space<vmem>>, vector<32x64xf32>
    %cst_229 = arith.constant dense<0.000000e+00> : vector<8x64xf32>
    %792 = tpu.matmul %790, %791, %cst_229 {dimension_numbers = #tpu.dot_dimension_numbers<[1], [0], [0], [1], [0, 0, 1, 1], [], []>} : vector<8x32xf32>, vector<32x64xf32>, vector<8x64xf32> -> vector<8x64xf32>
    %c960 = arith.constant 960 : index
    %c0_230 = arith.constant 0 : index
    %793 = vector.load %arg4[%c960, %c0_230] : memref<1088x128xf32, #tpu.memory_space<vmem>>, vector<1x64xf32>
    %794 = vector.broadcast %793 : vector<1x64xf32> to vector<8x64xf32>
    %795 = arith.addf %792, %794 : vector<8x64xf32>
    %cst_231 = arith.constant 0.000000e+00 : f32
    %796 = vector.broadcast %cst_231 : f32 to vector<8x64xf32>
    %797 = arith.maximumf %795, %796 : vector<8x64xf32>
    %c968 = arith.constant 968 : index
    %c0_232 = arith.constant 0 : index
    %798 = vector.load %arg4[%c968, %c0_232] : memref<1088x128xf32, #tpu.memory_space<vmem>>, vector<64x32xf32>
    %cst_233 = arith.constant dense<0.000000e+00> : vector<8x32xf32>
    %799 = tpu.matmul %797, %798, %cst_233 {dimension_numbers = #tpu.dot_dimension_numbers<[1], [0], [0], [1], [0, 0, 1, 1], [], []>} : vector<8x64xf32>, vector<64x32xf32>, vector<8x32xf32> -> vector<8x32xf32>
    %c1032 = arith.constant 1032 : index
    %c0_234 = arith.constant 0 : index
    %800 = vector.load %arg4[%c1032, %c0_234] : memref<1088x128xf32, #tpu.memory_space<vmem>>, vector<1x32xf32>
    %801 = vector.broadcast %800 : vector<1x32xf32> to vector<8x32xf32>
    %802 = arith.addf %799, %801 : vector<8x32xf32>
    %803 = arith.addf %790, %802 : vector<8x32xf32>
    %cst_235 = arith.constant dense<0.000000e+00> : vector<8xf32>
    %804 = vector.multi_reduction <add>, %803, %cst_235 [1] : vector<8x32xf32> to vector<8xf32>
    %805 = vector.shape_cast %804 : vector<8xf32> to vector<8x1xf32>
    %cst_236 = arith.constant 3.200000e+01 : f32
    %806 = vector.broadcast %cst_236 : f32 to vector<8x1xf32>
    %807 = arith.divf %805, %806 : vector<8x1xf32>
    %808 = vector.broadcast %807 : vector<8x1xf32> to vector<8x32xf32>
    %809 = arith.subf %803, %808 : vector<8x32xf32>
    %810 = vector.broadcast %807 : vector<8x1xf32> to vector<8x32xf32>
    %811 = arith.subf %803, %810 : vector<8x32xf32>
    %812 = arith.mulf %809, %811 : vector<8x32xf32>
    %cst_237 = arith.constant dense<0.000000e+00> : vector<8xf32>
    %813 = vector.multi_reduction <add>, %812, %cst_237 [1] : vector<8x32xf32> to vector<8xf32>
    %814 = vector.shape_cast %813 : vector<8xf32> to vector<8x1xf32>
    %cst_238 = arith.constant 3.200000e+01 : f32
    %815 = vector.broadcast %cst_238 : f32 to vector<8x1xf32>
    %816 = arith.divf %814, %815 : vector<8x1xf32>
    %817 = vector.broadcast %807 : vector<8x1xf32> to vector<8x32xf32>
    %818 = arith.subf %803, %817 : vector<8x32xf32>
    %cst_239 = arith.constant 9.99999997E-7 : f32
    %819 = vector.broadcast %cst_239 : f32 to vector<8x1xf32>
    %820 = arith.addf %816, %819 : vector<8x1xf32>
    %821 = math.rsqrt %820 : vector<8x1xf32>
    %822 = vector.broadcast %821 : vector<8x1xf32> to vector<8x32xf32>
    %823 = arith.mulf %818, %822 : vector<8x32xf32>
    %c1072 = arith.constant 1072 : index
    %c0_240 = arith.constant 0 : index
    %824 = vector.load %arg4[%c1072, %c0_240] : memref<1088x128xf32, #tpu.memory_space<vmem>>, vector<1x32xf32>
    %825 = vector.broadcast %824 : vector<1x32xf32> to vector<8x32xf32>
    %826 = arith.mulf %823, %825 : vector<8x32xf32>
    %c1080 = arith.constant 1080 : index
    %c0_241 = arith.constant 0 : index
    %827 = vector.load %arg4[%c1080, %c0_241] : memref<1088x128xf32, #tpu.memory_space<vmem>>, vector<1x32xf32>
    %828 = vector.broadcast %827 : vector<1x32xf32> to vector<8x32xf32>
    %829 = arith.addf %826, %828 : vector<8x32xf32>
    %c0_242 = arith.constant 0 : index
    %c0_243 = arith.constant 0 : index
    %c0_244 = arith.constant 0 : index
    %830 = vector.load %arg5[%c0_242, %c0_243, %c0_244] : memref<1x16x32xf32, #tpu.memory_space<vmem>>, vector<1x8x32xf32>
    %831 = vector.shape_cast %830 : vector<1x8x32xf32> to vector<8x32xf32>
    %832 = vector.shape_cast %566 : vector<8x32xf32> to vector<1x8x32xf32>
    tpu.vector_store %arg5[%c0_242, %c0_243, %c0_244], %832 {strides = array<i32>} : memref<1x16x32xf32, #tpu.memory_space<vmem>>, vector<1x8x32xf32>,
    %c0_245 = arith.constant 0 : index
    %c8_246 = arith.constant 8 : index
    %c0_247 = arith.constant 0 : index
    %833 = vector.load %arg5[%c0_245, %c8_246, %c0_247] : memref<1x16x32xf32, #tpu.memory_space<vmem>>, vector<1x8x32xf32>
    %834 = vector.shape_cast %833 : vector<1x8x32xf32> to vector<8x32xf32>
    %835 = vector.shape_cast %829 : vector<8x32xf32> to vector<1x8x32xf32>
    tpu.vector_store %arg5[%c0_245, %c8_246, %c0_247], %835 {strides = array<i32>} : memref<1x16x32xf32, #tpu.memory_space<vmem>>, vector<1x8x32xf32>,
    return
  }
  func.func @transform_0(%arg0: i32) -> (i32, i32, i32) {
    %c0_i32 = arith.constant 0 : i32
    %c0_i32_0 = arith.constant 0 : i32
    %c0_i32_1 = arith.constant 0 : i32
    return %arg0, %c0_i32, %c0_i32_0 : i32, i32, i32
  }
  func.func @transform_1(%arg0: i32) -> (i32, i32, i32) {
    %c0_i32 = arith.constant 0 : i32
    %c0_i32_0 = arith.constant 0 : i32
    %c0_i32_1 = arith.constant 0 : i32
    return %arg0, %c0_i32, %c0_i32_0 : i32, i32, i32
  }
  func.func @transform_2(%arg0: i32) -> (i32, i32, i32) {
    %c0_i32 = arith.constant 0 : i32
    %c0_i32_0 = arith.constant 0 : i32
    %c0_i32_1 = arith.constant 0 : i32
    return %arg0, %c0_i32, %c0_i32_0 : i32, i32, i32
  }
  func.func @transform_3(%arg0: i32) -> (i32, i32) {
    %c0_i32 = arith.constant 0 : i32
    %c0_i32_0 = arith.constant 0 : i32
    %c0_i32_1 = arith.constant 0 : i32
    return %c0_i32, %c0_i32_0 : i32, i32
  }
  func.func @transform_4(%arg0: i32) -> (i32, i32, i32) {
    %c0_i32 = arith.constant 0 : i32
    %c0_i32_0 = arith.constant 0 : i32
    %c0_i32_1 = arith.constant 0 : i32
    return %arg0, %c0_i32, %c0_i32_0 : i32, i32, i32
  }
}

</mosaic_0001>

<bundles_post_ra>
// kernel: tpu_custom_call.1
= control target key start
LH: loop header
LB: loop body
LE: loop exit
PB: predicated region body
PF: predicated region fallthrough
CT: control target
= control target key end

     0   :  { %9 = vsyncpa [#allocation3], 0  ;;  %s8875_s0 = inlined_call_operand.hbm [shape: f32[2,16,32], index: 0, kind: input, shape index: {}]   ;;  %s8876_s1 = inlined_call_operand.vmem [shape: f32[2,1,8], index: 1, kind: input, shape index: {}]   ;;  %s8877_s2 = inlined_call_operand.vmem [shape: f32[2,1,8], index: 2, kind: input, shape index: {}]   ;;  %s8878_s3 = inlined_call_operand.hbm [shape: f32[1088,128], index: 3, kind: input, shape index: {}]   ;;  %s8879_s4 = inlined_call_operand.hbm [shape: f32[2,16,32], index: 4, kind: output, shape index: {}]  }
   0x1   :  { %11 = vsyncpa [#allocation3 + $0x1], 0 }
   0x2   :  { %12 = vsyncpa [#allocation6], 0 }
   0x3   :  { %13 = vsyncpa [#allocation4], 0 }
   0x4   :  { %15 = vsyncpa [#allocation4 + $0x1], 0  ;;  %s7982_s15 = smov 0   ;;  %s7984_s16 = smov 0  }
   0x5   :  { %s7986_s17 = smov 0   ;;  %s7988_s18 = smov 0  }
   0x6 LB: > { %s8003_s19 = sadd.s32 4294967295, %s7932_s18   ;;  %s6543_s20 = sadd.s32 4294967294, %s7932_s18   ;;  %s7932_s18 = sphi %s7988_s18, %s8910_s18   ;;  %s7928_s17 = sphi %s7986_s17, %s8909_s17   ;;  %s7924_s16 = sphi %s7984_s16, %s8908_s16   ;;  %s7920_s15 = sphi %s7982_s15, %s8907_s15  }
   0x7   : > { %p41_p0 = scmp.ne.s32.totalorder %s7924_s16, %s7920_s15  ;;  %p8880_p1 = scmp.eq.s32.totalorder %s8003_s19, 0 }
   0x8   : > { %p144_p3 = scmp.eq.s32.totalorder %s6543_s20, 1  ;;  %p6544_p5 = scmp.ge.s32.totalorder %s7932_s18, 1 }
   0x9   : > { %p8012_p4 = por %p8880_p1, %p41_p0  ;;  %p151_p7 = scmp.lt.s32.totalorder %s7932_s18, 3 }
   0xa   : > { %p8017_p6 = por %p144_p3, %p41_p0  ;;  %s7934_s24 = smov [#allocation5]  }
   0xb   : > { %s8890_s21 = scalar_select %p8012_p4, 1, 0 }
   0xc   : > { %s8891_s22 = scalar_select %p8017_p6, 1, 0 }
   0xd   : > { %p8022_p8 = pnand %p6544_p5, %p151_p7  ;;  %s163_s25 = sshll.u32 %s7934_s24, 4  ;;  %s8026_s25 = int_to_ptr.vmem [resolvable:$true] %s163_s25 }
   0xe   : > { %s8038_s27 = sadd.s32 1, %s7932_s18   ;;  %s28_s28 = sadd.s32 1, %s7928_s17 }
   0xf   : > { %s8892_s23 = scalar_select %p8022_p8, 1, 0 }
  0x10   : > { %p7597_p9 = pneg %p8022_p8  ;;  %s25_s29 = ssub.s32 %s7932_s18, %s8038_s27 }
  0x11   : > { %s7804_s6 = scalar_lea.hbm %s8878_s3, 17408 }
  0x12   : > { %p8033_p11 = pnand %p7597_p9, %p8880_p1  ;;  %p7805_p12 = scmp.ne.s32.totalorder %s8878_s3, %s7804_s6 }
  0x13   : > { %p7811_p5 = scmp.lt.u32.totalorder %s7804_s6, %s8878_s3 }
  0x14   : > { %p7806_p13 = pneg %p8033_p11 }
  0x16   : > { %p7807_p0 = pnand %p7806_p13, %p7805_p12 }
  0x18   : > { %p7808_p3 = pneg %p7807_p0 }
  0x1a   : > { %p7813_p7 = pnand %p7811_p5, %p7808_p3 }
  0x1c   : > { %7816 = shalt.err (!%p7813_p7)
}
  0x1d   : > { %s7817_s11 = scalar_lea.vmem %s8026_s25, 17408  ;;  %p7825_p2 = scmp.lt.s32.totalorder %s8026_s25, %s8026_s25 }
  0x1e   : > { %p7818_p9 = scmp.ne.s32.totalorder %s8026_s25, %s7817_s11  ;;  %p7826_p6 = scmp.lt.s32.totalorder %s7817_s11, %s7817_s11 }
  0x20   : > { %p7820_p10 = pnand %p7818_p9, %p7806_p13  ;;  %p7827_p4 = por %p7826_p6, %p7825_p2 }
  0x22   : > { %p7821_p1 = pneg %p7820_p10 }
  0x24   : > { %p7828_p8 = pnand %p7827_p4, %p7821_p1 }
  0x26   : > { %7831 = shalt.err (!%p7828_p8)
}
  0x27   : > { %s7935_s12 = smov 128   ;;  %s7936_s13 = smov 8  }
  0x28   : > { %7600 = dma.hbm_to_vmem [thread:$0]  (!%p8033_p11), %s8878_s3, 17408, %s8026_s25, [#allocation6], %s7935_s12, %s7935_s12, %s7936_s13  }
  0x29   : > { %p26_p1 = scmp.eq.s32.totalorder %s25_s29, 0  ;;  %p35_p2 = scmp.ne.s32.totalorder %s7928_s17, %s7924_s16 }
  0x2a   : > { %p36_p4 = scmp.eq.s32.totalorder %s7932_s18, 0  ;;  %p7610_p6 = scmp.lt.s32.totalorder %s7932_s18, 2 }
  0x2b   : > { %s8072_s24 = scalar_select %p26_p1, %s7928_s17, %s28_s28  }
  0x2c   : > { %p37_p8 = por %p36_p4, %p35_p2  ;;  %p8894_p10 = scmp.eq.s32.totalorder %s8003_s19, 1 }
  0x2d   : > { %s177_s26 = sand.u32 1, %s7928_s17   ;;  %s6695_s5 = sshll.u32 %s7932_s18, 8 }
  0x2e   : > { %p8076_p12 = por %p8894_p10, %p35_p2  ;;  %s6547_s6 = sshll.u32 %s177_s26, 4 }
  0x2f   : > { %s8085_s9 = scalar_lea.hbm %s8875_s0, %s6695_s5  ;;  %s181_s25 = scalar_lea.vmem [#allocation2], %s6547_s6 }
  0x30   : > { %s188_s28 = sshll.u32 %s181_s25, 4  ;;  %p8087_p11 = pnand %p7610_p6, %p37_p8  ;;  %s8091_s28 = int_to_ptr.vmem [resolvable:$true] %s188_s28 }
  0x31   : > { %s8093_s10 = scalar_lea.sflag [#allocation3], %s177_s26  ;;  %s7832_s11 = scalar_lea.hbm %s8085_s9, 256 }
  0x32   : > { %p7833_p13 = scmp.ne.s32.totalorder %s8085_s9, %s7832_s11  ;;  %p7834_p0 = pneg %p8087_p11 }
  0x33   : > { %s7837_s5 = scalar_lea.hbm %s8875_s0, 512  ;;  %p7838_p7 = scmp.lt.u32.totalorder %s8085_s9, %s8875_s0 }
  0x34   : > { %p7835_p3 = pnand %p7834_p0, %p7833_p13  ;;  %p7839_p9 = scmp.lt.u32.totalorder %s7837_s5, %s7832_s11 }
  0x35   : > { %p7841_p2 = scmp.lt.u32.totalorder %s7832_s11, %s8085_s9 }
  0x36   : > { %p7836_p5 = pneg %p7835_p3  ;;  %p7840_p1 = por %p7839_p9, %p7838_p7 }
  0x38   : > { %p7842_p4 = por %p7841_p2, %p7840_p1 }
  0x3a   : > { %p7843_p6 = pnand %p7842_p4, %p7836_p5 }
  0x3c   : > { %7846 = shalt.err (!%p7843_p6)
}
  0x3d   : > { %s7847_s26 = scalar_lea.vmem %s8091_s28, 256  ;;  %s7937_s8 = smov [#allocation2]  }
  0x3e   : > { %p7848_p8 = scmp.ne.s32.totalorder %s8091_s28, %s7847_s26  ;;  %s7852_s25 = sshll.u32 %s7937_s8, 4  ;;  %s7853_s25 = int_to_ptr.vmem [resolvable:$false] %s7852_s25 }
  0x3f   : > { %s7854_s14 = scalar_lea.vmem %s7853_s25, 512  ;;  %p7855_p3 = scmp.lt.s32.totalorder %s8091_s28, %s7853_s25 }
  0x40   : > { %p7850_p10 = pnand %p7848_p8, %p7834_p0  ;;  %p7856_p7 = scmp.lt.s32.totalorder %s7854_s14, %s7847_s26 }
  0x42   : > { %p7851_p13 = pneg %p7850_p10  ;;  %p7857_p9 = por %p7856_p7, %p7855_p3 }
  0x44   : > { %p7858_p1 = pnand %p7857_p9, %p7851_p13 }
  0x46   : > { %7861 = shalt.err (!%p7858_p1)
}
  0x47   : > { %7604 = dma.hbm_to_vmem [thread:$0]  (!%p8087_p11), %s8085_s9, 256, %s8091_s28, %s8093_s10, %s7935_s12, %s7935_s12, %s7936_s13  }
  0x48   : > { %p8897_p0 = scmp.ne.s32.totalorder %s8892_s23, 0 }
  0x49   : > { %s8127_s11 = sand.u32 (!%p8897_p0), 1, %s7924_s16   ;;  %p8898_p5 = scmp.ne.s32.totalorder (!%p8897_p0), %s8890_s21, 0 }
  0x4a   : > { %212 = sbr.rel (%p8897_p0) target bundleno = 11419 (0x2c9b), region = 36  ;;  %s8883_s20 = sshll.u32 (!%p8897_p0), %s8127_s11, 4 }
  0x4b   : > { %s215_s5 = scalar_lea.sflag (!%p8897_p0), [#allocation3], %s8127_s11  ;;  %s8133_s29 = scalar_lea.vmem (!%p8897_p0), [#allocation2], %s8883_s20 }
  0x51   : > { %7907 = dma.done.wait (%p8898_p5), %s215_s5, 256  }
  0x52   : > { %7909 = vsyncadd (%p8898_p5), %s215_s5, 4294967040  ;;  %p8899_p11 = scmp.eq.s32.totalorder %s8003_s19, 0 }
  0x54   : > { %7911 = dma.done.wait (%p8899_p11), [#allocation6], 17408   ;;  %p8900_p2 = pmov %p8899_p11 }
  0x55   : > { %v7938_v0 = vmov 0.0|0.0   ;;  %vm7939_vm0 = vmmov 0   ;;  %v7940_v1 = vmov 0.0   ;;  %v263_v2 = vld [vmem:[#allocation5] sm:$0xff]  ;;  %v264_v3 = vld [vmem:[#allocation5 + $0x8] sm:$0xff]  ;;  %v265_v4 = vld [vmem:[#allocation5 + $0x10] sm:$0xff] }
  0x56   : > { %7913 = vsyncadd (%p8900_p2), [#allocation6], 4294949888  ;;  %7433 = vmatprep.subr.bf16.mxu1 %v7938_v0  ;;  %6927 = vmatprep.mubr.msk.f32.mxu1 %vm7939_vm0, %v7940_v1  ;;  %v7434_v5 = vpack.c.bf16 %v264_v3, %v263_v2  ;;  %v266_v6 = vld [vmem:[#allocation5 + $0x18] sm:$0xff]  ;;  %v8151_v8 = vld [vmem:[%s8133_s29] sm:$0xff]  ;;  %vm272_vm1 = vcmask 261120   ;;  %s7941_s21 = smov 120  }
  0x57   : > { %6940 = vmatprep.subr.mxu0 %v7940_v1  ;;  %6942 = vmatprep.mubr.msk.f32.mxu0 %vm7939_vm0, %v7940_v1  ;;  %v7437_v7 = vpack.c.bf16 %v266_v6, %v265_v4  ;;  %v6554_v9 = vld [vmem:[#allocation5 + $0x20] ss:$0 sm:$0xff]  ;;  %s7942_s23 = smov 96   ;;  %s8888_s12 = smov 80   ;;  %vm355_vm2 = vcmask 64512   ;;  %vm1025_vm3 = vcmask 130048  }
  0x58   : > { %7435 = vmatpush3.bf16.msra.mxu1 %v7434_v5  ;;  %s7944_s13 = smov 88   ;;  %s8886_s9 = smov 72   ;;  %vm1027_vm4 = vcmask 195584   ;;  %vm1234_vm5 = vcmask 523264  }
  0x59   : > { %7436 = vmatprep.subr.bf16.mxu1 %v7938_v0  ;;  %s7946_s28 = smov 112   ;;  %s7947_s10 = smov 104  }
  0x5a   : > { %p253_p4 = scmp.lt.s32.totalorder %s8003_s19, 1  ;;  %s7948_s25 = smov 56  }
  0x5b   : > { %s7949_s14 = smov 64   ;;  %s7950_s5 = smov 48  }
  0x5c   : > { %7438 = vmatpush3.bf16.msra.mxu1 %v7437_v7  ;;  %s8197_s6 = scalar_select %p253_p4, %s8003_s19, 1 }
  0x5d   : > { %6930 = vmatprep.subr.mxu1 %v7940_v1  ;;  %s8884_s7 = smov 40   ;;  %s7952_s26 = smov 8  }
  0x5e   : > { %s8203_s8 = scalar_lea.vmem %s8876_s1, %s8197_s6  ;;  %s7953_s20 = smov 16  }
  0x5f   : > { %6928 = vmatmul.mubr.msk.f32.vlgmr.msra.gmra.mrb[0].mxu1 %vm272_vm1, %v8151_v8  ;;  %v8206_v20 = vld [vmem:[%s8203_s8] ss:$0 sm:$0xff] }
  0x60   : > { %6932 = vmatprep.mubr.msk.f32.mxu1 %vm7939_vm0, %v7940_v1 }
 0x132   : > { %v342_v10 = vpop.f32.mrb[0].mxu1 }
 0x133   : > { %v8158_v11 = vadd.f32 %v6554_v9, %v342_v10  ;;  %v6929_v12 = vpop.f32.mrb[1].mxu1 }
 0x134   : > { %v1029_v12 = vld [vmem:[#allocation5 + $0x28] sm:$0xff] }
 0x135   : > { %517 = vrot.lane.b32.xlu1 %v8158_v11, %s7941_s21  ;;  %353 = vrot.lane.b32.xlu0 %v8158_v11, %s7942_s23 }
 0x139   : > { %684 = vrot.lane.b32.xlu1 %v8158_v11, %s8888_s12  ;;  %519 = vrot.lane.b32.xlu0 %v8158_v11, %s7944_s13 }
 0x13d   : > { %849 = vrot.lane.b32.xlu1 %v8158_v11, %s8886_s9  ;;  %682 = vrot.lane.b32.xlu0 %v8158_v11, %s7946_s28 }
 0x141   : > { %847 = vrot.lane.b32.xlu0 %v8158_v11, %s7947_s10 }
 0x1a7   : > { %v518_v13 = vpop.permute.xlu1 %517  ;;  %v354_v14 = vpop.permute.xlu0 %353 }
 0x1a8   : > { %6931 = vmatpush3.xpose.msk.msra.mxu1 %vm355_vm2, %v354_v14 }
 0x1a9   : > { %6935 = vmatprep.subr.mxu1 %v7940_v1 }
 0x1ab   : > { %6933 = vmatmul.mubr.msk.f32.vlgmr.msra.gmra.mrb[2].mxu1 %vm355_vm2, %v8158_v11  ;;  %v520_v15 = vpop.permute.xlu0 %519  ;;  %v685_v16 = vpop.permute.xlu1 %684 }
 0x1ac   : > { %6941 = vmatpush3.xpose.msk.msra.mxu0 %vm355_vm2, %v520_v15  ;;  %6937 = vmatprep.mubr.msk.f32.mxu1 %vm7939_vm0, %v7940_v1 }
 0x1ad   : > { %6950 = vmatprep.subr.mxu0 %v7940_v1 }
 0x1af   : > { %6943 = vmatmul.mubr.msk.f32.vlgmr.msra.gmra.mrb[0].mxu0 %vm355_vm2, %v518_v13  ;;  %v683_v17 = vpop.permute.xlu0 %682  ;;  %v850_v18 = vpop.permute.xlu1 %849  ;;  %v1030_v13 = vld [vmem:[#allocation5 + $0x30] sm:$0xff] }
 0x1b0   : > { %6951 = vmatpush3.xpose.msk.msra.mxu0 %vm355_vm2, %v685_v16  ;;  %6952 = vmatprep.mubr.msk.f32.mxu0 %vm7939_vm0, %v7940_v1  ;;  %v7440_v14 = vpack.c.bf16 %v1030_v13, %v1029_v12  ;;  %v8271_v12 = vld [vmem:[%s8133_s29 + $0x8] sm:$0xff]  ;;  %s8903_s29 = smov 72  }
 0x1b1   : > { %6960 = vmatprep.subr.mxu0 %v7940_v1  ;;  %v1227_v13 = vld [vmem:[#allocation5 + $0xa8] sm:$0xff] }
 0x1b3   : > { %6953 = vmatmul.mubr.msk.f32.vlgmr.msra.gmra.mrb[2].mxu0 %vm355_vm2, %v683_v17  ;;  %v848_v19 = vpop.permute.xlu0 %847 }
 0x1b4   : > { %6961 = vmatpush3.xpose.msk.msra.mxu0 %vm355_vm2, %v850_v18  ;;  %6962 = vmatprep.mubr.msk.f32.mxu0 %vm7939_vm0, %v7940_v1 }
 0x1b5   : > { %7439 = vmatprep.subr.bf16.mxu0 %v7938_v0 }
 0x1b7   : > { %6963 = vmatmul.mubr.msk.f32.vlgmr.msra.gmra.mrb[4].mxu0 %vm355_vm2, %v848_v19  ;;  %v1031_v19 = vld [vmem:[#allocation5 + $0x38] sm:$0xff] }
 0x1b8   : > { %6978 = vmatprep.mubr.msk.f32.mxu0 %vm7939_vm0, %v7940_v1  ;;  %7441 = vmatpush3.bf16.msra.mxu0 %v7440_v14  ;;  %v1228_v14 = vld [vmem:[#allocation5 + $0xb0] sm:$0xff] }
 0x1b9   : > { %7442 = vmatprep.subr.bf16.mxu0 %v7938_v0 }
 0x27e   : > { %v426_v21 = vpop.f32.mrb[2].mxu1 }
 0x27f   : > { %v427_v22 = vadd.f32 %v8206_v20, %v426_v21  ;;  %v6934_v23 = vpop.f32.mrb[3].mxu1  ;;  %v1032_v21 = vld [vmem:[#allocation5 + $0x40] sm:$0xff] }
 0x281   : > { %v430_v24 = vsel %vm355_vm2, %v427_v22, -inf }
 0x282   : > { %v591_v25 = vpop.f32.mrb[0].mxu0  ;;  %431 = vmax.xlane.f32.xlu1 %v430_v24 }
 0x283   : > { %v592_v26 = vadd.f32 %v8206_v20, %v591_v25  ;;  %v6944_v27 = vpop.f32.mrb[1].mxu0 }
 0x285   : > { %v595_v28 = vsel %vm355_vm2, %v592_v26, -inf }
 0x286   : > { %596 = vmax.xlane.f32.xlu0 %v595_v28  ;;  %v756_v29 = vpop.f32.mrb[2].mxu0 }
 0x287   : > { %v757_v30 = vadd.f32 %v8206_v20, %v756_v29  ;;  %v6954_v31 = vpop.f32.mrb[3].mxu0 }
 0x289   : > { %v760_v32 = vsel %vm355_vm2, %v757_v30, -inf }
 0x28a   : > { %761 = vmax.xlane.f32.xlu0 %v760_v32  ;;  %v921_v33 = vpop.f32.mrb[4].mxu0 }
 0x28b   : > { %v922_v34 = vadd.f32 %v8206_v20, %v921_v33  ;;  %v6964_v35 = vpop.f32.mrb[5].mxu0  ;;  %v6569_v33 = vld [vmem:[#allocation5 + $0x48] ss:$0 sm:$0xff] }
 0x28d   : > { %v925_v36 = vsel %vm355_vm2, %v922_v34, -inf }
 0x28e   : > { %926 = vmax.xlane.f32.xlu1 %v925_v36 }
 0x29f   : > { %606 = vrot.lane.b32.xlu1 %v8158_v11, %s7948_s25 }
 0x30f   : > { %v432_v37 = vpop.xlane.xlu1 %431 }
 0x310   : > { %v433_v38 = vsub.f32 %v427_v22, %v432_v37  ;;  %v7443_v22 = vpack.c.bf16 %v1032_v21, %v1031_v19 }
 0x312   : > { %v434_v39 = vmul.f32 1.442695, %v433_v38  ;;  %7444 = vmatpush3.bf16.msra.mxu0 %v7443_v22  ;;  %v6579_v22 = vld [vmem:[#allocation5 + $0x1e0] ss:$0 sm:$0xff] }
 0x313   : > { %v597_v40 = vpop.xlane.xlu0 %596  ;;  %7451 = vmatprep.subr.bf16.mxu0 %v7938_v0 }
 0x314   : > { %7686 = vpow2.f32 %v434_v39  ;;  %v598_v41 = vsub.f32 %v592_v26, %v597_v40 }
 0x316   : > { %v599_v42 = vmul.f32 1.442695, %v598_v41 }
 0x317   : > { %v762_v52 = vpop.xlane.xlu0 %761 }
 0x318   : > { %7688 = vpow2.f32 %v599_v42  ;;  %v763_v53 = vsub.f32 %v757_v30, %v762_v52 }
 0x31a   : > { %v764_v54 = vmul.f32 1.442695, %v763_v53  ;;  %v1224_v53 = vld [vmem:[#allocation5 + $0x90] sm:$0xff] }
 0x31b   : > { %v927_v43 = vpop.xlane.xlu1 %926 }
 0x31c   : > { %v928_v44 = vsub.f32 %v922_v34, %v927_v43 }
 0x31e   : > { %v7687_v45 = vpop.eup %7686  ;;  %v929_v46 = vmul.f32 1.442695, %v928_v44  ;;  %v1138_v44 = vld [vmem:[#allocation5 + $0x50] sm:$0xff] }
 0x31f   : > { %v436_v47 = vsel %vm355_vm2, %v7687_v45, 0.0  ;;  %v607_v57 = vpop.permute.xlu1 %606 }
 0x320   : > { %7690 = vpow2.f32 %v929_v46  ;;  %437 = vadd.xlane.f32.xlu0 %v436_v47  ;;  %v1140_v47 = vld [vmem:[#allocation5 + $0x60] sm:$0xff] }
 0x321   : > { %7692 = vpow2.f32 %v764_v54 }
 0x322   : > { %v7689_v48 = vpop.eup %7688 }
 0x323   : > { %v601_v49 = vsel %vm355_vm2, %v7689_v48, 0.0 }
 0x324   : > { %602 = vadd.xlane.f32.xlu1 %v601_v49 }
 0x32a   : > { %v7691_v50 = vpop.eup %7690 }
 0x32b   : > { %v931_v51 = vsel %vm355_vm2, %v7691_v50, 0.0  ;;  %v7693_v55 = vpop.eup %7692 }
 0x32c   : > { %932 = vadd.xlane.f32.xlu1 %v931_v51  ;;  %v766_v56 = vsel %vm355_vm2, %v7693_v55, 0.0  ;;  %v1223_v51 = vld [vmem:[#allocation5 + $0x88] sm:$0xff] }
 0x32d   : > { %v7455_v54 = vpack.c.bf16 %v1224_v53, %v1223_v51 }
 0x336   : > { %441 = vrot.lane.b32.xlu0 %v8158_v11, %s7949_s14 }
 0x33d   : > { %771 = vrot.lane.b32.xlu1 %v8158_v11, %s7950_s5 }
 0x355   : > { %767 = vadd.xlane.f32.xlu0 %v766_v56  ;;  %v1226_v56 = vld [vmem:[#allocation5 + $0xa0] sm:$0xff] }
 0x36b   : > { %936 = vrot.lane.b32.xlu0 %v8158_v11, %s8884_s7  ;;  %s7954_s7 = smov 24  }
 0x3ad   : > { %v438_v58 = vpop.xlane.xlu0 %437 }
 0x3ae   : > { %7694 = vrcp.f32 %v438_v58 }
 0x3b1   : > { %v442_v59 = vpop.permute.xlu0 %441  ;;  %v603_v60 = vpop.xlane.xlu1 %602 }
 0x3b2   : > { %7696 = vrcp.f32 %v603_v60  ;;  %6936 = vmatpush3.msra.mxu1 %v442_v59 }
 0x3b3   : > { %6945 = vmatprep.subr.mxu1 %v7940_v1 }
 0x3b8   : > { %v7695_v61 = vpop.eup %7694 }
 0x3b9   : > { %v933_v62 = vpop.xlane.xlu1 %932  ;;  %v440_v63 = vmul.f32 %v7695_v61, %v7687_v45  ;;  %v1139_v45 = vld [vmem:[#allocation5 + $0x58] sm:$0xff] }
 0x3ba   : > { %v7446_v46 = vpack.c.bf16 %v1139_v45, %v1138_v44 }
 0x3bb   : > { %6938 = vmatmul.mubr.msk.f32.vlgmr.msra.gmra.mrb[4].mxu1 %vm355_vm2, %v440_v63 }
 0x3bc   : > { %v7697_v2 = vpop.eup %7696  ;;  %6946 = vmatpush3.msra.mxu1 %v607_v57  ;;  %6947 = vmatprep.mubr.msk.f32.mxu1 %vm7939_vm0, %v7940_v1 }
 0x3bd   : > { %v772_v3 = vpop.permute.xlu1 %771  ;;  %6955 = vmatprep.subr.mxu1 %v7940_v1  ;;  %v605_v4 = vmul.f32 %v7697_v2, %v7689_v48  ;;  %v1141_v48 = vld [vmem:[#allocation5 + $0x68] sm:$0xff]  ;;  %v1334_v2 = vld [vmem:[#allocation5 + $0x1c0] sm:$0xff] }
 0x3be   : > { %v7449_v49 = vpack.c.bf16 %v1141_v48, %v1140_v47 }
 0x3bf   : > { %6948 = vmatmul.mubr.msk.f32.vlgmr.msra.gmra.mrb[6].mxu1 %vm355_vm2, %v605_v4  ;;  %v6572_v4 = vld [vmem:[#allocation5 + $0xc8] ss:$0 sm:$0xff] }
 0x3c0   : > { %6956 = vmatpush3.msra.mxu1 %v772_v3  ;;  %6957 = vmatprep.mubr.msk.f32.mxu1 %vm7939_vm0, %v7940_v1  ;;  %v1335_v3 = vld [vmem:[#allocation5 + $0x1c8] sm:$0xff] }
 0x3c1   : > { %6965 = vmatprep.subr.mxu1 %v7940_v1 }
 0x3e2   : > { %v768_v5 = vpop.xlane.xlu0 %767 }
 0x3e3   : > { %7698 = vrcp.f32 %v768_v5 }
 0x3e4   : > { %7700 = vrcp.f32 %v933_v62  ;;  %v6571_v62 = vld [vmem:[#allocation5 + $0xc0] ss:$0 sm:$0xff] }
 0x3e6   : > { %v937_v10 = vpop.permute.xlu0 %936 }
 0x3ed   : > { %v7699_v6 = vpop.eup %7698 }
 0x3ee   : > { %v770_v7 = vmul.f32 %v7699_v6, %v7693_v55  ;;  %v7701_v9 = vpop.eup %7700  ;;  %v1225_v55 = vld [vmem:[#allocation5 + $0x98] sm:$0xff]  ;;  %v7464_v6 = vpack.c.bf16 %v1335_v3, %v1334_v2 }
 0x3ef   : > { %v935_v11 = vmul.f32 %v7701_v9, %v7691_v50  ;;  %v1222_v50 = vld [vmem:[#allocation5 + $0x80] sm:$0xff]  ;;  %v7458_v57 = vpack.c.bf16 %v1226_v56, %v1225_v55  ;;  %v1336_v9 = vld [vmem:[#allocation5 + $0x1d0] sm:$0xff] }
 0x3f0   : > { %6958 = vmatmul.mubr.msk.f32.vlgmr.msra.gmra.mrb[8].mxu1 %vm355_vm2, %v770_v7 }
 0x3f1   : > { %6966 = vmatpush3.msra.mxu1 %v937_v10  ;;  %6967 = vmatprep.mubr.msk.f32.mxu1 %vm7939_vm0, %v7940_v1  ;;  %v1337_v10 = vld [vmem:[#allocation5 + $0x1d8] sm:$0xff] }
 0x3f2   : > { %7445 = vmatprep.subr.bf16.mxu1 %v7938_v0 }
 0x3f4   : > { %6968 = vmatmul.mubr.msk.f32.vlgmr.msra.gmra.mrb[10].mxu1 %vm355_vm2, %v935_v11  ;;  %v7467_v11 = vpack.c.bf16 %v1337_v10, %v1336_v9 }
 0x3f5   : > { %6989 = vmatprep.mubr.msk.f32.mxu1 %vm7939_vm0, %v7940_v1  ;;  %7447 = vmatpush3.bf16.msra.mxu1 %v7446_v46 }
 0x3f6   : > { %7448 = vmatprep.subr.bf16.mxu1 %v7938_v0 }
 0x3f9   : > { %7450 = vmatpush3.bf16.msra.mxu1 %v7449_v49 }
 0x3fa   : > { %7463 = vmatprep.subr.bf16.mxu1 %v7938_v0 }
 0x48e   : > { %v513_v15 = vpop.f32.mrb[4].mxu1 }
 0x48f   : > { %v6939_v16 = vpop.f32.mrb[5].mxu1 }
 0x490   : > { %v6573_v16 = vld [vmem:[#allocation5 + $0x70] ss:$0 sm:$0xff] }
 0x492   : > { %v678_v17 = vpop.f32.mrb[6].mxu1 }
 0x493   : > { %1013 = vrot.lane.b32.xlu1 %v678_v17, %s7952_s26  ;;  %v6949_v18 = vpop.f32.mrb[7].mxu1 }
 0x4c3   : > { %v843_v23 = vpop.f32.mrb[8].mxu1 }
 0x4c4   : > { %1017 = vrot.lane.b32.xlu0 %v843_v23, %s7953_s20  ;;  %v6959_v24 = vpop.f32.mrb[9].mxu1 }
 0x4c7   : > { %v1008_v25 = vpop.f32.mrb[10].mxu1 }
 0x4c8   : > { %1021 = vrot.lane.b32.xlu1 %v1008_v25, %s7954_s7  ;;  %v6969_v26 = vpop.f32.mrb[11].mxu1 }
 0x505   : > { %v1014_v27 = vpop.permute.xlu1 %1013 }
 0x506   : > { %v1024_v29 = vsel %vm355_vm2, %v513_v15, %v1014_v27  ;;  %v7461_v15 = vpack.c.bf16 %v1228_v14, %v1227_v13 }
 0x536   : > { %v1018_v28 = vpop.permute.xlu0 %1017 }
 0x537   : > { %v1026_v30 = vsel %vm1025_vm3, %v1024_v29, %v1018_v28 }
 0x53a   : > { %v1022_v31 = vpop.permute.xlu1 %1021 }
 0x53b   : > { %v1028_v32 = vsel %vm1027_vm4, %v1026_v30, %v1022_v31 }
 0x53c   : > { %6979 = vmatmul.mubr.msk.f32.vlgmr.msra.gmra.mrb[6].mxu0 %vm272_vm1, %v1028_v32 }
 0x53d   : > { %7008 = vmatprep.mubr.msk.f32.mxu0 %vm7939_vm0, %v7940_v1 }
 0x60f   : > { %v1107_v34 = vpop.f32.mrb[6].mxu0 }
 0x610   : > { %v1108_v35 = vadd.f32 %v6569_v33, %v1107_v34  ;;  %v6980_v36 = vpop.f32.mrb[7].mxu0 }
 0x612   : > { %v1111_v37 = vadd.f32 %v1108_v35, %v8151_v8  ;;  %v1221_v8 = vld [vmem:[#allocation5 + $0x78] sm:$0xff] }
 0x613   : > { %v7452_v52 = vpack.c.bf16 %v1222_v50, %v1221_v8 }
 0x614   : > { %v1112_v38 = vsel %vm272_vm1, %v1111_v37, 0.0 }
 0x615   : > { %1113 = vadd.xlane.f32.xlu0 %v1112_v38  ;;  %7453 = vmatpush3.bf16.msra.mxu0 %v7452_v52 }
 0x616   : > { %7454 = vmatprep.subr.bf16.mxu0 %v7938_v0 }
 0x619   : > { %7456 = vmatpush3.bf16.msra.mxu0 %v7455_v54 }
 0x61a   : > { %7457 = vmatprep.subr.bf16.mxu0 %v7938_v0 }
 0x61d   : > { %7459 = vmatpush3.bf16.msra.mxu0 %v7458_v57 }
 0x61e   : > { %7460 = vmatprep.subr.bf16.mxu0 %v7938_v0 }
 0x621   : > { %7462 = vmatpush3.bf16.msra.mxu0 %v7461_v15 }
 0x622   : > { %7032 = vmatprep.subr.mxu0 %v7940_v1 }
 0x6a2   : > { %v1114_v39 = vpop.xlane.xlu0 %1113 }
 0x6a3   : > { %v1116_v40 = vmul.f32 0.03125, %v1114_v39 }
 0x6a5   : > { %v1117_v41 = vsub.f32 %v1111_v37, %v1116_v40 }
 0x6a7   : > { %v1118_v42 = vmul.f32 %v1117_v41, %v1117_v41 }
 0x6a9   : > { %v1119_v43 = vsel %vm272_vm1, %v1118_v42, 0.0 }
 0x6aa   : > { %1120 = vadd.xlane.f32.xlu1 %v1119_v43 }
 0x737   : > { %v1121_v58 = vpop.xlane.xlu1 %1120 }
 0x738   : > { %v1122_v59 = vmul.f32 0.03125, %v1121_v58 }
 0x73a   : > { %v1123_v60 = vadd.f32 1e-06, %v1122_v59 }
 0x73c   : > { %7702 = vrsqrt.f32 %v1123_v60 }
 0x746   : > { %v7703_v61 = vpop.eup %7702 }
 0x747   : > { %v1125_v63 = vmul.f32 %v7703_v61, %v1117_v41 }
 0x749   : > { %v1131_v5 = vmul.f32 %v6571_v62, %v1125_v63 }
 0x74b   : > { %v8263_v7 = vadd.f32 %v6572_v4, %v1131_v5 }
 0x74d   : > { %6990 = vmatmul.mubr.msk.f32.vlgmr.msra.gmra.mrb[12].mxu1 %vm272_vm1, %v8263_v7 }
 0x74e   : > { %7465 = vmatpush3.bf16.msra.mxu1 %v7464_v6  ;;  %7019 = vmatprep.mubr.msk.f32.mxu1 %vm7939_vm0, %v7940_v1 }
 0x74f   : > { %7466 = vmatprep.subr.bf16.mxu1 %v7938_v0 }
 0x752   : > { %7468 = vmatpush3.bf16.msra.mxu1 %v7467_v11 }
 0x753   : > { %7022 = vmatprep.subr.mxu1 %v7940_v1 }
 0x755   : > { %7020 = vmatmul.mubr.msk.f32.vlgmr.msra.gmra.mrb[14].mxu1 %vm272_vm1, %v8271_v12 }
 0x756   : > { %7024 = vmatprep.mubr.msk.f32.mxu1 %vm7939_vm0, %v7940_v1 }
 0x820   : > { %v1216_v17 = vpop.f32.mrb[12].mxu1 }
 0x821   : > { %v1217_v18 = vadd.f32 %v6573_v16, %v1216_v17  ;;  %v6991_v19 = vpop.f32.mrb[13].mxu1 }
 0x823   : > { %v1220_v21 = vmax.f32 %v1217_v18, 0.0 }
 0x825   : > { %7009 = vmatmul.mubr.msk.f32.vlgmr.msra.gmra.mrb[8].mxu0 %vm1234_vm5, %v1220_v21 }
 0x826   : > { %7034 = vmatprep.mubr.msk.f32.mxu0 %vm7939_vm0, %v7940_v1 }
 0x828   : > { %v1412_v23 = vpop.f32.mrb[14].mxu1 }
 0x829   : > { %v8282_v24 = vadd.f32 %v6579_v22, %v1412_v23  ;;  %v7021_v25 = vpop.f32.mrb[15].mxu1 }
 0x82b   : > { %1588 = vrot.lane.b32.xlu1 %v8282_v24, %s7944_s13  ;;  %1423 = vrot.lane.b32.xlu0 %v8282_v24, %s7942_s23 }
 0x82f   : > { %1753 = vrot.lane.b32.xlu1 %v8282_v24, %s8888_s12  ;;  %1586 = vrot.lane.b32.xlu0 %v8282_v24, %s7941_s21  ;;  %s8325_s12 = scalar_lea.vmem %s8877_s2, %s8197_s6  ;;  %s8902_s6 = smov 80  }
 0x830   : > { %v6581_v35 = vld [vmem:[%s8325_s12] ss:$0 sm:$0xff] }
 0x833   : > { %1918 = vrot.lane.b32.xlu1 %v8282_v24, %s8886_s9  ;;  %1751 = vrot.lane.b32.xlu0 %v8282_v24, %s7946_s28  ;;  %s8901_s9 = smov 40  }
 0x837   : > { %1916 = vrot.lane.b32.xlu0 %v8282_v24, %s7947_s10 }
 0x89d   : > { %v1589_v26 = vpop.permute.xlu1 %1588  ;;  %v1424_v27 = vpop.permute.xlu0 %1423 }
 0x89e   : > { %7023 = vmatpush3.xpose.msk.msra.mxu1 %vm355_vm2, %v1424_v27  ;;  %7033 = vmatpush3.xpose.msk.msra.mxu0 %vm355_vm2, %v1589_v26 }
 0x89f   : > { %7042 = vmatprep.subr.mxu0 %v7940_v1  ;;  %7027 = vmatprep.subr.mxu1 %v7940_v1 }
 0x8a1   : > { %v1754_v28 = vpop.permute.xlu1 %1753  ;;  %7025 = vmatmul.mubr.msk.f32.vlgmr.msra.gmra.mrb[16].mxu1 %vm355_vm2, %v8282_v24  ;;  %v1587_v29 = vpop.permute.xlu0 %1586 }
 0x8a2   : > { %7035 = vmatmul.mubr.msk.f32.vlgmr.msra.gmra.mrb[10].mxu0 %vm355_vm2, %v1587_v29  ;;  %7029 = vmatprep.mubr.msk.f32.mxu1 %vm7939_vm0, %v7940_v1  ;;  %v2096_v29 = vld [vmem:[#allocation5 + $0x1e8] sm:$0xff] }
 0x8a3   : > { %7043 = vmatpush3.xpose.msk.msra.mxu0 %vm355_vm2, %v1754_v28  ;;  %7044 = vmatprep.mubr.msk.f32.mxu0 %vm7939_vm0, %v7940_v1 }
 0x8a4   : > { %7052 = vmatprep.subr.mxu0 %v7940_v1 }
 0x8a5   : > { %v1919_v30 = vpop.permute.xlu1 %1918  ;;  %v1752_v31 = vpop.permute.xlu0 %1751 }
 0x8a6   : > { %7045 = vmatmul.mubr.msk.f32.vlgmr.msra.gmra.mrb[12].mxu0 %vm355_vm2, %v1752_v31 }
 0x8a7   : > { %7053 = vmatpush3.xpose.msk.msra.mxu0 %vm355_vm2, %v1919_v30  ;;  %7054 = vmatprep.mubr.msk.f32.mxu0 %vm7939_vm0, %v7940_v1  ;;  %v2097_v30 = vld [vmem:[#allocation5 + $0x1f0] sm:$0xff] }
 0x8a8   : > { %7469 = vmatprep.subr.bf16.mxu0 %v7938_v0  ;;  %v7470_v31 = vpack.c.bf16 %v2097_v30, %v2096_v29  ;;  %v6577_v29 = vld [vmem:[#allocation5 + $0xd0] ss:$0 sm:$0xff] }
 0x8a9   : > { %v1917_v32 = vpop.permute.xlu0 %1916 }
 0x8aa   : > { %7055 = vmatmul.mubr.msk.f32.vlgmr.msra.gmra.mrb[14].mxu0 %vm355_vm2, %v1917_v32 }
 0x8ab   : > { %7070 = vmatprep.mubr.msk.f32.mxu0 %vm7939_vm0, %v7940_v1  ;;  %7471 = vmatpush3.bf16.msra.mxu0 %v7470_v31 }
 0x8ac   : > { %7472 = vmatprep.subr.bf16.mxu0 %v7938_v0 }
 0x8f8   : > { %v8319_v33 = vpop.f32.mrb[8].mxu0 }
 0x8f9   : > { %v7010_v34 = vpop.f32.mrb[9].mxu0 }
 0x974   : > { %v1495_v36 = vpop.f32.mrb[16].mxu1 }
 0x975   : > { %v1496_v37 = vadd.f32 %v6581_v35, %v1495_v36  ;;  %v7026_v38 = vpop.f32.mrb[17].mxu1  ;;  %v1660_v39 = vpop.f32.mrb[10].mxu0 }
 0x976   : > { %v1661_v40 = vadd.f32 %v6581_v35, %v1660_v39  ;;  %v7036_v41 = vpop.f32.mrb[11].mxu0  ;;  %v2099_v38 = vld [vmem:[#allocation5 + $0x200] sm:$0xff] }
 0x977   : > { %v1499_v42 = vsel %vm355_vm2, %v1496_v37, -inf }
 0x978   : > { %1500 = vmax.xlane.f32.xlu1 %v1499_v42  ;;  %v1664_v43 = vsel %vm355_vm2, %v1661_v40, -inf }
 0x979   : > { %1665 = vmax.xlane.f32.xlu0 %v1664_v43  ;;  %v1825_v44 = vpop.f32.mrb[12].mxu0 }
 0x97a   : > { %v1826_v45 = vadd.f32 %v6581_v35, %v1825_v44  ;;  %v7046_v46 = vpop.f32.mrb[13].mxu0  ;;  %v6575_v44 = vld [vmem:[#allocation5 + $0xb8] ss:$0 sm:$0xff] }
 0x97c   : > { %v1829_v47 = vsel %vm355_vm2, %v1826_v45, -inf }
 0x97d   : > { %1830 = vmax.xlane.f32.xlu0 %v1829_v47  ;;  %v1990_v48 = vpop.f32.mrb[14].mxu0 }
 0x97e   : > { %v1991_v49 = vadd.f32 %v6581_v35, %v1990_v48  ;;  %v7056_v8 = vpop.f32.mrb[15].mxu0 }
 0x980   : > { %v1994_v50 = vsel %vm355_vm2, %v1991_v49, -inf }
 0x981   : > { %1995 = vmax.xlane.f32.xlu1 %v1994_v50 }
 0x992   : > { %1675 = vrot.lane.b32.xlu1 %v8282_v24, %s7948_s25 }
 0xa05   : > { %v1501_v51 = vpop.xlane.xlu1 %1500 }
 0xa06   : > { %v1502_v52 = vsub.f32 %v1496_v37, %v1501_v51  ;;  %v1666_v53 = vpop.xlane.xlu0 %1665  ;;  %v2098_v37 = vld [vmem:[#allocation5 + $0x1f8] sm:$0xff] }
 0xa07   : > { %v1667_v54 = vsub.f32 %v1661_v40, %v1666_v53  ;;  %v7473_v39 = vpack.c.bf16 %v2099_v38, %v2098_v37 }
 0xa08   : > { %v1503_v55 = vmul.f32 1.442695, %v1502_v52 }
 0xa09   : > { %v1668_v56 = vmul.f32 1.442695, %v1667_v54  ;;  %7474 = vmatpush3.bf16.msra.mxu0 %v7473_v39  ;;  %v6596_v39 = vld [vmem:[#allocation5 + $0x2d0] ss:$0 sm:$0xff] }
 0xa0a   : > { %7704 = vpow2.f32 %v1503_v55  ;;  %v1831_v4 = vpop.xlane.xlu0 %1830  ;;  %7481 = vmatprep.subr.bf16.mxu0 %v7938_v0 }
 0xa0b   : > { %7706 = vpow2.f32 %v1668_v56  ;;  %v1832_v5 = vsub.f32 %v1826_v45, %v1831_v4  ;;  %v1305_v45 = vadd.f32 %v6575_v44, %v8319_v33  ;;  %v6594_v56 = vld [vmem:[#allocation5 + $0x208] ss:$0 sm:$0xff] }
 0xa0d   : > { %v1833_v6 = vmul.f32 1.442695, %v1832_v5  ;;  %v1308_v46 = vadd.f32 %v1305_v45, %v8263_v7  ;;  %v2207_v5 = vld [vmem:[#allocation5 + $0x228] sm:$0xff] }
 0xa0e   : > { %v1996_v57 = vpop.xlane.xlu1 %1995 }
 0xa0f   : > { %v1997_v58 = vsub.f32 %v1991_v49, %v1996_v57  ;;  %v1309_v47 = vsel %vm272_vm1, %v1308_v46, 0.0 }
 0xa11   : > { %v1998_v59 = vmul.f32 1.442695, %v1997_v58 }
 0xa12   : > { %v1676_v11 = vpop.permute.xlu1 %1675 }
 0xa13   : > { %7708 = vpow2.f32 %v1998_v59 }
 0xa14   : > { %v7705_v60 = vpop.eup %7704  ;;  %7710 = vpow2.f32 %v1833_v6 }
 0xa15   : > { %v7707_v61 = vpop.eup %7706  ;;  %v1505_v62 = vsel %vm355_vm2, %v7705_v60, 0.0 }
 0xa16   : > { %1506 = vadd.xlane.f32.xlu0 %v1505_v62  ;;  %v1670_v63 = vsel %vm355_vm2, %v7707_v61, 0.0  ;;  %v2204_v62 = vld [vmem:[#allocation5 + $0x210] sm:$0xff] }
 0xa17   : > { %1671 = vadd.xlane.f32.xlu1 %v1670_v63  ;;  %v2205_v63 = vld [vmem:[#allocation5 + $0x218] sm:$0xff] }
 0xa18   : > { %v7476_v4 = vpack.c.bf16 %v2205_v63, %v2204_v62 }
 0xa1d   : > { %v7709_v2 = vpop.eup %7708 }
 0xa1e   : > { %v2000_v3 = vsel %vm355_vm2, %v7709_v2, 0.0  ;;  %v7711_v9 = vpop.eup %7710 }
 0xa1f   : > { %2001 = vadd.xlane.f32.xlu1 %v2000_v3  ;;  %v1835_v10 = vsel %vm355_vm2, %v7711_v9, 0.0  ;;  %v7666_v3 = vpack.i.bf16 %v2205_v63, %v2204_v62 }
 0xa2c   : > { %1510 = vrot.lane.b32.xlu0 %v8282_v24, %s7949_s14 }
 0xa30   : > { %1840 = vrot.lane.b32.xlu1 %v8282_v24, %s7950_s5 }
 0xa4b   : > { %1836 = vadd.xlane.f32.xlu0 %v1835_v10 }
 0xa61   : > { %2005 = vrot.lane.b32.xlu0 %v8282_v24, %s8901_s9 }
 0xaa3   : > { %v1507_v13 = vpop.xlane.xlu0 %1506 }
 0xaa4   : > { %7712 = vrcp.f32 %v1507_v13  ;;  %v1672_v14 = vpop.xlane.xlu1 %1671 }
 0xaa5   : > { %7714 = vrcp.f32 %v1672_v14 }
 0xaa7   : > { %v1511_v15 = vpop.permute.xlu0 %1510 }
 0xaa8   : > { %7028 = vmatpush3.msra.mxu1 %v1511_v15 }
 0xaa9   : > { %7037 = vmatprep.subr.mxu1 %v7940_v1 }
 0xaac   : > { %v2002_v17 = vpop.xlane.xlu1 %2001 }
 0xaae   : > { %v7713_v16 = vpop.eup %7712 }
 0xaaf   : > { %v1509_v18 = vmul.f32 %v7713_v16, %v7705_v60  ;;  %v7715_v19 = vpop.eup %7714 }
 0xab0   : > { %v1674_v21 = vmul.f32 %v7715_v19, %v7707_v61  ;;  %v1841_v22 = vpop.permute.xlu1 %1840  ;;  %v6598_v19 = vld [vmem:[#allocation5 + $0x230] ss:$0 sm:$0xff] }
 0xab1   : > { %7030 = vmatmul.mubr.msk.f32.vlgmr.msra.gmra.mrb[18].mxu1 %vm355_vm2, %v1509_v18 }
 0xab2   : > { %7038 = vmatpush3.msra.mxu1 %v1676_v11  ;;  %7039 = vmatprep.mubr.msk.f32.mxu1 %vm7939_vm0, %v7940_v1 }
 0xab3   : > { %7047 = vmatprep.subr.mxu1 %v7940_v1 }
 0xab5   : > { %7040 = vmatmul.mubr.msk.f32.vlgmr.msra.gmra.mrb[20].mxu1 %vm355_vm2, %v1674_v21 }
 0xab6   : > { %7048 = vmatpush3.msra.mxu1 %v1841_v22  ;;  %7049 = vmatprep.mubr.msk.f32.mxu1 %vm7939_vm0, %v7940_v1 }
 0xab7   : > { %7057 = vmatprep.subr.mxu1 %v7940_v1 }
 0xad8   : > { %v1837_v23 = vpop.xlane.xlu0 %1836 }
 0xad9   : > { %7716 = vrcp.f32 %v1837_v23 }
 0xada   : > { %7718 = vrcp.f32 %v2002_v17 }
 0xadc   : > { %v2006_v27 = vpop.permute.xlu0 %2005 }
 0xae3   : > { %v7717_v24 = vpop.eup %7716 }
 0xae4   : > { %v1839_v25 = vmul.f32 %v7717_v24, %v7711_v9  ;;  %v7719_v26 = vpop.eup %7718 }
 0xae5   : > { %v2004_v28 = vmul.f32 %v7719_v26, %v7709_v2  ;;  %v2206_v2 = vld [vmem:[#allocation5 + $0x220] sm:$0xff] }
 0xae6   : > { %7050 = vmatmul.mubr.msk.f32.vlgmr.msra.gmra.mrb[22].mxu1 %vm355_vm2, %v1839_v25  ;;  %v7671_v6 = vpack.i.bf16 %v2207_v5, %v2206_v2  ;;  %v7479_v9 = vpack.c.bf16 %v2207_v5, %v2206_v2 }
 0xae7   : > { %7058 = vmatpush3.msra.mxu1 %v2006_v27  ;;  %7059 = vmatprep.mubr.msk.f32.mxu1 %vm7939_vm0, %v7940_v1 }
 0xae8   : > { %7475 = vmatprep.subr.bf16.mxu1 %v7938_v0 }
 0xaea   : > { %7060 = vmatmul.mubr.msk.f32.vlgmr.msra.gmra.mrb[24].mxu1 %vm355_vm2, %v2004_v28 }
 0xaeb   : > { %7081 = vmatprep.mubr.msk.f32.mxu1 %vm7939_vm0, %v7940_v1  ;;  %7477 = vmatpush3.bf16.msra.mxu1 %v7476_v4 }
 0xaec   : > { %7478 = vmatprep.subr.bf16.mxu1 %v7938_v0 }
 0xaef   : > { %7480 = vmatpush3.bf16.msra.mxu1 %v7479_v9 }
 0xaf0   : > { %7095 = vmatprep.subr.mxu1 %v7940_v1 }
 0xb84   : > { %v1582_v32 = vpop.f32.mrb[18].mxu1 }
 0xb85   : > { %v7031_v34 = vpop.f32.mrb[19].mxu1 }
 0xb88   : > { %v1747_v35 = vpop.f32.mrb[20].mxu1 }
 0xb89   : > { %2082 = vrot.lane.b32.xlu1 %v1747_v35, %s7952_s26  ;;  %v7041_v36 = vpop.f32.mrb[21].mxu1 }
 0xb8a   : > { %v6578_v36 = vld [vmem:[#allocation5 + $0xd8] ss:$0 sm:$0xff] }
 0xbb9   : > { %v1912_v40 = vpop.f32.mrb[22].mxu1 }
 0xbba   : > { %2086 = vrot.lane.b32.xlu0 %v1912_v40, %s7953_s20  ;;  %v7051_v41 = vpop.f32.mrb[23].mxu1 }
 0xbbb   : > { %v6597_v41 = vld [vmem:[#allocation5 + $0x2d8] ss:$0 sm:$0xff] }
 0xbbd   : > { %v2077_v42 = vpop.f32.mrb[24].mxu1 }
 0xbbe   : > { %2090 = vrot.lane.b32.xlu1 %v2077_v42, %s7954_s7  ;;  %v7061_v43 = vpop.f32.mrb[25].mxu1 }
 0xbd9   : > { %1310 = vadd.xlane.f32.xlu0 %v1309_v47 }
 0xbfb   : > { %v2083_v48 = vpop.permute.xlu1 %2082 }
 0xbfc   : > { %v2093_v8 = vsel %vm355_vm2, %v1582_v32, %v2083_v48 }
 0xc2c   : > { %v2087_v49 = vpop.permute.xlu0 %2086 }
 0xc2d   : > { %v2094_v50 = vsel %vm1025_vm3, %v2093_v8, %v2087_v49 }
 0xc30   : > { %v2091_v51 = vpop.permute.xlu1 %2090 }
 0xc31   : > { %v2095_v52 = vsel %vm1027_vm4, %v2094_v50, %v2091_v51 }
 0xc32   : > { %7071 = vmatmul.mubr.msk.f32.vlgmr.msra.gmra.mrb[16].mxu0 %vm272_vm1, %v2095_v52 }
 0xc33   : > { %7092 = vmatprep.mubr.msk.f32.mxu0 %vm7939_vm0, %v7940_v1 }
 0xc66   : > { %v1311_v33 = vpop.xlane.xlu0 %1310 }
 0xc67   : > { %v1312_v53 = vmul.f32 0.03125, %v1311_v33 }
 0xc69   : > { %v1313_v7 = vsub.f32 %v1308_v46, %v1312_v53 }
 0xc6b   : > { %v1314_v54 = vmul.f32 %v1313_v7, %v1313_v7 }
 0xc6d   : > { %v1315_v55 = vsel %vm272_vm1, %v1314_v54, 0.0 }
 0xc6e   : > { %1316 = vadd.xlane.f32.xlu0 %v1315_v55 }
 0xcfb   : > { %v1317_v21 = vpop.xlane.xlu0 %1316 }
 0xcfc   : > { %v1318_v22 = vmul.f32 0.03125, %v1317_v21 }
 0xcfe   : > { %v1319_v23 = vadd.f32 1e-06, %v1318_v22 }
 0xd00   : > { %7720 = vrsqrt.f32 %v1319_v23 }
 0xd05   : > { %v2174_v57 = vpop.f32.mrb[16].mxu0 }
 0xd06   : > { %v2175_v58 = vadd.f32 %v6594_v56, %v2174_v57  ;;  %v7072_v59 = vpop.f32.mrb[17].mxu0 }
 0xd08   : > { %v2178_v60 = vadd.f32 %v2175_v58, %v8271_v12 }
 0xd0a   : > { %v2179_v61 = vsel %vm272_vm1, %v2178_v60, 0.0  ;;  %v7721_v24 = vpop.eup %7720 }
 0xd0b   : > { %2180 = vadd.xlane.f32.xlu1 %v2179_v61  ;;  %v1321_v27 = vmul.f32 %v7721_v24, %v1313_v7 }
 0xd0d   : > { %v1327_v34 = vmul.f32 %v6577_v29, %v1321_v27 }
 0xd0f   : > { %v8384_v37 = vadd.f32 %v6578_v36, %v1327_v34 }
 0xd1c   : > { %7667 = vrot.lane.b32.xlu1 %v7666_v3, %s7942_s23 }
 0xd20   : > { %2303 = vrot.lane.b32.xlu1 %v6598_v19, %s7942_s23 }
 0xd98   : > { %v2181_v12 = vpop.xlane.xlu1 %2180 }
 0xd99   : > { %v2182_v10 = vmul.f32 0.03125, %v2181_v12 }
 0xd9b   : > { %v2183_v11 = vsub.f32 %v2178_v60, %v2182_v10 }
 0xd9c   : > { %v7668_v15 = vpop.permute.xlu1 %7667 }
 0xd9d   : > { %v2184_v13 = vmul.f32 %v2183_v11, %v2183_v11  ;;  %v7670_v16 = vunpack.i.h.bf16 %v7668_v15  ;;  %v7669_v17 = vunpack.i.l.bf16 %v7668_v15 }
 0xd9f   : > { %v2185_v14 = vsel %vm272_vm1, %v2184_v13, 0.0  ;;  %v7482_v18 = vpack.c.bf16 %v7670_v16, %v7669_v17 }
 0xda0   : > { %2186 = vadd.xlane.f32.xlu0 %v2185_v14  ;;  %v2304_v44 = vpop.permute.xlu1 %2303 }
 0xda1   : > { %7483 = vmatpush3.bf16.msra.mxu0 %v7482_v18 }
 0xda2   : > { %7484 = vmatprep.subr.bf16.mxu0 %v7938_v0 }
 0xdb6   : > { %7672 = vrot.lane.b32.xlu0 %v7671_v6, %s7942_s23 }
 0xe2d   : > { %v2187_v25 = vpop.xlane.xlu0 %2186 }
 0xe2e   : > { %v2188_v26 = vmul.f32 0.03125, %v2187_v25 }
 0xe30   : > { %v2189_v28 = vadd.f32 1e-06, %v2188_v26 }
 0xe31   : > { %v7673_v30 = vpop.permute.xlu0 %7672 }
 0xe32   : > { %7722 = vrsqrt.f32 %v2189_v28  ;;  %v7675_v31 = vunpack.i.h.bf16 %v7673_v30  ;;  %v7674_v32 = vunpack.i.l.bf16 %v7673_v30 }
 0xe34   : > { %v7485_v35 = vpack.c.bf16 %v7675_v31, %v7674_v32 }
 0xe36   : > { %7486 = vmatpush3.bf16.msra.mxu0 %v7485_v35 }
 0xe37   : > { %7105 = vmatprep.subr.mxu0 %v7940_v1 }
 0xe39   : > { %7093 = vmatmul.mubr.msk.f32.vlgmr.msra.gmra.mrb[18].mxu0 %vm272_vm1, %v8384_v37 }
 0xe3a   : > { %7107 = vmatprep.mubr.msk.f32.mxu0 %vm7939_vm0, %v7940_v1 }
 0xe3c   : > { %v7723_v38 = vpop.eup %7722 }
 0xe3d   : > { %v2191_v40 = vmul.f32 %v7723_v38, %v2183_v11 }
 0xe3f   : > { %v2197_v42 = vmul.f32 %v6596_v39, %v2191_v40 }
 0xe41   : > { %v8391_v43 = vadd.f32 %v6597_v41, %v2197_v42 }
 0xe43   : > { %7082 = vmatmul.mubr.msk.f32.vlgmr.msra.gmra.mrb[26].mxu1 %vm272_vm1, %v8391_v43 }
 0xe44   : > { %7097 = vmatprep.mubr.msk.f32.mxu1 %vm7939_vm0, %v7940_v1 }
 0xf0c   : > { %v2375_v45 = vpop.f32.mrb[18].mxu0 }
 0xf0d   : > { %v8397_v46 = vadd.f32 %v2375_v45, %v2304_v44  ;;  %v7094_v47 = vpop.f32.mrb[19].mxu0 }
 0xf0f   : > { %2544 = vrot.lane.b32.xlu1 %v8397_v46, %s7941_s21  ;;  %7096 = vmatpush3.xpose.msk.msra.mxu1 %vm355_vm2, %v8397_v46 }
 0xf10   : > { %7100 = vmatprep.subr.mxu1 %v7940_v1 }
 0xf13   : > { %2709 = vrot.lane.b32.xlu1 %v8397_v46, %s7946_s28 }
 0xf16   : > { %v2282_v48 = vpop.f32.mrb[26].mxu1 }
 0xf17   : > { %v2283_v49 = vadd.f32 %v6598_v19, %v2282_v48  ;;  %2874 = vrot.lane.b32.xlu1 %v8397_v46, %s7947_s10  ;;  %v7083_v8 = vpop.f32.mrb[27].mxu1 }
 0xf19   : > { %2542 = vrot.lane.b32.xlu0 %v2283_v49, %s7941_s21  ;;  %7098 = vmatmul.mubr.msk.f32.vlgmr.msra.gmra.mrb[28].mxu1 %vm355_vm2, %v2283_v49 }
 0xf1a   : > { %7102 = vmatprep.mubr.msk.f32.mxu1 %vm7939_vm0, %v7940_v1 }
 0xf1d   : > { %2707 = vrot.lane.b32.xlu0 %v2283_v49, %s7946_s28 }
 0xf21   : > { %2872 = vrot.lane.b32.xlu0 %v2283_v49, %s7947_s10 }
 0xf81   : > { %v2545_v50 = vpop.permute.xlu1 %2544 }
 0xf82   : > { %7106 = vmatpush3.xpose.msk.msra.mxu0 %vm355_vm2, %v2545_v50  ;;  %v3052_v50 = vld [vmem:[#allocation5 + $0x238] sm:$0xff] }
 0xf83   : > { %7115 = vmatprep.subr.mxu0 %v7940_v1 }
 0xf85   : > { %v2710_v51 = vpop.permute.xlu1 %2709 }
 0xf89   : > { %v2875_v53 = vpop.permute.xlu1 %2874 }
 0xf8b   : > { %v2543_v52 = vpop.permute.xlu0 %2542 }
 0xf8c   : > { %7108 = vmatmul.mubr.msk.f32.vlgmr.msra.gmra.mrb[20].mxu0 %vm355_vm2, %v2543_v52 }
 0xf8d   : > { %7116 = vmatpush3.xpose.msk.msra.mxu0 %vm355_vm2, %v2710_v51  ;;  %7117 = vmatprep.mubr.msk.f32.mxu0 %vm7939_vm0, %v7940_v1  ;;  %v3053_v51 = vld [vmem:[#allocation5 + $0x240] sm:$0xff] }
 0xf8e   : > { %7125 = vmatprep.subr.mxu0 %v7940_v1  ;;  %v7488_v52 = vpack.c.bf16 %v3053_v51, %v3052_v50  ;;  %v6617_v51 = vld [vmem:[#allocation5 + $0x280] ss:$0 sm:$0xff] }
 0xf8f   : > { %v2708_v33 = vpop.permute.xlu0 %2707 }
 0xf90   : > { %7118 = vmatmul.mubr.msk.f32.vlgmr.msra.gmra.mrb[22].mxu0 %vm355_vm2, %v2708_v33  ;;  %v3054_v33 = vld [vmem:[#allocation5 + $0x248] sm:$0xff] }
 0xf91   : > { %7126 = vmatpush3.xpose.msk.msra.mxu0 %vm355_vm2, %v2875_v53  ;;  %7127 = vmatprep.mubr.msk.f32.mxu0 %vm7939_vm0, %v7940_v1  ;;  %v3055_v53 = vld [vmem:[#allocation5 + $0x250] sm:$0xff] }
 0xf92   : > { %7487 = vmatprep.subr.bf16.mxu0 %v7938_v0 }
 0xf93   : > { %v2873_v7 = vpop.permute.xlu0 %2872 }
 0xf94   : > { %7128 = vmatmul.mubr.msk.f32.vlgmr.msra.gmra.mrb[24].mxu0 %vm355_vm2, %v2873_v7  ;;  %v7491_v7 = vpack.c.bf16 %v3055_v53, %v3054_v33 }
 0xf95   : > { %7143 = vmatprep.mubr.msk.f32.mxu0 %vm7939_vm0, %v7940_v1  ;;  %7489 = vmatpush3.bf16.msra.mxu0 %v7488_v52 }
 0xf96   : > { %7490 = vmatprep.subr.bf16.mxu0 %v7938_v0 }
 0xf99   : > { %7492 = vmatpush3.bf16.msra.mxu0 %v7491_v7 }
 0xf9a   : > { %7499 = vmatprep.subr.bf16.mxu0 %v7938_v0 }
 0xfec   : > { %v2451_v54 = vpop.f32.mrb[28].mxu1 }
 0xfed   : > { %v2452_v55 = vadd.f32 %v8206_v20, %v2451_v54  ;;  %v7099_v56 = vpop.f32.mrb[29].mxu1 }
 0xfef   : > { %v2455_v57 = vsel %vm355_vm2, %v2452_v55, -inf }
 0xff0   : > { %2456 = vmax.xlane.f32.xlu1 %v2455_v57 }
0x105f   : > { %v2616_v58 = vpop.f32.mrb[20].mxu0 }
0x1060   : > { %v2617_v59 = vadd.f32 %v8206_v20, %v2616_v58  ;;  %v7109_v60 = vpop.f32.mrb[21].mxu0 }
0x1062   : > { %v2620_v61 = vsel %vm355_vm2, %v2617_v59, -inf }
0x1063   : > { %2621 = vmax.xlane.f32.xlu0 %v2620_v61  ;;  %v2781_v62 = vpop.f32.mrb[22].mxu0 }
0x1064   : > { %v2782_v63 = vadd.f32 %v8206_v20, %v2781_v62  ;;  %v7119_v2 = vpop.f32.mrb[23].mxu0 }
0x1066   : > { %v2785_v3 = vsel %vm355_vm2, %v2782_v63, -inf }
0x1067   : > { %2786 = vmax.xlane.f32.xlu0 %v2785_v3  ;;  %v2946_v4 = vpop.f32.mrb[24].mxu0 }
0x1068   : > { %v2947_v5 = vadd.f32 %v8206_v20, %v2946_v4  ;;  %v7129_v6 = vpop.f32.mrb[25].mxu0  ;;  %v6613_v4 = vld [vmem:[#allocation5 + $0x258] ss:$0 sm:$0xff] }
0x106a   : > { %v2950_v9 = vsel %vm355_vm2, %v2947_v5, -inf }
0x106b   : > { %2951 = vmax.xlane.f32.xlu1 %v2950_v9 }
0x107c   : > { %2631 = vrot.lane.b32.xlu1 %v8397_v46, %s7944_s13 }
0x107d   : > { %v2457_v12 = vpop.xlane.xlu1 %2456 }
0x107e   : > { %v2458_v10 = vsub.f32 %v2452_v55, %v2457_v12 }
0x1080   : > { %v2459_v11 = vmul.f32 1.442695, %v2458_v10 }
0x1082   : > { %7724 = vpow2.f32 %v2459_v11 }
0x108c   : > { %v7725_v13 = vpop.eup %7724 }
0x108d   : > { %v2461_v14 = vsel %vm355_vm2, %v7725_v13, 0.0 }
0x108e   : > { %2462 = vadd.xlane.f32.xlu0 %v2461_v14 }
0x10a4   : > { %2466 = vrot.lane.b32.xlu0 %v8397_v46, %s7942_s23 }
0x10f0   : > { %v2622_v15 = vpop.xlane.xlu0 %2621 }
0x10f1   : > { %v2623_v20 = vsub.f32 %v2617_v59, %v2622_v15 }
0x10f3   : > { %v2624_v16 = vmul.f32 1.442695, %v2623_v20 }
0x10f4   : > { %v2787_v17 = vpop.xlane.xlu0 %2786 }
0x10f5   : > { %7726 = vpow2.f32 %v2624_v16  ;;  %v2788_v18 = vsub.f32 %v2782_v63, %v2787_v17  ;;  %v3160_v16 = vld [vmem:[#allocation5 + $0x260] sm:$0xff]  ;;  %v3161_v17 = vld [vmem:[#allocation5 + $0x268] sm:$0xff] }
0x10f7   : > { %v2789_v19 = vmul.f32 1.442695, %v2788_v18  ;;  %v7494_v18 = vpack.c.bf16 %v3161_v17, %v3160_v16 }
0x10f8   : > { %v2952_v21 = vpop.xlane.xlu1 %2951 }
0x10f9   : > { %7728 = vpow2.f32 %v2789_v19  ;;  %v2953_v22 = vsub.f32 %v2947_v5, %v2952_v21  ;;  %v3162_v19 = vld [vmem:[#allocation5 + $0x270] sm:$0xff]  ;;  %v3163_v21 = vld [vmem:[#allocation5 + $0x278] sm:$0xff] }
0x10fb   : > { %v2954_v23 = vmul.f32 1.442695, %v2953_v22  ;;  %v7497_v22 = vpack.c.bf16 %v3163_v21, %v3162_v19 }
0x10fc   : > { %v2632_v35 = vpop.permute.xlu1 %2631 }
0x10fd   : > { %7730 = vpow2.f32 %v2954_v23  ;;  %v3244_v23 = vld [vmem:[#allocation5 + $0x290] sm:$0xff] }
0x10ff   : > { %v7727_v24 = vpop.eup %7726 }
0x1100   : > { %v2626_v25 = vsel %vm355_vm2, %v7727_v24, 0.0 }
0x1101   : > { %2627 = vadd.xlane.f32.xlu1 %v2626_v25 }
0x1103   : > { %v7729_v26 = vpop.eup %7728 }
0x1104   : > { %v2791_v27 = vsel %vm355_vm2, %v7729_v26, 0.0 }
0x1105   : > { %2792 = vadd.xlane.f32.xlu0 %v2791_v27 }
0x1107   : > { %v7731_v28 = vpop.eup %7730 }
0x1108   : > { %v2956_v29 = vsel %vm355_vm2, %v7731_v28, 0.0 }
0x1109   : > { %2957 = vadd.xlane.f32.xlu1 %v2956_v29  ;;  %v3248_v29 = vld [vmem:[#allocation5 + $0x2b0] sm:$0xff] }
0x111a   : > { %2796 = vrot.lane.b32.xlu1 %v8397_v46, %s8902_s6 }
0x111b   : > { %2961 = vrot.lane.b32.xlu0 %v8397_v46, %s8903_s29  ;;  %v2463_v30 = vpop.xlane.xlu0 %2462 }
0x111c   : > { %7732 = vrcp.f32 %v2463_v30 }
0x111f   : > { %v2467_v31 = vpop.permute.xlu0 %2466 }
0x1120   : > { %7101 = vmatpush3.msra.mxu1 %v2467_v31 }
0x1121   : > { %7110 = vmatprep.subr.mxu1 %v7940_v1 }
0x1126   : > { %v7733_v32 = vpop.eup %7732 }
0x1127   : > { %v2465_v34 = vmul.f32 %v7733_v32, %v7725_v13 }
0x1129   : > { %7103 = vmatmul.mubr.msk.f32.vlgmr.msra.gmra.mrb[30].mxu1 %vm355_vm2, %v2465_v34 }
0x112a   : > { %7111 = vmatpush3.msra.mxu1 %v2632_v35  ;;  %7112 = vmatprep.mubr.msk.f32.mxu1 %vm7939_vm0, %v7940_v1 }
0x112b   : > { %7120 = vmatprep.subr.mxu1 %v7940_v1 }
0x118e   : > { %v2628_v36 = vpop.xlane.xlu1 %2627 }
0x118f   : > { %7734 = vrcp.f32 %v2628_v36  ;;  %v6615_v36 = vld [vmem:[#allocation5 + $0x2e0] ss:$0 sm:$0xff] }
0x1192   : > { %v2793_v38 = vpop.xlane.xlu0 %2792 }
0x1193   : > { %7736 = vrcp.f32 %v2793_v38 }
0x1196   : > { %v2958_v39 = vpop.xlane.xlu1 %2957  ;;  %v2962_v46 = vpop.permute.xlu0 %2961 }
0x1197   : > { %7738 = vrcp.f32 %v2958_v39  ;;  %v3355_v39 = vld [vmem:[#allocation5 + $0xe0] sm:$0xff] }
0x1199   : > { %v7735_v40 = vpop.eup %7734 }
0x119a   : > { %v2630_v41 = vmul.f32 %v7735_v40, %v7727_v24  ;;  %v2797_v42 = vpop.permute.xlu1 %2796  ;;  %v3245_v24 = vld [vmem:[#allocation5 + $0x298] sm:$0xff]  ;;  %v3356_v40 = vld [vmem:[#allocation5 + $0xe8] sm:$0xff] }
0x119c   : > { %7113 = vmatmul.mubr.msk.f32.vlgmr.msra.gmra.mrb[32].mxu1 %vm355_vm2, %v2630_v41  ;;  %v6616_v41 = vld [vmem:[#allocation5 + $0x2e8] ss:$0 sm:$0xff] }
0x119d   : > { %v7737_v44 = vpop.eup %7736  ;;  %7121 = vmatpush3.msra.mxu1 %v2797_v42  ;;  %7122 = vmatprep.mubr.msk.f32.mxu1 %vm7939_vm0, %v7940_v1 }
0x119e   : > { %v2795_v45 = vmul.f32 %v7737_v44, %v7729_v26  ;;  %7130 = vmatprep.subr.mxu1 %v7940_v1  ;;  %v3246_v26 = vld [vmem:[#allocation5 + $0x2a0] sm:$0xff]  ;;  %v7512_v44 = vpack.c.bf16 %v3356_v40, %v3355_v39 }
0x119f   : > { %v7503_v27 = vpack.c.bf16 %v3246_v26, %v3245_v24 }
0x11a0   : > { %7123 = vmatmul.mubr.msk.f32.vlgmr.msra.gmra.mrb[34].mxu1 %vm355_vm2, %v2795_v45 }
0x11a1   : > { %v7739_v47 = vpop.eup %7738  ;;  %7131 = vmatpush3.msra.mxu1 %v2962_v46  ;;  %7132 = vmatprep.mubr.msk.f32.mxu1 %vm7939_vm0, %v7940_v1  ;;  %v3357_v46 = vld [vmem:[#allocation5 + $0xf0] sm:$0xff] }
0x11a2   : > { %v2960_v48 = vmul.f32 %v7739_v47, %v7731_v28  ;;  %7493 = vmatprep.subr.bf16.mxu1 %v7938_v0  ;;  %v3247_v28 = vld [vmem:[#allocation5 + $0x2a8] sm:$0xff]  ;;  %v3358_v47 = vld [vmem:[#allocation5 + $0xf8] sm:$0xff] }
0x11a3   : > { %v7506_v30 = vpack.c.bf16 %v3248_v29, %v3247_v28 }
0x11a4   : > { %7133 = vmatmul.mubr.msk.f32.vlgmr.msra.gmra.mrb[36].mxu1 %vm355_vm2, %v2960_v48  ;;  %v7515_v48 = vpack.c.bf16 %v3358_v47, %v3357_v46 }
0x11a5   : > { %7154 = vmatprep.mubr.msk.f32.mxu1 %vm7939_vm0, %v7940_v1  ;;  %7495 = vmatpush3.bf16.msra.mxu1 %v7494_v18 }
0x11a6   : > { %7496 = vmatprep.subr.bf16.mxu1 %v7938_v0 }
0x11a9   : > { %7498 = vmatpush3.bf16.msra.mxu1 %v7497_v22 }
0x11aa   : > { %7511 = vmatprep.subr.bf16.mxu1 %v7938_v0 }
0x11fc   : > { %v2538_v49 = vpop.f32.mrb[30].mxu1 }
0x11fd   : > { %v7104_v8 = vpop.f32.mrb[31].mxu1 }
0x11fe   : > { %v3250_v8 = vld [vmem:[#allocation5 + $0x2c0] sm:$0xff] }
0x126f   : > { %v2703_v54 = vpop.f32.mrb[32].mxu1 }
0x1270   : > { %3038 = vrot.lane.b32.xlu1 %v2703_v54, %s7952_s26  ;;  %v7114_v55 = vpop.f32.mrb[33].mxu1  ;;  %v6623_v54 = vld [vmem:[#allocation5 + $0x100] ss:$0 sm:$0xff] }
0x1273   : > { %v2868_v56 = vpop.f32.mrb[34].mxu1 }
0x1274   : > { %3042 = vrot.lane.b32.xlu0 %v2868_v56, %s7953_s20  ;;  %v7124_v57 = vpop.f32.mrb[35].mxu1 }
0x1277   : > { %v3033_v58 = vpop.f32.mrb[36].mxu1 }
0x1278   : > { %3046 = vrot.lane.b32.xlu1 %v3033_v58, %s7954_s7  ;;  %v7134_v59 = vpop.f32.mrb[37].mxu1 }
0x12e2   : > { %v3039_v60 = vpop.permute.xlu1 %3038 }
0x12e3   : > { %v3049_v62 = vsel %vm355_vm2, %v2538_v49, %v3039_v60  ;;  %v3249_v49 = vld [vmem:[#allocation5 + $0x2b8] sm:$0xff] }
0x12e4   : > { %v7509_v50 = vpack.c.bf16 %v3250_v8, %v3249_v49 }
0x12e6   : > { %v3043_v61 = vpop.permute.xlu0 %3042 }
0x12e7   : > { %v3050_v63 = vsel %vm1025_vm3, %v3049_v62, %v3043_v61 }
0x12ea   : > { %v3047_v2 = vpop.permute.xlu1 %3046 }
0x12eb   : > { %v3051_v3 = vsel %vm1027_vm4, %v3050_v63, %v3047_v2 }
0x12ec   : > { %7144 = vmatmul.mubr.msk.f32.vlgmr.msra.gmra.mrb[26].mxu0 %vm272_vm1, %v3051_v3 }
0x12ed   : > { %7173 = vmatprep.mubr.msk.f32.mxu0 %vm7939_vm0, %v7940_v1 }
0x13bf   : > { %v3130_v5 = vpop.f32.mrb[26].mxu0 }
0x13c0   : > { %v3131_v6 = vadd.f32 %v6613_v4, %v3130_v5  ;;  %v7145_v9 = vpop.f32.mrb[27].mxu0 }
0x13c2   : > { %v3134_v12 = vadd.f32 %v3131_v6, %v8391_v43  ;;  %v3243_v43 = vld [vmem:[#allocation5 + $0x288] sm:$0xff]  ;;  %v8540_v6 = vld [vmem:[%s8203_s8] ss:$0 sm:$0xff] }
0x13c3   : > { %v7500_v25 = vpack.c.bf16 %v3244_v23, %v3243_v43 }
0x13c4   : > { %v3135_v10 = vsel %vm272_vm1, %v3134_v12, 0.0 }
0x13c5   : > { %3136 = vadd.xlane.f32.xlu0 %v3135_v10  ;;  %7501 = vmatpush3.bf16.msra.mxu0 %v7500_v25 }
0x13c6   : > { %7502 = vmatprep.subr.bf16.mxu0 %v7938_v0 }
0x13c9   : > { %7504 = vmatpush3.bf16.msra.mxu0 %v7503_v27 }
0x13ca   : > { %7505 = vmatprep.subr.bf16.mxu0 %v7938_v0 }
0x13cd   : > { %7507 = vmatpush3.bf16.msra.mxu0 %v7506_v30 }
0x13ce   : > { %7508 = vmatprep.subr.bf16.mxu0 %v7938_v0 }
0x13d1   : > { %7510 = vmatpush3.bf16.msra.mxu0 %v7509_v50 }
0x13d2   : > { %7197 = vmatprep.subr.mxu0 %v7940_v1 }
0x1452   : > { %v3137_v11 = vpop.xlane.xlu0 %3136 }
0x1453   : > { %v3138_v13 = vmul.f32 0.03125, %v3137_v11 }
0x1455   : > { %v3139_v14 = vsub.f32 %v3134_v12, %v3138_v13 }
0x1457   : > { %v3140_v15 = vmul.f32 %v3139_v14, %v3139_v14 }
0x1459   : > { %v3141_v20 = vsel %vm272_vm1, %v3140_v15, 0.0 }
0x145a   : > { %3142 = vadd.xlane.f32.xlu1 %v3141_v20 }
0x14e7   : > { %v3143_v31 = vpop.xlane.xlu1 %3142 }
0x14e8   : > { %v3144_v32 = vmul.f32 0.03125, %v3143_v31 }
0x14ea   : > { %v3145_v34 = vadd.f32 1e-06, %v3144_v32 }
0x14ec   : > { %7740 = vrsqrt.f32 %v3145_v34 }
0x14f6   : > { %v7741_v35 = vpop.eup %7740 }
0x14f7   : > { %v3147_v38 = vmul.f32 %v7741_v35, %v3139_v14 }
0x14f9   : > { %v3153_v42 = vmul.f32 %v6615_v36, %v3147_v38 }
0x14fb   : > { %v8484_v45 = vadd.f32 %v6616_v41, %v3153_v42 }
0x14fd   : > { %7155 = vmatmul.mubr.msk.f32.vlgmr.msra.gmra.mrb[38].mxu1 %vm272_vm1, %v8484_v45 }
0x14fe   : > { %7513 = vmatpush3.bf16.msra.mxu1 %v7512_v44  ;;  %7184 = vmatprep.mubr.msk.f32.mxu1 %vm7939_vm0, %v7940_v1 }
0x14ff   : > { %7514 = vmatprep.subr.bf16.mxu1 %v7938_v0 }
0x1502   : > { %7516 = vmatpush3.bf16.msra.mxu1 %v7515_v48 }
0x1503   : > { %7187 = vmatprep.subr.mxu1 %v7940_v1 }
0x1505   : > { %7185 = vmatmul.mubr.msk.f32.vlgmr.msra.gmra.mrb[40].mxu1 %vm272_vm1, %v8384_v37 }
0x1506   : > { %7189 = vmatprep.mubr.msk.f32.mxu1 %vm7939_vm0, %v7940_v1 }
0x15d0   : > { %v3238_v52 = vpop.f32.mrb[38].mxu1 }
0x15d1   : > { %v3239_v33 = vadd.f32 %v6617_v51, %v3238_v52  ;;  %v7156_v53 = vpop.f32.mrb[39].mxu1 }
0x15d3   : > { %v3242_v7 = vmax.f32 %v3239_v33, 0.0 }
0x15d5   : > { %7174 = vmatmul.mubr.msk.f32.vlgmr.msra.gmra.mrb[28].mxu0 %vm1234_vm5, %v3242_v7 }
0x15d6   : > { %7199 = vmatprep.mubr.msk.f32.mxu0 %vm7939_vm0, %v7940_v1 }
0x15d8   : > { %v3430_v55 = vpop.f32.mrb[40].mxu1 }
0x15d9   : > { %v8500_v56 = vadd.f32 %v6623_v54, %v3430_v55  ;;  %v7186_v57 = vpop.f32.mrb[41].mxu1 }
0x15db   : > { %3600 = vrot.lane.b32.xlu1 %v8500_v56, %s7944_s13  ;;  %3435 = vrot.lane.b32.xlu0 %v8500_v56, %s7942_s23 }
0x15df   : > { %3765 = vrot.lane.b32.xlu1 %v8500_v56, %s8902_s6  ;;  %3598 = vrot.lane.b32.xlu0 %v8500_v56, %s7941_s21 }
0x15e3   : > { %3930 = vrot.lane.b32.xlu1 %v8500_v56, %s8903_s29  ;;  %3763 = vrot.lane.b32.xlu0 %v8500_v56, %s7946_s28 }
0x15e7   : > { %3928 = vrot.lane.b32.xlu0 %v8500_v56, %s7947_s10 }
0x164d   : > { %v3601_v58 = vpop.permute.xlu1 %3600  ;;  %v3436_v59 = vpop.permute.xlu0 %3435 }
0x164e   : > { %7188 = vmatpush3.xpose.msk.msra.mxu1 %vm355_vm2, %v3436_v59  ;;  %7198 = vmatpush3.xpose.msk.msra.mxu0 %vm355_vm2, %v3601_v58 }
0x164f   : > { %7207 = vmatprep.subr.mxu0 %v7940_v1  ;;  %7192 = vmatprep.subr.mxu1 %v7940_v1 }
0x1651   : > { %v3766_v60 = vpop.permute.xlu1 %3765  ;;  %7190 = vmatmul.mubr.msk.f32.vlgmr.msra.gmra.mrb[42].mxu1 %vm355_vm2, %v8500_v56  ;;  %v3599_v61 = vpop.permute.xlu0 %3598 }
0x1652   : > { %7200 = vmatmul.mubr.msk.f32.vlgmr.msra.gmra.mrb[30].mxu0 %vm355_vm2, %v3599_v61  ;;  %7194 = vmatprep.mubr.msk.f32.mxu1 %vm7939_vm0, %v7940_v1  ;;  %v4109_v61 = vld [vmem:[#allocation5 + $0x110] sm:$0xff] }
0x1653   : > { %7208 = vmatpush3.xpose.msk.msra.mxu0 %vm355_vm2, %v3766_v60  ;;  %7209 = vmatprep.mubr.msk.f32.mxu0 %vm7939_vm0, %v7940_v1  ;;  %v4108_v60 = vld [vmem:[#allocation5 + $0x108] sm:$0xff] }
0x1654   : > { %7217 = vmatprep.subr.mxu0 %v7940_v1 }
0x1655   : > { %v3931_v62 = vpop.permute.xlu1 %3930  ;;  %v3764_v63 = vpop.permute.xlu0 %3763 }
0x1656   : > { %7210 = vmatmul.mubr.msk.f32.vlgmr.msra.gmra.mrb[32].mxu0 %vm355_vm2, %v3764_v63 }
0x1657   : > { %7218 = vmatpush3.xpose.msk.msra.mxu0 %vm355_vm2, %v3931_v62  ;;  %7219 = vmatprep.mubr.msk.f32.mxu0 %vm7939_vm0, %v7940_v1  ;;  %v7518_v62 = vpack.c.bf16 %v4109_v61, %v4108_v60  ;;  %v6639_v61 = vld [vmem:[#allocation5 + $0x1a0] ss:$0 sm:$0xff] }
0x1658   : > { %7517 = vmatprep.subr.bf16.mxu0 %v7938_v0 }
0x1659   : > { %v3929_v2 = vpop.permute.xlu0 %3928 }
0x165a   : > { %7220 = vmatmul.mubr.msk.f32.vlgmr.msra.gmra.mrb[34].mxu0 %vm355_vm2, %v3929_v2 }
0x165b   : > { %7235 = vmatprep.mubr.msk.f32.mxu0 %vm7939_vm0, %v7940_v1  ;;  %7519 = vmatpush3.bf16.msra.mxu0 %v7518_v62 }
0x165c   : > { %7520 = vmatprep.subr.bf16.mxu0 %v7938_v0 }
0x16a8   : > { %v8537_v3 = vpop.f32.mrb[28].mxu0 }
0x16a9   : > { %v7175_v4 = vpop.f32.mrb[29].mxu0 }
0x1724   : > { %v3507_v5 = vpop.f32.mrb[42].mxu1 }
0x1725   : > { %v3508_v9 = vadd.f32 %v8540_v6, %v3507_v5  ;;  %v7191_v12 = vpop.f32.mrb[43].mxu1  ;;  %v3672_v10 = vpop.f32.mrb[30].mxu0 }
0x1726   : > { %v3673_v11 = vadd.f32 %v8540_v6, %v3672_v10  ;;  %v7201_v13 = vpop.f32.mrb[31].mxu0  ;;  %v4111_v12 = vld [vmem:[#allocation5 + $0x120] sm:$0xff] }
0x1727   : > { %v3511_v14 = vsel %vm355_vm2, %v3508_v9, -inf }
0x1728   : > { %3512 = vmax.xlane.f32.xlu1 %v3511_v14  ;;  %v3676_v15 = vsel %vm355_vm2, %v3673_v11, -inf }
0x1729   : > { %3677 = vmax.xlane.f32.xlu0 %v3676_v15  ;;  %v3837_v20 = vpop.f32.mrb[32].mxu0 }
0x172a   : > { %v3838_v16 = vadd.f32 %v8540_v6, %v3837_v20  ;;  %v7211_v17 = vpop.f32.mrb[33].mxu0  ;;  %v6619_v20 = vld [vmem:[#allocation5 + $0x2c8] ss:$0 sm:$0xff] }
0x172c   : > { %v3841_v18 = vsel %vm355_vm2, %v3838_v16, -inf }
0x172d   : > { %3842 = vmax.xlane.f32.xlu0 %v3841_v18  ;;  %v4002_v19 = vpop.f32.mrb[34].mxu0 }
0x172e   : > { %v4003_v21 = vadd.f32 %v8540_v6, %v4002_v19  ;;  %v7221_v22 = vpop.f32.mrb[35].mxu0 }
0x1730   : > { %v4006_v43 = vsel %vm355_vm2, %v4003_v21, -inf }
0x1731   : > { %4007 = vmax.xlane.f32.xlu1 %v4006_v43 }
0x1742   : > { %3687 = vrot.lane.b32.xlu1 %v8500_v56, %s7948_s25 }
0x17b5   : > { %v3513_v23 = vpop.xlane.xlu1 %3512 }
0x17b6   : > { %v3514_v24 = vsub.f32 %v3508_v9, %v3513_v23  ;;  %v3678_v25 = vpop.xlane.xlu0 %3677  ;;  %v4110_v9 = vld [vmem:[#allocation5 + $0x118] sm:$0xff] }
0x17b7   : > { %v3679_v26 = vsub.f32 %v3673_v11, %v3678_v25  ;;  %v7521_v10 = vpack.c.bf16 %v4111_v12, %v4110_v9 }
0x17b8   : > { %v3515_v27 = vmul.f32 1.442695, %v3514_v24 }
0x17b9   : > { %v3680_v28 = vmul.f32 1.442695, %v3679_v26  ;;  %7522 = vmatpush3.bf16.msra.mxu0 %v7521_v10 }
0x17ba   : > { %7742 = vpow2.f32 %v3515_v27  ;;  %v3843_v40 = vpop.xlane.xlu0 %3842  ;;  %7529 = vmatprep.subr.bf16.mxu0 %v7938_v0 }
0x17bb   : > { %7744 = vpow2.f32 %v3680_v28  ;;  %v3844_v41 = vsub.f32 %v3838_v16, %v3843_v40  ;;  %v3326_v16 = vadd.f32 %v6619_v20, %v8537_v3  ;;  %v6637_v3 = vld [vmem:[#allocation5 + $0x128] ss:$0 sm:$0xff] }
0x17bd   : > { %v3845_v42 = vmul.f32 1.442695, %v3844_v41  ;;  %v3329_v17 = vadd.f32 %v3326_v16, %v8484_v45  ;;  %v4216_v41 = vld [vmem:[#allocation5 + $0x130] sm:$0xff] }
0x17be   : > { %v4008_v29 = vpop.xlane.xlu1 %4007 }
0x17bf   : > { %v4009_v30 = vsub.f32 %v4003_v21, %v4008_v29  ;;  %v3330_v18 = vsel %vm272_vm1, %v3329_v17, 0.0 }
0x17c1   : > { %v4010_v31 = vmul.f32 1.442695, %v4009_v30 }
0x17c2   : > { %v3688_v47 = vpop.permute.xlu1 %3687 }
0x17c3   : > { %7746 = vpow2.f32 %v4010_v31 }
0x17c4   : > { %v7743_v32 = vpop.eup %7742  ;;  %7748 = vpow2.f32 %v3845_v42  ;;  %v4217_v42 = vld [vmem:[#allocation5 + $0x138] sm:$0xff] }
0x17c5   : > { %v7745_v34 = vpop.eup %7744  ;;  %v3517_v35 = vsel %vm355_vm2, %v7743_v32, 0.0 }
0x17c6   : > { %3518 = vadd.xlane.f32.xlu0 %v3517_v35  ;;  %v3682_v36 = vsel %vm355_vm2, %v7745_v34, 0.0 }
0x17c7   : > { %3683 = vadd.xlane.f32.xlu1 %v3682_v36 }
0x17cd   : > { %v7747_v38 = vpop.eup %7746 }
0x17ce   : > { %v4012_v39 = vsel %vm355_vm2, %v7747_v38, 0.0  ;;  %v7749_v44 = vpop.eup %7748 }
0x17cf   : > { %4013 = vadd.xlane.f32.xlu1 %v4012_v39  ;;  %v3847_v46 = vsel %vm355_vm2, %v7749_v44, 0.0 }
0x17dc   : > { %3522 = vrot.lane.b32.xlu0 %v8500_v56, %s7949_s14 }
0x17e0   : > { %3852 = vrot.lane.b32.xlu1 %v8500_v56, %s7950_s5 }
0x17fb   : > { %3848 = vadd.xlane.f32.xlu0 %v3847_v46  ;;  %v4219_v46 = vld [vmem:[#allocation5 + $0x148] sm:$0xff] }
0x1811   : > { %4017 = vrot.lane.b32.xlu0 %v8500_v56, %s8901_s9 }
0x1853   : > { %v3519_v48 = vpop.xlane.xlu0 %3518 }
0x1854   : > { %7750 = vrcp.f32 %v3519_v48  ;;  %v3684_v49 = vpop.xlane.xlu1 %3683  ;;  %v4299_v48 = vld [vmem:[#allocation5 + $0x158] sm:$0xff] }
0x1855   : > { %7752 = vrcp.f32 %v3684_v49  ;;  %v4300_v49 = vld [vmem:[#allocation5 + $0x160] sm:$0xff] }
0x1857   : > { %v3523_v8 = vpop.permute.xlu0 %3522 }
0x1858   : > { %7193 = vmatpush3.msra.mxu1 %v3523_v8  ;;  %v4301_v8 = vld [vmem:[#allocation5 + $0x168] sm:$0xff] }
0x1859   : > { %7202 = vmatprep.subr.mxu1 %v7940_v1 }
0x185c   : > { %v4014_v52 = vpop.xlane.xlu1 %4013 }
0x185e   : > { %v7751_v50 = vpop.eup %7750 }
0x185f   : > { %v3521_v51 = vmul.f32 %v7751_v50, %v7743_v32  ;;  %v7753_v33 = vpop.eup %7752  ;;  %v7530_v50 = vpack.c.bf16 %v4300_v49, %v4299_v48 }
0x1860   : > { %v3686_v53 = vmul.f32 %v7753_v33, %v7745_v34  ;;  %v3853_v7 = vpop.permute.xlu1 %3852  ;;  %v4303_v33 = vld [vmem:[#allocation5 + $0x178] sm:$0xff] }
0x1861   : > { %7195 = vmatmul.mubr.msk.f32.vlgmr.msra.gmra.mrb[44].mxu1 %vm355_vm2, %v3521_v51  ;;  %v4302_v51 = vld [vmem:[#allocation5 + $0x170] sm:$0xff] }
0x1862   : > { %7203 = vmatpush3.msra.mxu1 %v3688_v47  ;;  %7204 = vmatprep.mubr.msk.f32.mxu1 %vm7939_vm0, %v7940_v1 }
0x1863   : > { %7212 = vmatprep.subr.mxu1 %v7940_v1 }
0x1865   : > { %7205 = vmatmul.mubr.msk.f32.vlgmr.msra.gmra.mrb[46].mxu1 %vm355_vm2, %v3686_v53  ;;  %v4304_v53 = vld [vmem:[#allocation5 + $0x180] sm:$0xff] }
0x1866   : > { %7213 = vmatpush3.msra.mxu1 %v3853_v7  ;;  %7214 = vmatprep.mubr.msk.f32.mxu1 %vm7939_vm0, %v7940_v1  ;;  %v7536_v7 = vpack.c.bf16 %v4304_v53, %v4303_v33 }
0x1867   : > { %7222 = vmatprep.subr.mxu1 %v7940_v1 }
0x1888   : > { %v3849_v54 = vpop.xlane.xlu0 %3848 }
0x1889   : > { %7754 = vrcp.f32 %v3849_v54 }
0x188a   : > { %7756 = vrcp.f32 %v4014_v52  ;;  %v7533_v52 = vpack.c.bf16 %v4302_v51, %v4301_v8 }
0x188c   : > { %v4018_v58 = vpop.permute.xlu0 %4017 }
0x1893   : > { %v7755_v55 = vpop.eup %7754 }
0x1894   : > { %v3851_v56 = vmul.f32 %v7755_v55, %v7749_v44  ;;  %v7757_v57 = vpop.eup %7756  ;;  %v4218_v44 = vld [vmem:[#allocation5 + $0x140] sm:$0xff] }
0x1895   : > { %v4016_v59 = vmul.f32 %v7757_v57, %v7747_v38  ;;  %v7527_v47 = vpack.c.bf16 %v4219_v46, %v4218_v44 }
0x1896   : > { %7215 = vmatmul.mubr.msk.f32.vlgmr.msra.gmra.mrb[48].mxu1 %vm355_vm2, %v3851_v56 }
0x1897   : > { %7223 = vmatpush3.msra.mxu1 %v4018_v58  ;;  %7224 = vmatprep.mubr.msk.f32.mxu1 %vm7939_vm0, %v7940_v1 }
0x1898   : > { %7523 = vmatprep.subr.bf16.mxu1 %v7938_v0 }
0x189a   : > { %7225 = vmatmul.mubr.msk.f32.vlgmr.msra.gmra.mrb[50].mxu1 %vm355_vm2, %v4016_v59 }
0x189b   : > { %7246 = vmatprep.mubr.msk.f32.mxu1 %vm7939_vm0, %v7940_v1 }
0x1934   : > { %v3594_v63 = vpop.f32.mrb[44].mxu1 }
0x1935   : > { %v7196_v2 = vpop.f32.mrb[45].mxu1 }
0x1936   : > { %v4412_v2 = vld [vmem:[#allocation5 + $0x308] sm:$0xff] }
0x1938   : > { %v3759_v4 = vpop.f32.mrb[46].mxu1 }
0x1939   : > { %4094 = vrot.lane.b32.xlu1 %v3759_v4, %s7952_s26  ;;  %v7206_v5 = vpop.f32.mrb[47].mxu1  ;;  %v6640_v4 = vld [vmem:[#allocation5 + $0x1a8] ss:$0 sm:$0xff] }
0x1969   : > { %v3924_v11 = vpop.f32.mrb[48].mxu1 }
0x196a   : > { %4098 = vrot.lane.b32.xlu0 %v3924_v11, %s7953_s20  ;;  %v7216_v13 = vpop.f32.mrb[49].mxu1 }
0x196b   : > { %v4413_v13 = vld [vmem:[#allocation5 + $0x310] sm:$0xff] }
0x196d   : > { %v4089_v14 = vpop.f32.mrb[50].mxu1 }
0x196e   : > { %4102 = vrot.lane.b32.xlu1 %v4089_v14, %s7954_s7  ;;  %v7226_v15 = vpop.f32.mrb[51].mxu1  ;;  %v4414_v14 = vld [vmem:[#allocation5 + $0x318] sm:$0xff] }
0x196f   : > { %v6621_v15 = vld [vmem:[#allocation5 + $0x2f0] ss:$0 sm:$0xff]  ;;  %v7545_v20 = vpack.c.bf16 %v4414_v14, %v4413_v13 }
0x1992   : > { %3331 = vadd.xlane.f32.xlu1 %v3330_v18 }
0x19ab   : > { %v4095_v19 = vpop.permute.xlu1 %4094 }
0x19ac   : > { %v4105_v22 = vsel %vm355_vm2, %v3594_v63, %v4095_v19  ;;  %v4411_v63 = vld [vmem:[#allocation5 + $0x300] sm:$0xff]  ;;  %v4305_v19 = vld [vmem:[#allocation5 + $0x188] sm:$0xff] }
0x19ad   : > { %v7542_v12 = vpack.c.bf16 %v4412_v2, %v4411_v63 }
0x19dc   : > { %v4099_v21 = vpop.permute.xlu0 %4098 }
0x19dd   : > { %v4106_v43 = vsel %vm1025_vm3, %v4105_v22, %v4099_v21  ;;  %v4306_v21 = vld [vmem:[#allocation5 + $0x190] sm:$0xff] }
0x19de   : > { %v7539_v22 = vpack.c.bf16 %v4306_v21, %v4305_v19 }
0x19e0   : > { %v4103_v23 = vpop.permute.xlu1 %4102 }
0x19e1   : > { %v4107_v24 = vsel %vm1027_vm4, %v4106_v43, %v4103_v23  ;;  %v6641_v43 = vld [vmem:[#allocation5 + $0x150] ss:$0 sm:$0xff] }
0x19e2   : > { %7236 = vmatmul.mubr.msk.f32.vlgmr.msra.gmra.mrb[36].mxu0 %vm272_vm1, %v4107_v24 }
0x19e3   : > { %7265 = vmatprep.mubr.msk.f32.mxu0 %vm7939_vm0, %v7940_v1  ;;  %7531 = vmatpush3.bf16.msra.mxu0 %v7530_v50 }
0x19e4   : > { %7532 = vmatprep.subr.bf16.mxu0 %v7938_v0 }
0x19e7   : > { %7534 = vmatpush3.bf16.msra.mxu0 %v7533_v52 }
0x19e8   : > { %7535 = vmatprep.subr.bf16.mxu0 %v7938_v0 }
0x19eb   : > { %7537 = vmatpush3.bf16.msra.mxu0 %v7536_v7 }
0x19ec   : > { %7538 = vmatprep.subr.bf16.mxu0 %v7938_v0 }
0x19ef   : > { %7540 = vmatpush3.bf16.msra.mxu0 %v7539_v22 }
0x19f0   : > { %7289 = vmatprep.subr.mxu0 %v7940_v1 }
0x1a1f   : > { %v3332_v29 = vpop.xlane.xlu1 %3331 }
0x1a20   : > { %v3333_v30 = vmul.f32 0.03125, %v3332_v29 }
0x1a22   : > { %v3334_v34 = vsub.f32 %v3329_v17, %v3333_v30  ;;  %v6622_v17 = vld [vmem:[#allocation5 + $0x2f8] ss:$0 sm:$0xff] }
0x1a24   : > { %v3335_v39 = vmul.f32 %v3334_v34, %v3334_v34 }
0x1a26   : > { %v3336_v40 = vsel %vm272_vm1, %v3335_v39, 0.0 }
0x1ab5   : > { %v4186_v25 = vpop.f32.mrb[36].mxu0 }
0x1ab6   : > { %v4187_v45 = vadd.f32 %v6637_v3, %v4186_v25  ;;  %v7237_v26 = vpop.f32.mrb[37].mxu0 }
0x1ab8   : > { %v4190_v27 = vadd.f32 %v4187_v45, %v8384_v37  ;;  %v7524_v37 = vpack.c.bf16 %v4217_v42, %v4216_v41  ;;  %v6647_v45 = vld [vmem:[#allocation5 + $0x320] ss:$0 sm:$0xff] }
0x1ab9   : > { %v7803_v41 = vld [vmem:[%s8325_s12] ss:$0 sm:$0xff]  ;;  %s8904_s12 = sshll.u32 %s8127_s11, 4 }
0x1aba   : > { %v4191_v28 = vsel %vm272_vm1, %v4190_v27, 0.0  ;;  %7525 = vmatpush3.bf16.msra.mxu1 %v7524_v37  ;;  %s8710_s8 = scalar_lea.vmem [#allocation7], %s8904_s12 }
0x1abb   : > { %4192 = vadd.xlane.f32.xlu0 %v4191_v28  ;;  %7526 = vmatprep.subr.bf16.mxu1 %v7938_v0 }
0x1abe   : > { %7528 = vmatpush3.bf16.msra.mxu1 %v7527_v47 }
0x1abf   : > { %7541 = vmatprep.subr.bf16.mxu1 %v7938_v0 }
0x1b48   : > { %v4193_v31 = vpop.xlane.xlu0 %4192 }
0x1b49   : > { %v4194_v32 = vmul.f32 0.03125, %v4193_v31 }
0x1b4b   : > { %v4195_v35 = vsub.f32 %v4190_v27, %v4194_v32 }
0x1b4d   : > { %v4196_v36 = vmul.f32 %v4195_v35, %v4195_v35 }
0x1b4f   : > { %v4197_v38 = vsel %vm272_vm1, %v4196_v36, 0.0 }
0x1b50   : > { %4198 = vadd.xlane.f32.xlu0 %v4197_v38 }
0x1b54   : > { %3337 = vadd.xlane.f32.xlu0 %v3336_v40 }
0x1bdd   : > { %v4199_v54 = vpop.xlane.xlu0 %4198 }
0x1bde   : > { %v4200_v55 = vmul.f32 0.03125, %v4199_v54 }
0x1be0   : > { %v4201_v56 = vadd.f32 1e-06, %v4200_v55 }
0x1be1   : > { %v3338_v57 = vpop.xlane.xlu0 %3337 }
0x1be2   : > { %7758 = vrsqrt.f32 %v4201_v56  ;;  %v3339_v58 = vmul.f32 0.03125, %v3338_v57 }
0x1be4   : > { %v3340_v59 = vadd.f32 1e-06, %v3339_v58 }
0x1be6   : > { %7760 = vrsqrt.f32 %v3340_v59 }
0x1bec   : > { %v7759_v60 = vpop.eup %7758 }
0x1bed   : > { %v4203_v62 = vmul.f32 %v7759_v60, %v4195_v35 }
0x1bef   : > { %v4209_v5 = vmul.f32 %v6639_v61, %v4203_v62 }
0x1bf0   : > { %v7761_v9 = vpop.eup %7760 }
0x1bf1   : > { %v3342_v10 = vmul.f32 %v7761_v9, %v3334_v34  ;;  %v8601_v11 = vadd.f32 %v6640_v4, %v4209_v5 }
0x1bf3   : > { %7247 = vmatmul.mubr.msk.f32.vlgmr.msra.gmra.mrb[52].mxu1 %vm272_vm1, %v8601_v11  ;;  %v3348_v16 = vmul.f32 %v6621_v15, %v3342_v10 }
0x1bf4   : > { %7543 = vmatpush3.bf16.msra.mxu1 %v7542_v12  ;;  %7276 = vmatprep.mubr.msk.f32.mxu1 %vm7939_vm0, %v7940_v1 }
0x1bf5   : > { %7544 = vmatprep.subr.bf16.mxu1 %v7938_v0  ;;  %v8608_v18 = vadd.f32 %v6622_v17, %v3348_v16 }
0x1bf8   : > { %7546 = vmatpush3.bf16.msra.mxu1 %v7545_v20 }
0x1bf9   : > { %7279 = vmatprep.subr.mxu1 %v7940_v1 }
0x1bfb   : > { %7277 = vmatmul.mubr.msk.f32.vlgmr.msra.gmra.mrb[54].mxu1 %vm272_vm1, %v8608_v18 }
0x1bfc   : > { %7281 = vmatprep.mubr.msk.f32.mxu1 %vm7939_vm0, %v7940_v1 }
0x1cc6   : > { %v4294_v23 = vpop.f32.mrb[52].mxu1 }
0x1cc7   : > { %v4295_v24 = vadd.f32 %v6641_v43, %v4294_v23  ;;  %v7248_v3 = vpop.f32.mrb[53].mxu1 }
0x1cc9   : > { %v4298_v25 = vmax.f32 %v4295_v24, 0.0 }
0x1ccb   : > { %7266 = vmatmul.mubr.msk.f32.vlgmr.msra.gmra.mrb[38].mxu0 %vm1234_vm5, %v4298_v25 }
0x1ccc   : > { %7291 = vmatprep.mubr.msk.f32.mxu0 %vm7939_vm0, %v7940_v1 }
0x1cce   : > { %v4489_v26 = vpop.f32.mrb[54].mxu1 }
0x1ccf   : > { %v8619_v27 = vadd.f32 %v6647_v45, %v4489_v26  ;;  %v7278_v28 = vpop.f32.mrb[55].mxu1 }
0x1cd1   : > { %4659 = vrot.lane.b32.xlu0 %v8619_v27, %s7944_s13  ;;  %4494 = vrot.lane.b32.xlu1 %v8619_v27, %s7942_s23 }
0x1cd5   : > { %4822 = vrot.lane.b32.xlu0 %v8619_v27, %s7946_s28  ;;  %4657 = vrot.lane.b32.xlu1 %v8619_v27, %s7941_s21 }
0x1cd9   : > { %4987 = vrot.lane.b32.xlu0 %v8619_v27, %s7947_s10  ;;  %4824 = vrot.lane.b32.xlu1 %v8619_v27, %s8902_s6 }
0x1cdd   : > { %4989 = vrot.lane.b32.xlu1 %v8619_v27, %s8903_s29 }
0x1d43   : > { %v4660_v29 = vpop.permute.xlu0 %4659  ;;  %v4495_v30 = vpop.permute.xlu1 %4494 }
0x1d44   : > { %7280 = vmatpush3.xpose.msk.msra.mxu1 %vm355_vm2, %v4495_v30  ;;  %7290 = vmatpush3.xpose.msk.msra.mxu0 %vm355_vm2, %v4660_v29 }
0x1d45   : > { %7299 = vmatprep.subr.mxu0 %v7940_v1  ;;  %7284 = vmatprep.subr.mxu1 %v7940_v1 }
0x1d47   : > { %7282 = vmatmul.mubr.msk.f32.vlgmr.msra.gmra.mrb[56].mxu1 %vm355_vm2, %v8619_v27  ;;  %v4658_v31 = vpop.permute.xlu1 %4657  ;;  %v4823_v34 = vpop.permute.xlu0 %4822 }
0x1d48   : > { %7292 = vmatmul.mubr.msk.f32.vlgmr.msra.gmra.mrb[40].mxu0 %vm355_vm2, %v4658_v31  ;;  %7286 = vmatprep.mubr.msk.f32.mxu1 %vm7939_vm0, %v7940_v1 }
0x1d49   : > { %7301 = vmatprep.mubr.msk.f32.mxu0 %vm7939_vm0, %v7940_v1 }
0x1d4b   : > { %v4825_v32 = vpop.permute.xlu1 %4824  ;;  %v4988_v36 = vpop.permute.xlu0 %4987 }
0x1d4c   : > { %7300 = vmatpush3.xpose.msk.msra.mxu0 %vm355_vm2, %v4825_v32  ;;  %v5167_v32 = vld [vmem:[#allocation5 + $0x328] sm:$0xff] }
0x1d4d   : > { %7309 = vmatprep.subr.mxu0 %v7940_v1 }
0x1d4f   : > { %7302 = vmatmul.mubr.msk.f32.vlgmr.msra.gmra.mrb[42].mxu0 %vm355_vm2, %v4823_v34  ;;  %v4990_v35 = vpop.permute.xlu1 %4989  ;;  %v5168_v34 = vld [vmem:[#allocation5 + $0x330] sm:$0xff] }
0x1d50   : > { %7310 = vmatpush3.xpose.msk.msra.mxu0 %vm355_vm2, %v4990_v35  ;;  %7311 = vmatprep.mubr.msk.f32.mxu0 %vm7939_vm0, %v7940_v1  ;;  %v7548_v35 = vpack.c.bf16 %v5168_v34, %v5167_v32  ;;  %v6665_v32 = vld [vmem:[#allocation5 + $0x370] ss:$0 sm:$0xff] }
0x1d51   : > { %7547 = vmatprep.subr.bf16.mxu0 %v7938_v0 }
0x1d53   : > { %7312 = vmatmul.mubr.msk.f32.vlgmr.msra.gmra.mrb[44].mxu0 %vm355_vm2, %v4988_v36 }
0x1d54   : > { %7327 = vmatprep.mubr.msk.f32.mxu0 %vm7939_vm0, %v7940_v1  ;;  %7549 = vmatpush3.bf16.msra.mxu0 %v7548_v35 }
0x1d55   : > { %7550 = vmatprep.subr.bf16.mxu0 %v7938_v0 }
0x1d9e   : > { %v8656_v38 = vpop.f32.mrb[38].mxu0 }
0x1d9f   : > { %v7267_v39 = vpop.f32.mrb[39].mxu0 }
0x1e1a   : > { %v4566_v40 = vpop.f32.mrb[56].mxu1 }
0x1e1b   : > { %v4567_v42 = vadd.f32 %v7803_v41, %v4566_v40  ;;  %v7283_v37 = vpop.f32.mrb[57].mxu1  ;;  %v4731_v44 = vpop.f32.mrb[40].mxu0 }
0x1e1c   : > { %v4732_v46 = vadd.f32 %v7803_v41, %v4731_v44  ;;  %v7293_v47 = vpop.f32.mrb[41].mxu0  ;;  %v5170_v37 = vld [vmem:[#allocation5 + $0x340] sm:$0xff] }
0x1e1d   : > { %v4570_v48 = vsel %vm355_vm2, %v4567_v42, -inf }
0x1e1e   : > { %4571 = vmax.xlane.f32.xlu1 %v4570_v48  ;;  %v4735_v49 = vsel %vm355_vm2, %v4732_v46, -inf }
0x1e1f   : > { %4736 = vmax.xlane.f32.xlu0 %v4735_v49 }
0x1e22   : > { %v4896_v8 = vpop.f32.mrb[42].mxu0 }
0x1e23   : > { %v4897_v50 = vadd.f32 %v7803_v41, %v4896_v8  ;;  %v7303_v51 = vpop.f32.mrb[43].mxu0  ;;  %v6643_v8 = vld [vmem:[#allocation5 + $0x198] ss:$0 sm:$0xff] }
0x1e25   : > { %v4900_v52 = vsel %vm355_vm2, %v4897_v50, -inf }
0x1e26   : > { %4901 = vmax.xlane.f32.xlu0 %v4900_v52  ;;  %v5061_v33 = vpop.f32.mrb[44].mxu0 }
0x1e27   : > { %v5062_v53 = vadd.f32 %v7803_v41, %v5061_v33  ;;  %v7313_v7 = vpop.f32.mrb[45].mxu0 }
0x1e29   : > { %v5065_v54 = vsel %vm355_vm2, %v5062_v53, -inf }
0x1e2a   : > { %5066 = vmax.xlane.f32.xlu1 %v5065_v54 }
0x1e3b   : > { %4746 = vrot.lane.b32.xlu1 %v8619_v27, %s7948_s25 }
0x1eab   : > { %v4572_v55 = vpop.xlane.xlu1 %4571 }
0x1eac   : > { %v4573_v56 = vsub.f32 %v4567_v42, %v4572_v55  ;;  %v4737_v57 = vpop.xlane.xlu0 %4736  ;;  %v5169_v42 = vld [vmem:[#allocation5 + $0x338] sm:$0xff] }
0x1ead   : > { %v4738_v58 = vsub.f32 %v4732_v46, %v4737_v57  ;;  %v7551_v44 = vpack.c.bf16 %v5170_v37, %v5169_v42 }
0x1eae   : > { %v4574_v59 = vmul.f32 1.442695, %v4573_v56 }
0x1eaf   : > { %v4739_v60 = vmul.f32 1.442695, %v4738_v58  ;;  %7552 = vmatpush3.bf16.msra.mxu0 %v7551_v44  ;;  %v6663_v44 = vld [vmem:[#allocation5 + $0x410] ss:$0 sm:$0xff] }
0x1eb0   : > { %7762 = vpow2.f32 %v4574_v59  ;;  %7559 = vmatprep.subr.bf16.mxu0 %v7938_v0 }
0x1eb1   : > { %7764 = vpow2.f32 %v4739_v60 }
0x1eb3   : > { %v4902_v13 = vpop.xlane.xlu0 %4901 }
0x1eb4   : > { %v4903_v14 = vsub.f32 %v4897_v50, %v4902_v13  ;;  %v4382_v50 = vadd.f32 %v6643_v8, %v8656_v38  ;;  %v6645_v13 = vld [vmem:[#allocation5 + $0x1b0] ss:$0 sm:$0xff] }
0x1eb6   : > { %v4904_v15 = vmul.f32 1.442695, %v4903_v14  ;;  %v4385_v51 = vadd.f32 %v4382_v50, %v8601_v11 }
0x1eb7   : > { %v5067_v61 = vpop.xlane.xlu1 %5066 }
0x1eb8   : > { %v5068_v62 = vsub.f32 %v5062_v53, %v5067_v61  ;;  %v4386_v52 = vsel %vm272_vm1, %v4385_v51, 0.0 }
0x1eba   : > { %v7763_v63 = vpop.eup %7762  ;;  %v5069_v2 = vmul.f32 1.442695, %v5068_v62 }
0x1ebb   : > { %v7765_v4 = vpop.eup %7764  ;;  %v4576_v5 = vsel %vm355_vm2, %v7763_v63, 0.0  ;;  %v4747_v17 = vpop.permute.xlu1 %4746 }
0x1ebc   : > { %7766 = vpow2.f32 %v5069_v2  ;;  %4577 = vadd.xlane.f32.xlu0 %v4576_v5  ;;  %v4741_v9 = vsel %vm355_vm2, %v7765_v4, 0.0 }
0x1ebd   : > { %4742 = vadd.xlane.f32.xlu1 %v4741_v9  ;;  %7768 = vpow2.f32 %v4904_v15  ;;  %v6646_v15 = vld [vmem:[#allocation5 + $0x1b8] ss:$0 sm:$0xff] }
0x1ec6   : > { %v7767_v12 = vpop.eup %7766 }
0x1ec7   : > { %v5071_v10 = vsel %vm355_vm2, %v7767_v12, 0.0  ;;  %v7769_v20 = vpop.eup %7768 }
0x1ec8   : > { %5072 = vadd.xlane.f32.xlu1 %v5071_v10  ;;  %v4906_v16 = vsel %vm355_vm2, %v7769_v20, 0.0 }
0x1ed2   : > { %4581 = vrot.lane.b32.xlu0 %v8619_v27, %s7949_s14 }
0x1ed9   : > { %4911 = vrot.lane.b32.xlu1 %v8619_v27, %s7950_s5 }
0x1ef1   : > { %4907 = vadd.xlane.f32.xlu0 %v4906_v16 }
0x1f07   : > { %5076 = vrot.lane.b32.xlu0 %v8619_v27, %s8901_s9 }
0x1f49   : > { %v4578_v19 = vpop.xlane.xlu0 %4577 }
0x1f4a   : > { %7770 = vrcp.f32 %v4578_v19  ;;  %v4743_v21 = vpop.xlane.xlu1 %4742  ;;  %v5276_v19 = vld [vmem:[#allocation5 + $0x358] sm:$0xff] }
0x1f4b   : > { %7772 = vrcp.f32 %v4743_v21 }
0x1f4d   : > { %v4582_v22 = vpop.permute.xlu0 %4581 }
0x1f4e   : > { %7285 = vmatpush3.msra.mxu1 %v4582_v22 }
0x1f4f   : > { %7294 = vmatprep.subr.mxu1 %v7940_v1 }
0x1f54   : > { %v7771_v43 = vpop.eup %7770 }
0x1f55   : > { %v4580_v23 = vmul.f32 %v7771_v43, %v7763_v63  ;;  %v5073_v24 = vpop.xlane.xlu1 %5072  ;;  %v7773_v3 = vpop.eup %7772  ;;  %v6661_v63 = vld [vmem:[#allocation5 + $0x348] ss:$0 sm:$0xff] }
0x1f56   : > { %v4745_v25 = vmul.f32 %v7773_v3, %v7765_v4 }
0x1f57   : > { %7287 = vmatmul.mubr.msk.f32.vlgmr.msra.gmra.mrb[58].mxu1 %vm355_vm2, %v4580_v23 }
0x1f58   : > { %7295 = vmatpush3.msra.mxu1 %v4747_v17  ;;  %7296 = vmatprep.mubr.msk.f32.mxu1 %vm7939_vm0, %v7940_v1  ;;  %v5275_v17 = vld [vmem:[#allocation5 + $0x350] sm:$0xff] }
0x1f59   : > { %v4912_v45 = vpop.permute.xlu1 %4911  ;;  %7304 = vmatprep.subr.mxu1 %v7940_v1  ;;  %v7676_v21 = vpack.i.bf16 %v5276_v19, %v5275_v17 }
0x1f5b   : > { %7297 = vmatmul.mubr.msk.f32.vlgmr.msra.gmra.mrb[60].mxu1 %vm355_vm2, %v4745_v25  ;;  %v5277_v25 = vld [vmem:[#allocation5 + $0x360] sm:$0xff] }
0x1f5c   : > { %7305 = vmatpush3.msra.mxu1 %v4912_v45  ;;  %7306 = vmatprep.mubr.msk.f32.mxu1 %vm7939_vm0, %v7940_v1  ;;  %v5278_v45 = vld [vmem:[#allocation5 + $0x368] sm:$0xff] }
0x1f5d   : > { %7314 = vmatprep.subr.mxu1 %v7940_v1 }
0x1f7e   : > { %v4908_v26 = vpop.xlane.xlu0 %4907 }
0x1f7f   : > { %7774 = vrcp.f32 %v4908_v26 }
0x1f80   : > { %7776 = vrcp.f32 %v5073_v24 }
0x1f82   : > { %v5077_v30 = vpop.permute.xlu0 %5076 }
0x1f89   : > { %v7775_v27 = vpop.eup %7774 }
0x1f8a   : > { %v4910_v28 = vmul.f32 %v7775_v27, %v7769_v20  ;;  %v7777_v29 = vpop.eup %7776 }
0x1f8b   : > { %v5075_v31 = vmul.f32 %v7777_v29, %v7767_v12  ;;  %v7681_v29 = vpack.i.bf16 %v5278_v45, %v5277_v25 }
0x1f8c   : > { %7307 = vmatmul.mubr.msk.f32.vlgmr.msra.gmra.mrb[62].mxu1 %vm355_vm2, %v4910_v28 }
0x1f8d   : > { %7315 = vmatpush3.msra.mxu1 %v5077_v30  ;;  %7316 = vmatprep.mubr.msk.f32.mxu1 %vm7939_vm0, %v7940_v1  ;;  %v7554_v30 = vpack.c.bf16 %v5276_v19, %v5275_v17 }
0x1f8e   : > { %7553 = vmatprep.subr.bf16.mxu1 %v7938_v0 }
0x1f90   : > { %7317 = vmatmul.mubr.msk.f32.vlgmr.msra.gmra.mrb[64].mxu1 %vm355_vm2, %v5075_v31  ;;  %v7557_v31 = vpack.c.bf16 %v5278_v45, %v5277_v25 }
0x1f91   : > { %7338 = vmatprep.mubr.msk.f32.mxu1 %vm7939_vm0, %v7940_v1  ;;  %7555 = vmatpush3.bf16.msra.mxu1 %v7554_v30 }
0x1f92   : > { %7556 = vmatprep.subr.bf16.mxu1 %v7938_v0 }
0x1f95   : > { %7558 = vmatpush3.bf16.msra.mxu1 %v7557_v31 }
0x1f96   : > { %7352 = vmatprep.subr.mxu1 %v7940_v1 }
0x202a   : > { %v4653_v36 = vpop.f32.mrb[58].mxu1 }
0x202b   : > { %v7288_v39 = vpop.f32.mrb[59].mxu1 }
0x202e   : > { %v4818_v40 = vpop.f32.mrb[60].mxu1 }
0x202f   : > { %5153 = vrot.lane.b32.xlu1 %v4818_v40, %s7952_s26  ;;  %v7298_v41 = vpop.f32.mrb[61].mxu1 }
0x205f   : > { %v4983_v46 = vpop.f32.mrb[62].mxu1 }
0x2060   : > { %5157 = vrot.lane.b32.xlu0 %v4983_v46, %s7953_s20  ;;  %v7308_v47 = vpop.f32.mrb[63].mxu1 }
0x2061   : > { %v6664_v47 = vld [vmem:[#allocation5 + $0x418] ss:$0 sm:$0xff] }
0x2063   : > { %v5148_v48 = vpop.f32.mrb[64].mxu1 }
0x2064   : > { %5161 = vrot.lane.b32.xlu1 %v5148_v48, %s7954_s7  ;;  %v7318_v49 = vpop.f32.mrb[65].mxu1 }
0x207f   : > { %4387 = vadd.xlane.f32.xlu0 %v4386_v52 }
0x20a1   : > { %v5154_v33 = vpop.permute.xlu1 %5153 }
0x20a2   : > { %v5164_v7 = vsel %vm355_vm2, %v4653_v36, %v5154_v33 }
0x20d2   : > { %v5158_v53 = vpop.permute.xlu0 %5157 }
0x20d3   : > { %v5165_v54 = vsel %vm1025_vm3, %v5164_v7, %v5158_v53 }
0x20d6   : > { %v5162_v55 = vpop.permute.xlu1 %5161 }
0x20d7   : > { %v5166_v56 = vsel %vm1027_vm4, %v5165_v54, %v5162_v55 }
0x20d8   : > { %7328 = vmatmul.mubr.msk.f32.vlgmr.msra.gmra.mrb[46].mxu0 %vm272_vm1, %v5166_v56 }
0x20d9   : > { %7349 = vmatprep.mubr.msk.f32.mxu0 %vm7939_vm0, %v7940_v1 }
0x210c   : > { %v4388_v38 = vpop.xlane.xlu0 %4387 }
0x210d   : > { %v4389_v57 = vmul.f32 0.03125, %v4388_v38 }
0x210f   : > { %v4390_v11 = vsub.f32 %v4385_v51, %v4389_v57 }
0x2111   : > { %v4391_v58 = vmul.f32 %v4390_v11, %v4390_v11 }
0x2113   : > { %v4392_v59 = vsel %vm272_vm1, %v4391_v58, 0.0 }
0x2114   : > { %4393 = vadd.xlane.f32.xlu0 %v4392_v59 }
0x21a1   : > { %v4394_v60 = vpop.xlane.xlu0 %4393 }
0x21a2   : > { %v4395_v61 = vmul.f32 0.03125, %v4394_v60 }
0x21a4   : > { %v4396_v62 = vadd.f32 1e-06, %v4395_v61 }
0x21a6   : > { %7778 = vrsqrt.f32 %v4396_v62 }
0x21ab   : > { %v5245_v2 = vpop.f32.mrb[46].mxu0 }
0x21ac   : > { %v5246_v4 = vadd.f32 %v6661_v63, %v5245_v2  ;;  %v7329_v5 = vpop.f32.mrb[47].mxu0 }
0x21ae   : > { %v5249_v9 = vadd.f32 %v5246_v4, %v8608_v18 }
0x21b0   : > { %v7779_v12 = vpop.eup %7778  ;;  %v5250_v10 = vsel %vm272_vm1, %v5249_v9, 0.0 }
0x21b1   : > { %v4398_v14 = vmul.f32 %v7779_v12, %v4390_v11  ;;  %5251 = vadd.xlane.f32.xlu1 %v5250_v10 }
0x21b3   : > { %v4404_v20 = vmul.f32 %v6645_v13, %v4398_v14 }
0x21b5   : > { %v4410_v16 = vadd.f32 %v6646_v15, %v4404_v20 }
0x21b7   : > { %6426 = vst.msk [vmem:[%s8710_s8] sm:$0xff] %vm272_vm1, %v4410_v16 }
0x21c2   : > { %7677 = vrot.lane.b32.xlu1 %v7676_v21, %s7942_s23 }
0x21c6   : > { %5374 = vrot.lane.b32.xlu1 %v6665_v32, %s7942_s23 }
0x223e   : > { %v5252_v18 = vpop.xlane.xlu1 %5251 }
0x223f   : > { %v5253_v22 = vmul.f32 0.03125, %v5252_v18 }
0x2241   : > { %v5254_v43 = vsub.f32 %v5249_v9, %v5253_v22 }
0x2242   : > { %v7678_v3 = vpop.permute.xlu1 %7677 }
0x2243   : > { %v5255_v23 = vmul.f32 %v5254_v43, %v5254_v43  ;;  %v7680_v26 = vunpack.i.h.bf16 %v7678_v3  ;;  %v7679_v27 = vunpack.i.l.bf16 %v7678_v3 }
0x2245   : > { %v5256_v24 = vsel %vm272_vm1, %v5255_v23, 0.0  ;;  %v7560_v28 = vpack.c.bf16 %v7680_v26, %v7679_v27 }
0x2246   : > { %5257 = vadd.xlane.f32.xlu0 %v5256_v24  ;;  %v5375_v8 = vpop.permute.xlu1 %5374 }
0x2247   : > { %7561 = vmatpush3.bf16.msra.mxu0 %v7560_v28 }
0x2248   : > { %7562 = vmatprep.subr.bf16.mxu0 %v7938_v0 }
0x225c   : > { %7682 = vrot.lane.b32.xlu0 %v7681_v29, %s7942_s23 }
0x22d3   : > { %v5258_v34 = vpop.xlane.xlu0 %5257 }
0x22d4   : > { %v5259_v35 = vmul.f32 0.03125, %v5258_v34 }
0x22d6   : > { %v5260_v36 = vadd.f32 1e-06, %v5259_v35 }
0x22d7   : > { %v7683_v39 = vpop.permute.xlu0 %7682 }
0x22d8   : > { %7780 = vrsqrt.f32 %v5260_v36  ;;  %v7685_v40 = vunpack.i.h.bf16 %v7683_v39  ;;  %v7684_v41 = vunpack.i.l.bf16 %v7683_v39 }
0x22da   : > { %v7563_v42 = vpack.c.bf16 %v7685_v40, %v7684_v41 }
0x22dc   : > { %7564 = vmatpush3.bf16.msra.mxu0 %v7563_v42 }
0x22dd   : > { %7362 = vmatprep.subr.mxu0 %v7940_v1 }
0x22df   : > { %7350 = vmatmul.mubr.msk.f32.vlgmr.msra.gmra.mrb[48].mxu0 %vm272_vm1, %v4410_v16 }
0x22e0   : > { %7364 = vmatprep.mubr.msk.f32.mxu0 %vm7939_vm0, %v7940_v1 }
0x22e2   : > { %v7781_v37 = vpop.eup %7780 }
0x22e3   : > { %v5262_v46 = vmul.f32 %v7781_v37, %v5254_v43 }
0x22e5   : > { %v5268_v48 = vmul.f32 %v6663_v44, %v5262_v46 }
0x22e7   : > { %v8725_v49 = vadd.f32 %v6664_v47, %v5268_v48 }
0x22e9   : > { %7339 = vmatmul.mubr.msk.f32.vlgmr.msra.gmra.mrb[66].mxu1 %vm272_vm1, %v8725_v49 }
0x22ea   : > { %7354 = vmatprep.mubr.msk.f32.mxu1 %vm7939_vm0, %v7940_v1 }
0x23b2   : > { %v5446_v50 = vpop.f32.mrb[48].mxu0 }
0x23b3   : > { %v8731_v51 = vadd.f32 %v5446_v50, %v5375_v8  ;;  %v7351_v52 = vpop.f32.mrb[49].mxu0 }
0x23b5   : > { %5615 = vrot.lane.b32.xlu1 %v8731_v51, %s7941_s21  ;;  %7353 = vmatpush3.xpose.msk.msra.mxu1 %vm355_vm2, %v8731_v51 }
0x23b6   : > { %7357 = vmatprep.subr.mxu1 %v7940_v1 }
0x23b9   : > { %5780 = vrot.lane.b32.xlu1 %v8731_v51, %s7946_s28 }
0x23bc   : > { %v5353_v33 = vpop.f32.mrb[66].mxu1 }
0x23bd   : > { %v5354_v53 = vadd.f32 %v6665_v32, %v5353_v33  ;;  %5945 = vrot.lane.b32.xlu1 %v8731_v51, %s7947_s10  ;;  %v7340_v7 = vpop.f32.mrb[67].mxu1 }
0x23be   : > { %v6123_v7 = vld [vmem:[#allocation5 + $0x378] sm:$0xff] }
0x23bf   : > { %5613 = vrot.lane.b32.xlu0 %v5354_v53, %s7941_s21  ;;  %7355 = vmatmul.mubr.msk.f32.vlgmr.msra.gmra.mrb[68].mxu1 %vm355_vm2, %v5354_v53  ;;  %s6442_s21 = sshll.u32 %s8710_s8, 4  ;;  %s8828_s21 = int_to_ptr.vmem [resolvable:$true] %s6442_s21 }
0x23c0   : > { %7359 = vmatprep.mubr.msk.f32.mxu1 %vm7939_vm0, %v7940_v1  ;;  %s7862_s25 = scalar_lea.vmem %s8828_s21, 256 }
0x23c1   : > { %p7863_p6 = scmp.ne.s32.totalorder %s8828_s21, %s7862_s25 }
0x23c3   : > { %5778 = vrot.lane.b32.xlu0 %v5354_v53, %s7946_s28  ;;  %p7864_p8 = pnand %p7863_p6, %p8076_p12 }
0x23c5   : > { %p7865_p10 = pneg %p7864_p8 }
0x23c7   : > { %5943 = vrot.lane.b32.xlu0 %v5354_v53, %s7947_s10  ;;  %s6429_s10 = scalar_lea.sflag [#allocation4], %s8127_s11 }
0x2427   : > { %v5616_v54 = vpop.permute.xlu1 %5615 }
0x2428   : > { %7363 = vmatpush3.xpose.msk.msra.mxu0 %vm355_vm2, %v5616_v54  ;;  %v6124_v54 = vld [vmem:[#allocation5 + $0x380] sm:$0xff] }
0x2429   : > { %7372 = vmatprep.subr.mxu0 %v7940_v1 }
0x242b   : > { %v5781_v55 = vpop.permute.xlu1 %5780 }
0x242f   : > { %v5946_v57 = vpop.permute.xlu1 %5945 }
0x2431   : > { %v5614_v56 = vpop.permute.xlu0 %5613 }
0x2432   : > { %7365 = vmatmul.mubr.msk.f32.vlgmr.msra.gmra.mrb[50].mxu0 %vm355_vm2, %v5614_v56  ;;  %v6125_v56 = vld [vmem:[#allocation5 + $0x388] sm:$0xff] }
0x2433   : > { %7373 = vmatpush3.xpose.msk.msra.mxu0 %vm355_vm2, %v5781_v55  ;;  %7374 = vmatprep.mubr.msk.f32.mxu0 %vm7939_vm0, %v7940_v1  ;;  %v7566_v55 = vpack.c.bf16 %v6124_v54, %v6123_v7 }
0x2434   : > { %7382 = vmatprep.subr.mxu0 %v7940_v1 }
0x2435   : > { %v5779_v38 = vpop.permute.xlu0 %5778 }
0x2436   : > { %7375 = vmatmul.mubr.msk.f32.vlgmr.msra.gmra.mrb[52].mxu0 %vm355_vm2, %v5779_v38  ;;  %v6126_v38 = vld [vmem:[#allocation5 + $0x390] sm:$0xff] }
0x2437   : > { %7383 = vmatpush3.xpose.msk.msra.mxu0 %vm355_vm2, %v5946_v57  ;;  %7384 = vmatprep.mubr.msk.f32.mxu0 %vm7939_vm0, %v7940_v1  ;;  %v7569_v57 = vpack.c.bf16 %v6126_v38, %v6125_v56 }
0x2438   : > { %7565 = vmatprep.subr.bf16.mxu0 %v7938_v0 }
0x2439   : > { %v5944_v11 = vpop.permute.xlu0 %5943 }
0x243a   : > { %7385 = vmatmul.mubr.msk.f32.vlgmr.msra.gmra.mrb[54].mxu0 %vm355_vm2, %v5944_v11 }
0x243b   : > { %7400 = vmatprep.mubr.msk.f32.mxu0 %vm7939_vm0, %v7940_v1  ;;  %7567 = vmatpush3.bf16.msra.mxu0 %v7566_v55 }
0x243c   : > { %7568 = vmatprep.subr.bf16.mxu0 %v7938_v0 }
0x243f   : > { %7570 = vmatpush3.bf16.msra.mxu0 %v7569_v57 }
0x2440   : > { %7577 = vmatprep.subr.bf16.mxu0 %v7938_v0 }
0x2492   : > { %v5522_v58 = vpop.f32.mrb[68].mxu1 }
0x2493   : > { %v5523_v59 = vadd.f32 %v8540_v6, %v5522_v58  ;;  %v7356_v60 = vpop.f32.mrb[69].mxu1 }
0x2495   : > { %v5526_v61 = vsel %vm355_vm2, %v5523_v59, -inf }
0x2496   : > { %5527 = vmax.xlane.f32.xlu1 %v5526_v61 }
0x2505   : > { %v5687_v62 = vpop.f32.mrb[50].mxu0 }
0x2506   : > { %v5688_v63 = vadd.f32 %v8540_v6, %v5687_v62  ;;  %v7366_v2 = vpop.f32.mrb[51].mxu0 }
0x2508   : > { %v5691_v4 = vsel %vm355_vm2, %v5688_v63, -inf }
0x2509   : > { %5692 = vmax.xlane.f32.xlu0 %v5691_v4  ;;  %v5852_v5 = vpop.f32.mrb[52].mxu0 }
0x250a   : > { %v5853_v9 = vadd.f32 %v8540_v6, %v5852_v5  ;;  %v7376_v12 = vpop.f32.mrb[53].mxu0 }
0x250c   : > { %v5856_v10 = vsel %vm355_vm2, %v5853_v9, -inf }
0x250d   : > { %5857 = vmax.xlane.f32.xlu0 %v5856_v10  ;;  %v6017_v13 = vpop.f32.mrb[54].mxu0  ;;  %v6680_v10 = vld [vmem:[#allocation5 + $0x398] ss:$0 sm:$0xff] }
0x250e   : > { %v6018_v14 = vadd.f32 %v8540_v6, %v6017_v13  ;;  %v7386_v15 = vpop.f32.mrb[55].mxu0 }
0x2510   : > { %v6021_v20 = vsel %vm355_vm2, %v6018_v14, -inf }
0x2511   : > { %6022 = vmax.xlane.f32.xlu1 %v6021_v20 }
0x2522   : > { %5702 = vrot.lane.b32.xlu1 %v8731_v51, %s7944_s13 }
0x2523   : > { %v5528_v16 = vpop.xlane.xlu1 %5527 }
0x2524   : > { %v5529_v17 = vsub.f32 %v5523_v59, %v5528_v16 }
0x2526   : > { %v5530_v19 = vmul.f32 1.442695, %v5529_v17 }
0x2528   : > { %7782 = vpow2.f32 %v5530_v19 }
0x2532   : > { %v7783_v21 = vpop.eup %7782 }
0x2533   : > { %v5532_v18 = vsel %vm355_vm2, %v7783_v21, 0.0 }
0x2534   : > { %5533 = vadd.xlane.f32.xlu0 %v5532_v18 }
0x254a   : > { %5537 = vrot.lane.b32.xlu0 %v8731_v51, %s7942_s23 }
0x2596   : > { %v5693_v22 = vpop.xlane.xlu0 %5692 }
0x2597   : > { %v5694_v6 = vsub.f32 %v5688_v63, %v5693_v22 }
0x2599   : > { %v5695_v43 = vmul.f32 1.442695, %v5694_v6  ;;  %v6231_v6 = vld [vmem:[#allocation5 + $0x3a0] sm:$0xff] }
0x259a   : > { %v5858_v23 = vpop.xlane.xlu0 %5857 }
0x259b   : > { %7784 = vpow2.f32 %v5695_v43  ;;  %v5859_v24 = vsub.f32 %v5853_v9, %v5858_v23  ;;  %v6232_v43 = vld [vmem:[#allocation5 + $0x3a8] sm:$0xff] }
0x259c   : > { %v7572_v23 = vpack.c.bf16 %v6232_v43, %v6231_v6 }
0x259d   : > { %v5860_v3 = vmul.f32 1.442695, %v5859_v24  ;;  %v6234_v24 = vld [vmem:[#allocation5 + $0x3b8] sm:$0xff] }
0x259e   : > { %v6023_v25 = vpop.xlane.xlu1 %6022 }
0x259f   : > { %7786 = vpow2.f32 %v5860_v3  ;;  %v6024_v45 = vsub.f32 %v6018_v14, %v6023_v25  ;;  %v6315_v25 = vld [vmem:[#allocation5 + $0x3d0] sm:$0xff] }
0x25a1   : > { %v6025_v26 = vmul.f32 1.442695, %v6024_v45  ;;  %v6316_v45 = vld [vmem:[#allocation5 + $0x3d8] sm:$0xff] }
0x25a2   : > { %v5703_v40 = vpop.permute.xlu1 %5702 }
0x25a3   : > { %7788 = vpow2.f32 %v6025_v26 }
0x25a5   : > { %v7785_v27 = vpop.eup %7784 }
0x25a6   : > { %v5697_v28 = vsel %vm355_vm2, %v7785_v27, 0.0 }
0x25a7   : > { %5698 = vadd.xlane.f32.xlu1 %v5697_v28 }
0x25a9   : > { %v7787_v29 = vpop.eup %7786 }
0x25aa   : > { %v5862_v30 = vsel %vm355_vm2, %v7787_v29, 0.0 }
0x25ab   : > { %5863 = vadd.xlane.f32.xlu0 %v5862_v30  ;;  %v6319_v30 = vld [vmem:[#allocation5 + $0x3f0] sm:$0xff] }
0x25ad   : > { %v7789_v31 = vpop.eup %7788 }
0x25ae   : > { %v6027_v32 = vsel %vm355_vm2, %v7789_v31, 0.0 }
0x25af   : > { %6028 = vadd.xlane.f32.xlu1 %v6027_v32 }
0x25c0   : > { %5867 = vrot.lane.b32.xlu1 %v8731_v51, %s8902_s6 }
0x25c1   : > { %6032 = vrot.lane.b32.xlu0 %v8731_v51, %s8903_s29  ;;  %v5534_v34 = vpop.xlane.xlu0 %5533 }
0x25c2   : > { %7790 = vrcp.f32 %v5534_v34 }
0x25c5   : > { %v5538_v35 = vpop.permute.xlu0 %5537 }
0x25c6   : > { %7358 = vmatpush3.msra.mxu1 %v5538_v35 }
0x25c7   : > { %7367 = vmatprep.subr.mxu1 %v7940_v1 }
0x25cc   : > { %v7791_v36 = vpop.eup %7790 }
0x25cd   : > { %v5536_v39 = vmul.f32 %v7791_v36, %v7783_v21 }
0x25cf   : > { %7360 = vmatmul.mubr.msk.f32.vlgmr.msra.gmra.mrb[70].mxu1 %vm355_vm2, %v5536_v39  ;;  %v6682_v39 = vld [vmem:[#allocation5 + $0x420] ss:$0 sm:$0xff] }
0x25d0   : > { %7368 = vmatpush3.msra.mxu1 %v5703_v40  ;;  %7369 = vmatprep.mubr.msk.f32.mxu1 %vm7939_vm0, %v7940_v1 }
0x25d1   : > { %7377 = vmatprep.subr.mxu1 %v7940_v1 }
0x2634   : > { %v5699_v41 = vpop.xlane.xlu1 %5698 }
0x2635   : > { %7792 = vrcp.f32 %v5699_v41  ;;  %v6683_v41 = vld [vmem:[#allocation5 + $0x428] ss:$0 sm:$0xff] }
0x2638   : > { %v5864_v42 = vpop.xlane.xlu0 %5863 }
0x2639   : > { %7794 = vrcp.f32 %v5864_v42 }
0x263c   : > { %v6029_v37 = vpop.xlane.xlu1 %6028  ;;  %v6033_v50 = vpop.permute.xlu0 %6032 }
0x263d   : > { %7796 = vrcp.f32 %v6029_v37 }
0x263f   : > { %v7793_v44 = vpop.eup %7792 }
0x2640   : > { %v5701_v46 = vmul.f32 %v7793_v44, %v7785_v27  ;;  %v5868_v47 = vpop.permute.xlu1 %5867  ;;  %v6317_v27 = vld [vmem:[#allocation5 + $0x3e0] sm:$0xff]  ;;  %v6320_v44 = vld [vmem:[#allocation5 + $0x3f8] sm:$0xff] }
0x2641   : > { %v7581_v28 = vpack.c.bf16 %v6317_v27, %v6316_v45 }
0x2642   : > { %7370 = vmatmul.mubr.msk.f32.vlgmr.msra.gmra.mrb[72].mxu1 %vm355_vm2, %v5701_v46  ;;  %v6321_v46 = vld [vmem:[#allocation5 + $0x400] sm:$0xff] }
0x2643   : > { %v7795_v48 = vpop.eup %7794  ;;  %7378 = vmatpush3.msra.mxu1 %v5868_v47  ;;  %7379 = vmatprep.mubr.msk.f32.mxu1 %vm7939_vm0, %v7940_v1  ;;  %v7587_v47 = vpack.c.bf16 %v6321_v46, %v6320_v44 }
0x2644   : > { %v5866_v8 = vmul.f32 %v7795_v48, %v7787_v29  ;;  %7387 = vmatprep.subr.mxu1 %v7940_v1  ;;  %v6318_v29 = vld [vmem:[#allocation5 + $0x3e8] sm:$0xff]  ;;  %v6684_v48 = vld [vmem:[#allocation5 + $0x3c0] ss:$0 sm:$0xff] }
0x2646   : > { %7380 = vmatmul.mubr.msk.f32.vlgmr.msra.gmra.mrb[74].mxu1 %vm355_vm2, %v5866_v8 }
0x2647   : > { %v7797_v51 = vpop.eup %7796  ;;  %7388 = vmatpush3.msra.mxu1 %v6033_v50  ;;  %7389 = vmatprep.mubr.msk.f32.mxu1 %vm7939_vm0, %v7940_v1 }
0x2648   : > { %v6031_v52 = vmul.f32 %v7797_v51, %v7789_v31  ;;  %7571 = vmatprep.subr.bf16.mxu1 %v7938_v0  ;;  %v7584_v31 = vpack.c.bf16 %v6319_v30, %v6318_v29 }
0x264a   : > { %7390 = vmatmul.mubr.msk.f32.vlgmr.msra.gmra.mrb[76].mxu1 %vm355_vm2, %v6031_v52  ;;  %v6686_v52 = vld [vmem:[#allocation5 + $0x408] ss:$0 sm:$0xff] }
0x264b   : > { %7411 = vmatprep.mubr.msk.f32.mxu1 %vm7939_vm0, %v7940_v1  ;;  %7573 = vmatpush3.bf16.msra.mxu1 %v7572_v23 }
0x264c   : > { %7574 = vmatprep.subr.bf16.mxu1 %v7938_v0 }
0x26a2   : > { %v5609_v33 = vpop.f32.mrb[70].mxu1 }
0x26a3   : > { %v7361_v53 = vpop.f32.mrb[71].mxu1 }
0x2715   : > { %v5774_v11 = vpop.f32.mrb[72].mxu1 }
0x2716   : > { %6109 = vrot.lane.b32.xlu1 %v5774_v11, %s7952_s26  ;;  %v7371_v58 = vpop.f32.mrb[73].mxu1 }
0x2719   : > { %v5939_v59 = vpop.f32.mrb[74].mxu1 }
0x271a   : > { %6113 = vrot.lane.b32.xlu0 %v5939_v59, %s7953_s20  ;;  %v7381_v60 = vpop.f32.mrb[75].mxu1  ;;  %s6696_s20 = sshll.u32 %s8003_s19, 8  ;;  %s7955_s19 = smov [#allocation7]  }
0x271b   : > { %s8826_s28 = scalar_lea.hbm %s8879_s4, %s6696_s20  ;;  %s7866_s14 = sshll.u32 %s7955_s19, 4  ;;  %s7867_s14 = int_to_ptr.vmem [resolvable:$false] %s7866_s14 }
0x271c   : > { %s7868_s5 = scalar_lea.vmem %s7867_s14, 512  ;;  %p7869_p13 = scmp.lt.s32.totalorder %s8828_s21, %s7867_s14 }
0x271d   : > { %v6104_v61 = vpop.f32.mrb[76].mxu1  ;;  %p7870_p3 = scmp.lt.s32.totalorder %s7868_s5, %s7862_s25 }
0x271e   : > { %6117 = vrot.lane.b32.xlu1 %v6104_v61, %s7954_s7  ;;  %v7391_v62 = vpop.f32.mrb[77].mxu1 }
0x271f   : > { %p7871_p7 = por %p7870_p3, %p7869_p13 }
0x2721   : > { %p7872_p9 = pnand %p7871_p7, %p7865_p10 }
0x2788   : > { %v6110_v63 = vpop.permute.xlu1 %6109 }
0x2789   : > { %v6120_v4 = vsel %vm355_vm2, %v5609_v33, %v6110_v63  ;;  %v6688_v63 = vld [vmem:[#allocation5 + $0x430] ss:$0 sm:$0xff] }
0x278c   : > { %v6114_v2 = vpop.permute.xlu0 %6113 }
0x278d   : > { %v6121_v5 = vsel %vm1025_vm3, %v6120_v4, %v6114_v2  ;;  %v6689_v4 = vld [vmem:[#allocation5 + $0x438] ss:$0 sm:$0xff] }
0x2790   : > { %v6118_v9 = vpop.permute.xlu1 %6117 }
0x2791   : > { %v6122_v12 = vsel %vm1027_vm4, %v6121_v5, %v6118_v9 }
0x2792   : > { %7401 = vmatmul.mubr.msk.f32.vlgmr.msra.gmra.mrb[56].mxu0 %vm272_vm1, %v6122_v12 }
0x2793   : > { %7430 = vmatprep.mubr.msk.f32.mxu0 %vm7939_vm0, %v7940_v1  ;;  %v6233_v1 = vld [vmem:[#allocation5 + $0x3b0] sm:$0xff] }
0x2794   : > { %v7575_v3 = vpack.c.bf16 %v6234_v24, %v6233_v1 }
0x2796   : > { %7576 = vmatpush3.bf16.msra.mxu1 %v7575_v3 }
0x2865   : > { %v6201_v13 = vpop.f32.mrb[56].mxu0 }
0x2866   : > { %v6202_v14 = vadd.f32 %v6680_v10, %v6201_v13  ;;  %v7402_v15 = vpop.f32.mrb[57].mxu0 }
0x2868   : > { %v6205_v20 = vadd.f32 %v6202_v14, %v8725_v49  ;;  %v6314_v49 = vld [vmem:[#allocation5 + $0x3c8] sm:$0xff] }
0x2869   : > { %v7578_v26 = vpack.c.bf16 %v6315_v25, %v6314_v49 }
0x286a   : > { %v6206_v16 = vsel %vm272_vm1, %v6205_v20, 0.0 }
0x286b   : > { %6207 = vadd.xlane.f32.xlu0 %v6206_v16  ;;  %7579 = vmatpush3.bf16.msra.mxu0 %v7578_v26 }
0x286c   : > { %7580 = vmatprep.subr.bf16.mxu0 %v7938_v0 }
0x286f   : > { %7582 = vmatpush3.bf16.msra.mxu0 %v7581_v28 }
0x2870   : > { %7583 = vmatprep.subr.bf16.mxu0 %v7938_v0 }
0x2873   : > { %7585 = vmatpush3.bf16.msra.mxu0 %v7584_v31 }
0x2874   : > { %7586 = vmatprep.subr.bf16.mxu0 %v7938_v0 }
0x2877   : > { %7588 = vmatpush3.bf16.msra.mxu0 %v7587_v47 }
0x28f8   : > { %v6208_v17 = vpop.xlane.xlu0 %6207 }
0x28f9   : > { %v6209_v19 = vmul.f32 0.03125, %v6208_v17 }
0x28fb   : > { %v6210_v21 = vsub.f32 %v6205_v20, %v6209_v19 }
0x28fd   : > { %v6211_v18 = vmul.f32 %v6210_v21, %v6210_v21 }
0x28ff   : > { %v6212_v22 = vsel %vm272_vm1, %v6211_v18, 0.0 }
0x2900   : > { %6213 = vadd.xlane.f32.xlu1 %v6212_v22 }
0x298d   : > { %v6214_v32 = vpop.xlane.xlu1 %6213 }
0x298e   : > { %v6215_v34 = vmul.f32 0.03125, %v6214_v32 }
0x2990   : > { %v6216_v35 = vadd.f32 1e-06, %v6215_v34 }
0x2992   : > { %7798 = vrsqrt.f32 %v6216_v35 }
0x299c   : > { %v7799_v36 = vpop.eup %7798 }
0x299d   : > { %v6218_v40 = vmul.f32 %v7799_v36, %v6210_v21 }
0x299f   : > { %v6224_v42 = vmul.f32 %v6682_v39, %v6218_v40 }
0x29a1   : > { %v6230_v37 = vadd.f32 %v6683_v41, %v6224_v42 }
0x29a3   : > { %7412 = vmatmul.mubr.msk.f32.vlgmr.msra.gmra.mrb[78].mxu1 %vm272_vm1, %v6230_v37 }
0x2a76   : > { %v6309_v8 = vpop.f32.mrb[78].mxu1 }
0x2a77   : > { %v6310_v50 = vadd.f32 %v6684_v48, %v6309_v8  ;;  %v7413_v0 = vpop.f32.mrb[79].mxu1 }
0x2a79   : > { %v6313_v51 = vmax.f32 %v6310_v50, 0.0 }
0x2a7b   : > { %7431 = vmatmul.mubr.msk.f32.vlgmr.msra.gmra.mrb[58].mxu0 %vm1234_vm5, %v6313_v51 }
0x2b4e   : > { %v6396_v33 = vpop.f32.mrb[58].mxu0 }
0x2b4f   : > { %v6397_v53 = vadd.f32 %v6686_v52, %v6396_v33  ;;  %v7432_v7 = vpop.f32.mrb[59].mxu0 }
0x2b51   : > { %v6400_v54 = vadd.f32 %v6397_v53, %v6230_v37 }
0x2b53   : > { %v6401_v55 = vsel %vm272_vm1, %v6400_v54, 0.0 }
0x2b54   : > { %6402 = vadd.xlane.f32.xlu0 %v6401_v55 }
0x2be1   : > { %v6403_v56 = vpop.xlane.xlu0 %6402 }
0x2be2   : > { %v6404_v38 = vmul.f32 0.03125, %v6403_v56 }
0x2be4   : > { %v6405_v57 = vsub.f32 %v6400_v54, %v6404_v38 }
0x2be6   : > { %v6406_v11 = vmul.f32 %v6405_v57, %v6405_v57 }
0x2be8   : > { %v6407_v58 = vsel %vm272_vm1, %v6406_v11, 0.0 }
0x2be9   : > { %6408 = vadd.xlane.f32.xlu0 %v6407_v58 }
0x2c76   : > { %v6409_v59 = vpop.xlane.xlu0 %6408 }
0x2c77   : > { %v6410_v60 = vmul.f32 0.03125, %v6409_v59 }
0x2c79   : > { %v6411_v61 = vadd.f32 1e-06, %v6410_v60 }
0x2c7b   : > { %7800 = vrsqrt.f32 %v6411_v61 }
0x2c85   : > { %v7801_v62 = vpop.eup %7800 }
0x2c86   : > { %v6413_v2 = vmul.f32 %v7801_v62, %v6405_v57 }
0x2c88   : > { %v6419_v5 = vmul.f32 %v6688_v63, %v6413_v2 }
0x2c8a   : > { %v6425_v9 = vadd.f32 %v6689_v4, %v6419_v5 }
0x2c8c   : > { %6427 = vst.msk [vmem:[%s8710_s8 + $0x8] sm:$0xff] %vm272_vm1, %v6425_v9 }
0x2c8d   : > { %7875 = shalt.err (!%p7872_p9)
}
0x2c8e   : > { %s7876_s7 = scalar_lea.hbm %s8826_s28, 256  ;;  %s7880_s29 = scalar_lea.hbm %s8879_s4, 512 }
0x2c8f   : > { %p7877_p1 = scmp.ne.s32.totalorder %s8826_s28, %s7876_s7  ;;  %p7881_p11 = scmp.lt.u32.totalorder %s8826_s28, %s8879_s4 }
0x2c90   : > { %p7882_p2 = scmp.lt.u32.totalorder %s7880_s29, %s7876_s7  ;;  %p7884_p6 = scmp.lt.u32.totalorder %s7876_s7, %s8826_s28 }
0x2c91   : > { %p7878_p0 = pnand %p7877_p1, %p8076_p12 }
0x2c92   : > { %p7883_p4 = por %p7882_p2, %p7881_p11 }
0x2c93   : > { %p7879_p5 = pneg %p7878_p0 }
0x2c94   : > { %p7885_p8 = por %p7884_p6, %p7883_p4 }
0x2c96   : > { %p7886_p10 = pnand %p7885_p8, %p7879_p5 }
0x2c98   : > { %7889 = shalt.err (!%p7886_p10)
}
0x2c99   : > { %s7956_s20 = smov 128  }
0x2c9a   : > { %7595 = dma.vmem_to_hbm [thread:$0]  (%p8076_p12), %s8828_s21, 256, %s8826_s28, %s6429_s10, %s7956_s20, %s7956_s20, %s7952_s26  }
0x2c9b PF: > { %s6457_s23 = sand.u32 1, %s7920_s15   ;;  %p8905_p13 = scmp.ne.s32.totalorder %s8891_s22, 0 }
0x2c9c   : > { %p8906_p3 = scmp.ge.s32.totalorder %s7932_s18, 2  ;;  %s6458_s13 = scalar_lea.sflag [#allocation4], %s6457_s23 }
0x2c9e   : > { %p7606_p7 = pnand %p8906_p3, %p8905_p13 }
0x2ca0   : > { %7915 = dma.done.wait (!%p7606_p7), %s6458_s13, 256  }
0x2ca1   : > { %7917 = vsyncadd (!%p7606_p7), %s6458_s13, 4294967040  ;;  %p18_p9 = scmp.ge.s32.totalorder %s8038_s27, 4   ;;  %s8907_s15 = smov %s7924_s16 }
0x2ca2   : > { %s8908_s16 = smov %s7928_s17  ;;  %s8909_s17 = smov %s8072_s24 }
0x2ca3   : > { %s8910_s18 = smov %s8038_s27  ;;  %20 = sbr.rel (!%p18_p9) target bundleno = 6 (0x6), region = 91 }
0x2caa   :  { %6463 = vsyncpa [#allocation3], 1 }
0x2cab   :  { %6465 = vsyncpa [#allocation3 + $0x1], 1 }
0x2cac   :  { %6466 = vsyncpa [#allocation6], 1 }
0x2cad   :  { %6467 = vsyncpa [#allocation4], 1 }
0x2cae   :  { %6469 = vsyncpa [#allocation4 + $0x1], 1 }

</bundles_post_ra>
